<compile_context>
chip_gen: v7x
topology: tpu7x:2x2x1
jax: 0.10.0
libtpu: 0.0.40
codegen_flags: <defaults>
</compile_context>

<pallas_src>
import jax
import jax.numpy as jnp
from jax import lax
from jax.experimental import pallas as pl
from jax.experimental.pallas import tpu as pltpu

EPS = 1e-5
LANE = 128


def _round_up(v, m):
    return -(-v // m) * m


def _dense_layer_kernel(x_ref, s1_ref, b1_ref, w1_ref, b2_ref, w2_ref,
                        yy_ref, xx_ref, o_ref):
    # x_ref : (1, H, W, Cp) f32   input, channels zero-padded to Cp
    # s1/b1 : (1, Cp)       f32   folded BN1 scale / bias (zero in padding)
    # w1    : (Cp, Ck)      bf16  1x1 conv weight with BN2 scale folded in
    # b2    : (1, Ck)       f32   folded BN2 bias
    # w2    : (9, Ck, Co)   bf16  3x3 conv weight, tap t = dy*3 + dx
    # yy/xx : (H*W, 1)      i32   per-pixel row / column coordinate
    # o_ref : (1, H, W, Co) f32
    _, H, W, Cp = x_ref.shape
    Co = w2_ref.shape[2]
    HW = H * W

    x = x_ref[0]                                              # (H, W, Cp)

    # ---- BN1 (folded) + ReLU -------------------------------------------
    h1 = jnp.maximum(x * s1_ref[0] + b1_ref[0], 0.0)

    # ---- 1x1 conv (BN2 scale pre-folded) + BN2 bias + ReLU --------------
    y1 = jnp.dot(h1.reshape(HW, Cp).astype(jnp.bfloat16), w1_ref[...],
                 preferred_element_type=jnp.float32)          # (HW, Ck) f32
    h2 = jnp.maximum(y1 + b2_ref[0], 0.0)                     # (HW, Ck) f32

    # ---- 3x3 conv, stride 1, pad 1: 9 shifted matmuls --------------------
    # Channels live on lanes, flattened pixels on sublanes, so each spatial
    # shift is a sublane roll (XLU) + a border mask (VPU); the accumulator is
    # initialized from the first tap's dot (no zeros + add).
    yy = yy_ref[...]                                          # (HW, 1) i32
    xx = xx_ref[...]                                          # (HW, 1) i32

    acc = None
    for dx in range(3):                                       # width taps
        if dx == 1:
            col = h2
        else:
            col = pltpu.roll(h2, shift=(-(dx - 1)) % HW, axis=0)
            xmask = (xx >= 1) if dx == 0 else (xx <= W - 2)
            col = jnp.where(xmask, col, 0.0)
        for dy in range(3):                                   # height taps
            op = col
            if dy != 1:
                op = pltpu.roll(op, shift=(-(dy - 1) * W) % HW, axis=0)
                ymask = (yy >= 1) if dy == 0 else (yy <= H - 2)
                op = jnp.where(ymask, op, 0.0)
            contrib = jnp.dot(op.astype(jnp.bfloat16), w2_ref[dy * 3 + dx],
                              preferred_element_type=jnp.float32)
            acc = contrib if acc is None else acc + contrib

    # Lane-dense store (Co is a multiple of 128); the reshape is a pure
    # regroup of the major dims when W is a multiple of 8.
    o_ref[0] = acc.reshape(H, W, Co).astype(o_ref.dtype)


def basic_dense_layer(prev_features_nchw, params):
    """prev_features_nchw: list of NCHW arrays; channels concat to num_input_features."""
    x = jnp.concatenate(prev_features_nchw, axis=1)           # (N, C, H, W)
    N, C, H, W = x.shape
    cmid = params["w1"].shape[0]                              # bn_size * growth_rate
    growth = params["w2"].shape[0]                            # growth_rate

    Cp = _round_up(C, LANE)
    Ck = _round_up(cmid, LANE)
    Co = _round_up(growth, LANE)

    # NCHW -> NHWC, zero-pad channels to a full lane multiple.
    x_nhwc = jnp.transpose(x, (0, 2, 3, 1)).astype(jnp.float32)
    x_p = jnp.pad(x_nhwc, ((0, 0), (0, 0), (0, 0), (0, Cp - C)))

    # Fold BatchNorm (eval mode) into per-channel scale/bias.
    # TODO(synk): PyTorch training-mode BN uses batch statistics; this kernel
    # implements eval-mode BN with running stats folded into scale/bias.
    s1 = params["g1"] / jnp.sqrt(params["v1"] + EPS)
    b1 = params["b1"] - params["m1"] * s1
    s2 = params["g2"] / jnp.sqrt(params["v2"] + EPS)
    b2 = params["b2"] - params["m2"] * s2

    s1_p = jnp.pad(s1, (0, Cp - C)).reshape(1, Cp)
    b1_p = jnp.pad(b1, (0, Cp - C)).reshape(1, Cp)
    b2_p = jnp.pad(b2, (0, Ck - cmid)).reshape(1, Ck)

    # conv1 weight OIHW (cmid, C, 1, 1) -> (C, cmid); fold BN2 scale into cols.
    w1 = jnp.transpose(params["w1"][:, :, 0, 0], (1, 0)) * s2[None, :]
    w1_p = jnp.pad(w1, ((0, Cp - C), (0, Ck - cmid))).astype(jnp.bfloat16)

    # conv2 weight OIHW (growth, cmid, 3, 3) -> (3,3,cmid,growth) -> (9, Ck, Co).
    w2 = jnp.transpose(params["w2"], (2, 3, 1, 0))
    w2_p = jnp.pad(w2, ((0, 0), (0, 0), (0, Ck - cmid), (0, Co - growth)))
    w2_p = w2_p.reshape(9, Ck, Co).astype(jnp.bfloat16)

    # Per-pixel (row, col) coordinates for the conv border masks.
    pix = jnp.arange(H * W, dtype=jnp.int32)
    yy_in = (pix // W).reshape(H * W, 1)
    xx_in = (pix % W).reshape(H * W, 1)

    # TODO(synk): dropout (drop_rate > 0) is not applied — inference path.
    # TODO(synk): for large H*W add a second "parallel" grid axis over H row
    # tiles (with a 1-row halo) so the pipeline overlaps DMA with compute and
    # both v7x TensorCores stay busy even for N == 1.
    out_nhwc = pl.pallas_call(
        _dense_layer_kernel,
        out_shape=jax.ShapeDtypeStruct((N, H, W, Co), jnp.float32),
        grid_spec=pltpu.PrefetchScalarGridSpec(
            num_scalar_prefetch=0,
            grid=(N,),
            in_specs=[
                pl.BlockSpec((1, H, W, Cp), lambda n: (n, 0, 0, 0)),
                pl.BlockSpec((1, Cp), lambda n: (0, 0)),
                pl.BlockSpec((1, Cp), lambda n: (0, 0)),
                pl.BlockSpec((Cp, Ck), lambda n: (0, 0)),
                pl.BlockSpec((1, Ck), lambda n: (0, 0)),
                pl.BlockSpec((9, Ck, Co), lambda n: (0, 0, 0)),
                pl.BlockSpec((H * W, 1), lambda n: (0, 0)),
                pl.BlockSpec((H * W, 1), lambda n: (0, 0)),
            ],
            out_specs=pl.BlockSpec((1, H, W, Co), lambda n: (n, 0, 0, 0)),
        ),
        compiler_params=pltpu.CompilerParams(
            dimension_semantics=("parallel",),
            vmem_limit_bytes=32 * 1024 * 1024,
        ),
    )(x_p, s1_p, b1_p, w1_p, b2_p, w2_p, yy_in, xx_in)

    # Drop channel padding, back to NCHW.
    return jnp.transpose(out_nhwc[..., :growth], (0, 3, 1, 2))


def ref_forward(prev_features_nchw, params):
    """Pure-JAX reference (NCHW, lax.conv) for verification."""
    x = jnp.concatenate(prev_features_nchw, axis=1)

    def bn(h, g, b, m, v):
        inv = g / jnp.sqrt(v + EPS)
        return h * inv[None, :, None, None] + (b - m * inv)[None, :, None, None]

    h = jax.nn.relu(bn(x, params["g1"], params["b1"], params["m1"], params["v1"]))
    h = lax.conv_general_dilated(h, params["w1"], (1, 1), "VALID",
                                 dimension_numbers=("NCHW", "OIHW", "NCHW"))
    h = jax.nn.relu(bn(h, params["g2"], params["b2"], params["m2"], params["v2"]))
    h = lax.conv_general_dilated(h, params["w2"], (1, 1), ((1, 1), (1, 1)),
                                 dimension_numbers=("NCHW", "OIHW", "NCHW"))
    return h


def make_params(key, num_input_features, growth_rate, bn_size):
    cmid = bn_size * growth_rate
    ks = jax.random.split(key, 10)
    return {
        # conv weights (deterministic synthetic init, OIHW like PyTorch)
        "w1": jax.random.normal(ks[0], (cmid, num_input_features, 1, 1),
                                jnp.float32) * 0.1,
        "w2": jax.random.normal(ks[1], (growth_rate, cmid, 3, 3),
                                jnp.float32) * 0.1,
        # BatchNorm1 affine + running stats
        "g1": 1.0 + 0.1 * jax.random.normal(ks[2], (num_input_features,), jnp.float32),
        "b1": 0.1 * jax.random.normal(ks[3], (num_input_features,), jnp.float32),
        "m1": 0.1 * jax.random.normal(ks[4], (num_input_features,), jnp.float32),
        "v1": 1.0 + 0.1 * jax.random.uniform(ks[5], (num_input_features,), jnp.float32),
        # BatchNorm2 affine + running stats
        "g2": 1.0 + 0.1 * jax.random.normal(ks[6], (cmid,), jnp.float32),
        "b2": 0.1 * jax.random.normal(ks[7], (cmid,), jnp.float32),
        "m2": 0.1 * jax.random.normal(ks[8], (cmid,), jnp.float32),
        "v2": 1.0 + 0.1 * jax.random.uniform(ks[9], (cmid,), jnp.float32),
    }


if __name__ == "__main__":
    num_input_features, growth_rate, bn_size = 6, 4, 4
    N, H, W = 2, 16, 16

    key = jax.random.PRNGKey(0)
    kp, kx1, kx2 = jax.random.split(key, 3)
    params = make_params(kp, num_input_features, growth_rate, bn_size)

    # Two "previous feature" tensors whose channels concat to num_input_features.
    c0 = num_input_features // 2
    x1 = jax.random.normal(kx1, (N, c0, H, W), jnp.float32)
    x2 = jax.random.normal(kx2, (N, num_input_features - c0, H, W), jnp.float32)
    prev_features = [x1, x2]

    out = jax.block_until_ready(basic_dense_layer(prev_features, params))
    ref = jax.block_until_ready(ref_forward(prev_features, params))

    assert out.shape == (N, growth_rate, H, W), out.shape
    err = float(jnp.max(jnp.abs(out - ref)))
    # bf16-fed MXU vs. f32 reference -> loosened tolerance.
    assert jnp.allclose(out, ref, atol=5e-2, rtol=5e-2), err

    print("KERNEL_OK")
</pallas_src>

<mosaic_0001>
module attributes {stable_mosaic.version = 11 : i64} {
  func.func @_dense_layer_kernel(%arg0: i32, %arg1: memref<1x16x16x128xf32, #tpu.memory_space<vmem>>, %arg2: memref<1x128xf32, #tpu.memory_space<vmem>>, %arg3: memref<1x128xf32, #tpu.memory_space<vmem>>, %arg4: memref<128x128xbf16, #tpu.memory_space<vmem>>, %arg5: memref<1x128xf32, #tpu.memory_space<vmem>>, %arg6: memref<9x128x128xbf16, #tpu.memory_space<vmem>>, %arg7: memref<256x1xi32, #tpu.memory_space<vmem>>, %arg8: memref<256x1xi32, #tpu.memory_space<vmem>>, %arg9: memref<1x16x16x128xf32, #tpu.memory_space<vmem>>) attributes {dimension_semantics = [#tpu.dimension_semantics<parallel>], iteration_bounds = array<i64: 2>, scalar_prefetch = 0 : i64, scratch_operands = 0 : i64, tpu.core_type = #tpu.core_type<tc>, window_params = [{transform_indices = @transform_0, window_bounds = array<i64: 1, 16, 16, 128>}, {pipeline_mode = #tpu.pipeline_mode<synchronous>, transform_indices = @transform_1, window_bounds = array<i64: 1, 128>}, {pipeline_mode = #tpu.pipeline_mode<synchronous>, transform_indices = @transform_2, window_bounds = array<i64: 1, 128>}, {pipeline_mode = #tpu.pipeline_mode<synchronous>, transform_indices = @transform_3, window_bounds = array<i64: 128, 128>}, {pipeline_mode = #tpu.pipeline_mode<synchronous>, transform_indices = @transform_4, window_bounds = array<i64: 1, 128>}, {pipeline_mode = #tpu.pipeline_mode<synchronous>, transform_indices = @transform_5, window_bounds = array<i64: 9, 128, 128>}, {pipeline_mode = #tpu.pipeline_mode<synchronous>, transform_indices = @transform_6, window_bounds = array<i64: 256, 1>}, {pipeline_mode = #tpu.pipeline_mode<synchronous>, transform_indices = @transform_7, window_bounds = array<i64: 256, 1>}, {transform_indices = @transform_8, window_bounds = array<i64: 1, 16, 16, 128>}]} {
    %c0 = arith.constant 0 : index
    %c0_0 = arith.constant 0 : index
    %c0_1 = arith.constant 0 : index
    %c0_2 = arith.constant 0 : index
    %0 = vector.load %arg1[%c0, %c0_0, %c0_1, %c0_2] : memref<1x16x16x128xf32, #tpu.memory_space<vmem>>, vector<1x16x16x128xf32>
    %1 = vector.shape_cast %0 : vector<1x16x16x128xf32> to vector<16x16x128xf32>
    %c0_3 = arith.constant 0 : index
    %c0_4 = arith.constant 0 : index
    %2 = vector.load %arg2[%c0_3, %c0_4] : memref<1x128xf32, #tpu.memory_space<vmem>>, vector<1x128xf32>
    %3 = vector.shape_cast %2 : vector<1x128xf32> to vector<128xf32>
    %4 = vector.shape_cast %3 : vector<128xf32> to vector<1x1x128xf32>
    %5 = vector.broadcast %4 : vector<1x1x128xf32> to vector<16x16x128xf32>
    %6 = arith.mulf %1, %5 : vector<16x16x128xf32>
    %c0_5 = arith.constant 0 : index
    %c0_6 = arith.constant 0 : index
    %7 = vector.load %arg3[%c0_5, %c0_6] : memref<1x128xf32, #tpu.memory_space<vmem>>, vector<1x128xf32>
    %8 = vector.shape_cast %7 : vector<1x128xf32> to vector<128xf32>
    %9 = vector.shape_cast %8 : vector<128xf32> to vector<1x1x128xf32>
    %10 = vector.broadcast %9 : vector<1x1x128xf32> to vector<16x16x128xf32>
    %11 = arith.addf %6, %10 : vector<16x16x128xf32>
    %cst = arith.constant 0.000000e+00 : f32
    %12 = vector.broadcast %cst : f32 to vector<16x16x128xf32>
    %13 = arith.maximumf %11, %12 : vector<16x16x128xf32>
    %14 = vector.shape_cast %13 : vector<16x16x128xf32> to vector<256x128xf32>
    %15 = arith.truncf %14 : vector<256x128xf32> to vector<256x128xbf16>
    %c0_7 = arith.constant 0 : index
    %c0_8 = arith.constant 0 : index
    %16 = vector.load %arg4[%c0_7, %c0_8] : memref<128x128xbf16, #tpu.memory_space<vmem>>, vector<128x128xbf16>
    %cst_9 = arith.constant dense<0.000000e+00> : vector<256x128xf32>
    %17 = tpu.matmul %15, %16, %cst_9 {dimension_numbers = #tpu.dot_dimension_numbers<[1], [0], [0], [1], [0, 0, 1, 1], [], []>} : vector<256x128xbf16>, vector<128x128xbf16>, vector<256x128xf32> -> vector<256x128xf32>
    %c0_10 = arith.constant 0 : index
    %c0_11 = arith.constant 0 : index
    %18 = vector.load %arg5[%c0_10, %c0_11] : memref<1x128xf32, #tpu.memory_space<vmem>>, vector<1x128xf32>
    %19 = vector.shape_cast %18 : vector<1x128xf32> to vector<128xf32>
    %20 = vector.shape_cast %19 : vector<128xf32> to vector<1x128xf32>
    %21 = vector.broadcast %20 : vector<1x128xf32> to vector<256x128xf32>
    %22 = arith.addf %17, %21 : vector<256x128xf32>
    %cst_12 = arith.constant 0.000000e+00 : f32
    %23 = vector.broadcast %cst_12 : f32 to vector<256x128xf32>
    %24 = arith.maximumf %22, %23 : vector<256x128xf32>
    %c0_13 = arith.constant 0 : index
    %c0_14 = arith.constant 0 : index
    %25 = vector.load %arg7[%c0_13, %c0_14] : memref<256x1xi32, #tpu.memory_space<vmem>>, vector<256x1xi32>
    %c0_15 = arith.constant 0 : index
    %c0_16 = arith.constant 0 : index
    %26 = vector.load %arg8[%c0_15, %c0_16] : memref<256x1xi32, #tpu.memory_space<vmem>>, vector<256x1xi32>
    %c1_i32 = arith.constant 1 : i32
    %27 = tpu.dynamic_rotate %24 by %c1_i32 dim 0 : vector<256x128xf32>, i32 -> vector<256x128xf32>
    %c1_i32_17 = arith.constant 1 : i32
    %28 = vector.broadcast %c1_i32_17 : i32 to vector<256x1xi32>
    %29 = arith.cmpi sge, %26, %28 : vector<256x1xi32>
    %cst_18 = arith.constant 0.000000e+00 : f32
    %30 = vector.shape_cast %29 : vector<256x1xi1> to vector<256x1xi1>
    %31 = vector.broadcast %30 : vector<256x1xi1> to vector<256x128xi1>
    %32 = vector.broadcast %cst_18 : f32 to vector<256x128xf32>
    %33 = arith.select %31, %27, %32 : vector<256x128xi1>, vector<256x128xf32>
    %c16_i32 = arith.constant 16 : i32
    %34 = tpu.dynamic_rotate %33 by %c16_i32 dim 0 : vector<256x128xf32>, i32 -> vector<256x128xf32>
    %c1_i32_19 = arith.constant 1 : i32
    %35 = vector.broadcast %c1_i32_19 : i32 to vector<256x1xi32>
    %36 = arith.cmpi sge, %25, %35 : vector<256x1xi32>
    %cst_20 = arith.constant 0.000000e+00 : f32
    %37 = vector.shape_cast %36 : vector<256x1xi1> to vector<256x1xi1>
    %38 = vector.broadcast %37 : vector<256x1xi1> to vector<256x128xi1>
    %39 = vector.broadcast %cst_20 : f32 to vector<256x128xf32>
    %40 = arith.select %38, %34, %39 : vector<256x128xi1>, vector<256x128xf32>
    %41 = arith.truncf %40 : vector<256x128xf32> to vector<256x128xbf16>
    %c0_21 = arith.constant 0 : index
    %c0_22 = arith.constant 0 : index
    %c0_23 = arith.constant 0 : index
    %42 = vector.load %arg6[%c0_21, %c0_22, %c0_23] : memref<9x128x128xbf16, #tpu.memory_space<vmem>>, vector<1x128x128xbf16>
    %43 = vector.shape_cast %42 : vector<1x128x128xbf16> to vector<128x128xbf16>
    %cst_24 = arith.constant dense<0.000000e+00> : vector<256x128xf32>
    %44 = tpu.matmul %41, %43, %cst_24 {dimension_numbers = #tpu.dot_dimension_numbers<[1], [0], [0], [1], [0, 0, 1, 1], [], []>} : vector<256x128xbf16>, vector<128x128xbf16>, vector<256x128xf32> -> vector<256x128xf32>
    %45 = arith.truncf %33 : vector<256x128xf32> to vector<256x128xbf16>
    %c3 = arith.constant 3 : index
    %c0_25 = arith.constant 0 : index
    %c0_26 = arith.constant 0 : index
    %46 = vector.load %arg6[%c3, %c0_25, %c0_26] : memref<9x128x128xbf16, #tpu.memory_space<vmem>>, vector<1x128x128xbf16>
    %47 = vector.shape_cast %46 : vector<1x128x128xbf16> to vector<128x128xbf16>
    %cst_27 = arith.constant dense<0.000000e+00> : vector<256x128xf32>
    %48 = tpu.matmul %45, %47, %cst_27 {dimension_numbers = #tpu.dot_dimension_numbers<[1], [0], [0], [1], [0, 0, 1, 1], [], []>} : vector<256x128xbf16>, vector<128x128xbf16>, vector<256x128xf32> -> vector<256x128xf32>
    %49 = arith.addf %44, %48 : vector<256x128xf32>
    %c240_i32 = arith.constant 240 : i32
    %50 = tpu.dynamic_rotate %33 by %c240_i32 dim 0 : vector<256x128xf32>, i32 -> vector<256x128xf32>
    %c14_i32 = arith.constant 14 : i32
    %51 = vector.broadcast %c14_i32 : i32 to vector<256x1xi32>
    %52 = arith.cmpi sle, %25, %51 : vector<256x1xi32>
    %cst_28 = arith.constant 0.000000e+00 : f32
    %53 = vector.shape_cast %52 : vector<256x1xi1> to vector<256x1xi1>
    %54 = vector.broadcast %53 : vector<256x1xi1> to vector<256x128xi1>
    %55 = vector.broadcast %cst_28 : f32 to vector<256x128xf32>
    %56 = arith.select %54, %50, %55 : vector<256x128xi1>, vector<256x128xf32>
    %57 = arith.truncf %56 : vector<256x128xf32> to vector<256x128xbf16>
    %c6 = arith.constant 6 : index
    %c0_29 = arith.constant 0 : index
    %c0_30 = arith.constant 0 : index
    %58 = vector.load %arg6[%c6, %c0_29, %c0_30] : memref<9x128x128xbf16, #tpu.memory_space<vmem>>, vector<1x128x128xbf16>
    %59 = vector.shape_cast %58 : vector<1x128x128xbf16> to vector<128x128xbf16>
    %cst_31 = arith.constant dense<0.000000e+00> : vector<256x128xf32>
    %60 = tpu.matmul %57, %59, %cst_31 {dimension_numbers = #tpu.dot_dimension_numbers<[1], [0], [0], [1], [0, 0, 1, 1], [], []>} : vector<256x128xbf16>, vector<128x128xbf16>, vector<256x128xf32> -> vector<256x128xf32>
    %61 = arith.addf %49, %60 : vector<256x128xf32>
    %c16_i32_32 = arith.constant 16 : i32
    %62 = tpu.dynamic_rotate %24 by %c16_i32_32 dim 0 : vector<256x128xf32>, i32 -> vector<256x128xf32>
    %c1_i32_33 = arith.constant 1 : i32
    %63 = vector.broadcast %c1_i32_33 : i32 to vector<256x1xi32>
    %64 = arith.cmpi sge, %25, %63 : vector<256x1xi32>
    %cst_34 = arith.constant 0.000000e+00 : f32
    %65 = vector.shape_cast %64 : vector<256x1xi1> to vector<256x1xi1>
    %66 = vector.broadcast %65 : vector<256x1xi1> to vector<256x128xi1>
    %67 = vector.broadcast %cst_34 : f32 to vector<256x128xf32>
    %68 = arith.select %66, %62, %67 : vector<256x128xi1>, vector<256x128xf32>
    %69 = arith.truncf %68 : vector<256x128xf32> to vector<256x128xbf16>
    %c1 = arith.constant 1 : index
    %c0_35 = arith.constant 0 : index
    %c0_36 = arith.constant 0 : index
    %70 = vector.load %arg6[%c1, %c0_35, %c0_36] : memref<9x128x128xbf16, #tpu.memory_space<vmem>>, vector<1x128x128xbf16>
    %71 = vector.shape_cast %70 : vector<1x128x128xbf16> to vector<128x128xbf16>
    %cst_37 = arith.constant dense<0.000000e+00> : vector<256x128xf32>
    %72 = tpu.matmul %69, %71, %cst_37 {dimension_numbers = #tpu.dot_dimension_numbers<[1], [0], [0], [1], [0, 0, 1, 1], [], []>} : vector<256x128xbf16>, vector<128x128xbf16>, vector<256x128xf32> -> vector<256x128xf32>
    %73 = arith.addf %61, %72 : vector<256x128xf32>
    %74 = arith.truncf %24 : vector<256x128xf32> to vector<256x128xbf16>
    %c4 = arith.constant 4 : index
    %c0_38 = arith.constant 0 : index
    %c0_39 = arith.constant 0 : index
    %75 = vector.load %arg6[%c4, %c0_38, %c0_39] : memref<9x128x128xbf16, #tpu.memory_space<vmem>>, vector<1x128x128xbf16>
    %76 = vector.shape_cast %75 : vector<1x128x128xbf16> to vector<128x128xbf16>
    %cst_40 = arith.constant dense<0.000000e+00> : vector<256x128xf32>
    %77 = tpu.matmul %74, %76, %cst_40 {dimension_numbers = #tpu.dot_dimension_numbers<[1], [0], [0], [1], [0, 0, 1, 1], [], []>} : vector<256x128xbf16>, vector<128x128xbf16>, vector<256x128xf32> -> vector<256x128xf32>
    %78 = arith.addf %73, %77 : vector<256x128xf32>
    %c240_i32_41 = arith.constant 240 : i32
    %79 = tpu.dynamic_rotate %24 by %c240_i32_41 dim 0 : vector<256x128xf32>, i32 -> vector<256x128xf32>
    %c14_i32_42 = arith.constant 14 : i32
    %80 = vector.broadcast %c14_i32_42 : i32 to vector<256x1xi32>
    %81 = arith.cmpi sle, %25, %80 : vector<256x1xi32>
    %cst_43 = arith.constant 0.000000e+00 : f32
    %82 = vector.shape_cast %81 : vector<256x1xi1> to vector<256x1xi1>
    %83 = vector.broadcast %82 : vector<256x1xi1> to vector<256x128xi1>
    %84 = vector.broadcast %cst_43 : f32 to vector<256x128xf32>
    %85 = arith.select %83, %79, %84 : vector<256x128xi1>, vector<256x128xf32>
    %86 = arith.truncf %85 : vector<256x128xf32> to vector<256x128xbf16>
    %c7 = arith.constant 7 : index
    %c0_44 = arith.constant 0 : index
    %c0_45 = arith.constant 0 : index
    %87 = vector.load %arg6[%c7, %c0_44, %c0_45] : memref<9x128x128xbf16, #tpu.memory_space<vmem>>, vector<1x128x128xbf16>
    %88 = vector.shape_cast %87 : vector<1x128x128xbf16> to vector<128x128xbf16>
    %cst_46 = arith.constant dense<0.000000e+00> : vector<256x128xf32>
    %89 = tpu.matmul %86, %88, %cst_46 {dimension_numbers = #tpu.dot_dimension_numbers<[1], [0], [0], [1], [0, 0, 1, 1], [], []>} : vector<256x128xbf16>, vector<128x128xbf16>, vector<256x128xf32> -> vector<256x128xf32>
    %90 = arith.addf %78, %89 : vector<256x128xf32>
    %c255_i32 = arith.constant 255 : i32
    %91 = tpu.dynamic_rotate %24 by %c255_i32 dim 0 : vector<256x128xf32>, i32 -> vector<256x128xf32>
    %c14_i32_47 = arith.constant 14 : i32
    %92 = vector.broadcast %c14_i32_47 : i32 to vector<256x1xi32>
    %93 = arith.cmpi sle, %26, %92 : vector<256x1xi32>
    %cst_48 = arith.constant 0.000000e+00 : f32
    %94 = vector.shape_cast %93 : vector<256x1xi1> to vector<256x1xi1>
    %95 = vector.broadcast %94 : vector<256x1xi1> to vector<256x128xi1>
    %96 = vector.broadcast %cst_48 : f32 to vector<256x128xf32>
    %97 = arith.select %95, %91, %96 : vector<256x128xi1>, vector<256x128xf32>
    %c16_i32_49 = arith.constant 16 : i32
    %98 = tpu.dynamic_rotate %97 by %c16_i32_49 dim 0 : vector<256x128xf32>, i32 -> vector<256x128xf32>
    %c1_i32_50 = arith.constant 1 : i32
    %99 = vector.broadcast %c1_i32_50 : i32 to vector<256x1xi32>
    %100 = arith.cmpi sge, %25, %99 : vector<256x1xi32>
    %cst_51 = arith.constant 0.000000e+00 : f32
    %101 = vector.shape_cast %100 : vector<256x1xi1> to vector<256x1xi1>
    %102 = vector.broadcast %101 : vector<256x1xi1> to vector<256x128xi1>
    %103 = vector.broadcast %cst_51 : f32 to vector<256x128xf32>
    %104 = arith.select %102, %98, %103 : vector<256x128xi1>, vector<256x128xf32>
    %105 = arith.truncf %104 : vector<256x128xf32> to vector<256x128xbf16>
    %c2 = arith.constant 2 : index
    %c0_52 = arith.constant 0 : index
    %c0_53 = arith.constant 0 : index
    %106 = vector.load %arg6[%c2, %c0_52, %c0_53] : memref<9x128x128xbf16, #tpu.memory_space<vmem>>, vector<1x128x128xbf16>
    %107 = vector.shape_cast %106 : vector<1x128x128xbf16> to vector<128x128xbf16>
    %cst_54 = arith.constant dense<0.000000e+00> : vector<256x128xf32>
    %108 = tpu.matmul %105, %107, %cst_54 {dimension_numbers = #tpu.dot_dimension_numbers<[1], [0], [0], [1], [0, 0, 1, 1], [], []>} : vector<256x128xbf16>, vector<128x128xbf16>, vector<256x128xf32> -> vector<256x128xf32>
    %109 = arith.addf %90, %108 : vector<256x128xf32>
    %110 = arith.truncf %97 : vector<256x128xf32> to vector<256x128xbf16>
    %c5 = arith.constant 5 : index
    %c0_55 = arith.constant 0 : index
    %c0_56 = arith.constant 0 : index
    %111 = vector.load %arg6[%c5, %c0_55, %c0_56] : memref<9x128x128xbf16, #tpu.memory_space<vmem>>, vector<1x128x128xbf16>
    %112 = vector.shape_cast %111 : vector<1x128x128xbf16> to vector<128x128xbf16>
    %cst_57 = arith.constant dense<0.000000e+00> : vector<256x128xf32>
    %113 = tpu.matmul %110, %112, %cst_57 {dimension_numbers = #tpu.dot_dimension_numbers<[1], [0], [0], [1], [0, 0, 1, 1], [], []>} : vector<256x128xbf16>, vector<128x128xbf16>, vector<256x128xf32> -> vector<256x128xf32>
    %114 = arith.addf %109, %113 : vector<256x128xf32>
    %c240_i32_58 = arith.constant 240 : i32
    %115 = tpu.dynamic_rotate %97 by %c240_i32_58 dim 0 : vector<256x128xf32>, i32 -> vector<256x128xf32>
    %c14_i32_59 = arith.constant 14 : i32
    %116 = vector.broadcast %c14_i32_59 : i32 to vector<256x1xi32>
    %117 = arith.cmpi sle, %25, %116 : vector<256x1xi32>
    %cst_60 = arith.constant 0.000000e+00 : f32
    %118 = vector.shape_cast %117 : vector<256x1xi1> to vector<256x1xi1>
    %119 = vector.broadcast %118 : vector<256x1xi1> to vector<256x128xi1>
    %120 = vector.broadcast %cst_60 : f32 to vector<256x128xf32>
    %121 = arith.select %119, %115, %120 : vector<256x128xi1>, vector<256x128xf32>
    %122 = arith.truncf %121 : vector<256x128xf32> to vector<256x128xbf16>
    %c8 = arith.constant 8 : index
    %c0_61 = arith.constant 0 : index
    %c0_62 = arith.constant 0 : index
    %123 = vector.load %arg6[%c8, %c0_61, %c0_62] : memref<9x128x128xbf16, #tpu.memory_space<vmem>>, vector<1x128x128xbf16>
    %124 = vector.shape_cast %123 : vector<1x128x128xbf16> to vector<128x128xbf16>
    %cst_63 = arith.constant dense<0.000000e+00> : vector<256x128xf32>
    %125 = tpu.matmul %122, %124, %cst_63 {dimension_numbers = #tpu.dot_dimension_numbers<[1], [0], [0], [1], [0, 0, 1, 1], [], []>} : vector<256x128xbf16>, vector<128x128xbf16>, vector<256x128xf32> -> vector<256x128xf32>
    %126 = arith.addf %114, %125 : vector<256x128xf32>
    %127 = vector.shape_cast %126 : vector<256x128xf32> to vector<16x16x128xf32>
    %c0_64 = arith.constant 0 : index
    %c0_65 = arith.constant 0 : index
    %c0_66 = arith.constant 0 : index
    %c0_67 = arith.constant 0 : index
    %128 = vector.load %arg9[%c0_64, %c0_65, %c0_66, %c0_67] : memref<1x16x16x128xf32, #tpu.memory_space<vmem>>, vector<1x16x16x128xf32>
    %129 = vector.shape_cast %128 : vector<1x16x16x128xf32> to vector<16x16x128xf32>
    %130 = vector.shape_cast %127 : vector<16x16x128xf32> to vector<1x16x16x128xf32>
    tpu.vector_store %arg9[%c0_64, %c0_65, %c0_66, %c0_67], %130 {strides = array<i32>} : memref<1x16x16x128xf32, #tpu.memory_space<vmem>>, vector<1x16x16x128xf32>,
    return
  }
  func.func @transform_0(%arg0: i32) -> (i32, i32, i32, i32) {
    %c0_i32 = arith.constant 0 : i32
    %c0_i32_0 = arith.constant 0 : i32
    %c0_i32_1 = arith.constant 0 : i32
    %c0_i32_2 = arith.constant 0 : i32
    return %arg0, %c0_i32, %c0_i32_0, %c0_i32_1 : i32, i32, i32, i32
  }
  func.func @transform_1(%arg0: i32) -> (i32, i32) {
    %c0_i32 = arith.constant 0 : i32
    %c0_i32_0 = arith.constant 0 : i32
    %c0_i32_1 = arith.constant 0 : i32
    return %c0_i32, %c0_i32_0 : i32, i32
  }
  func.func @transform_2(%arg0: i32) -> (i32, i32) {
    %c0_i32 = arith.constant 0 : i32
    %c0_i32_0 = arith.constant 0 : i32
    %c0_i32_1 = arith.constant 0 : i32
    return %c0_i32, %c0_i32_0 : i32, i32
  }
  func.func @transform_3(%arg0: i32) -> (i32, i32) {
    %c0_i32 = arith.constant 0 : i32
    %c0_i32_0 = arith.constant 0 : i32
    %c0_i32_1 = arith.constant 0 : i32
    return %c0_i32, %c0_i32_0 : i32, i32
  }
  func.func @transform_4(%arg0: i32) -> (i32, i32) {
    %c0_i32 = arith.constant 0 : i32
    %c0_i32_0 = arith.constant 0 : i32
    %c0_i32_1 = arith.constant 0 : i32
    return %c0_i32, %c0_i32_0 : i32, i32
  }
  func.func @transform_5(%arg0: i32) -> (i32, i32, i32) {
    %c0_i32 = arith.constant 0 : i32
    %c0_i32_0 = arith.constant 0 : i32
    %c0_i32_1 = arith.constant 0 : i32
    %c0_i32_2 = arith.constant 0 : i32
    return %c0_i32, %c0_i32_0, %c0_i32_1 : i32, i32, i32
  }
  func.func @transform_6(%arg0: i32) -> (i32, i32) {
    %c0_i32 = arith.constant 0 : i32
    %c0_i32_0 = arith.constant 0 : i32
    %c0_i32_1 = arith.constant 0 : i32
    return %c0_i32, %c0_i32_0 : i32, i32
  }
  func.func @transform_7(%arg0: i32) -> (i32, i32) {
    %c0_i32 = arith.constant 0 : i32
    %c0_i32_0 = arith.constant 0 : i32
    %c0_i32_1 = arith.constant 0 : i32
    return %c0_i32, %c0_i32_0 : i32, i32
  }
  func.func @transform_8(%arg0: i32) -> (i32, i32, i32, i32) {
    %c0_i32 = arith.constant 0 : i32
    %c0_i32_0 = arith.constant 0 : i32
    %c0_i32_1 = arith.constant 0 : i32
    %c0_i32_2 = arith.constant 0 : i32
    return %arg0, %c0_i32, %c0_i32_0, %c0_i32_1 : i32, i32, i32, i32
  }
}

</mosaic_0001>

<bundles_post_ra>
// kernel: tpu_custom_call.1
= control target key start
LH: loop header
LB: loop body
LE: loop exit
PB: predicated region body
PF: predicated region fallthrough
CT: control target
= control target key end

     0   :  { %13 = vsyncpa [#allocation3], 0  ;;  %s9208_s0 = inlined_call_operand.vmem [shape: f32[2,16,16,128], index: 0, kind: input, shape index: {}]   ;;  %s9209_s1 = inlined_call_operand.vmem [shape: f32[1,128], index: 1, kind: input, shape index: {}]   ;;  %s9210_s2 = inlined_call_operand.vmem [shape: f32[1,128], index: 2, kind: input, shape index: {}]   ;;  %s9211_s3 = inlined_call_operand.hbm [shape: bf16[128,128], index: 3, kind: input, shape index: {}]   ;;  %s9212_s4 = inlined_call_operand.vmem [shape: f32[1,128], index: 4, kind: input, shape index: {}]   ;;  %s9213_s5 = inlined_call_operand.hbm [shape: bf16[9,128,128], index: 5, kind: input, shape index: {}]   ;;  %s9214_s6 = inlined_call_operand.vmem [shape: s32[256,1], index: 6, kind: input, shape index: {}]   ;;  %s9215_s7 = inlined_call_operand.vmem [shape: s32[256,1], index: 7, kind: input, shape index: {}]   ;;  %s9216_s8 = inlined_call_operand.hbm [shape: f32[2,16,16,128], index: 8, kind: output, shape index: {}]  }
   0x1   :  { %14 = vsyncpa [#allocation6], 0 }
   0x2   :  { %15 = vsyncpa [#allocation4], 0 }
   0x3   :  { %17 = vsyncpa [#allocation4 + $0x1], 0  ;;  %s6332_s27 = smov 0   ;;  %s6334_s28 = smov 0  }
   0x4   :  { %s6336_s29 = smov 0   ;;  %s6338_s30 = smov 0  }
   0x5 LB: > { %9488 = sst [smem:[#allocation11_spill]] %s6273_s29  ;;  %s6353_s9 = sadd.s32 4294967295, %s6277_s30   ;;  %s6277_s30 = sphi %s6338_s30, %s10254_s30   ;;  %s6273_s29 = sphi %s6336_s29, %s10251_s29   ;;  %s6269_s28 = sphi %s6334_s28, %s10253_s28   ;;  %s6265_s27 = sphi %s6332_s27, %s10252_s27  }
   0x6   : > { %s4508_s10 = sadd.s32 4294967294, %s6277_s30   ;;  %s6357_s11 = sadd.s32 1, %s6277_s30  }
   0x7   : > { %s203_s12 = sadd.s32 1, %s6273_s29  ;;  %s200_s13 = ssub.s32 %s6277_s30, %s6357_s11 }
   0x8   : > { %p213_p0 = scmp.ne.s32.totalorder %s6273_s29, %s6269_s28  ;;  %p201_p1 = scmp.eq.s32.totalorder %s200_s13, 0 }
   0x9   : > { %p214_p2 = scmp.eq.s32.totalorder %s6353_s9, 1  ;;  %p219_p3 = scmp.ne.s32.totalorder %s6269_s28, %s6265_s27 }
   0xa   : > { %p220_p4 = scmp.eq.s32.totalorder %s4508_s10, 1  ;;  %p4509_p7 = scmp.ge.s32.totalorder %s6277_s30, 1 }
   0xb   : > { %s6368_s14 = scalar_select %p201_p1, %s6273_s29, %s203_s12  }
   0xc   : > { %p6370_p5 = por %p214_p2, %p213_p0  ;;  %p6374_p6 = por %p220_p4, %p219_p3 }
   0xd   : > { %9489 = sst [smem:[#allocation12_spill]] %s6368_s14  ;;  %p227_p8 = scmp.lt.s32.totalorder %s6277_s30, 3 }
   0xe   : > { %s9490_s15 = scalar_select %p6370_p5, 1, 0 }
   0xf   : > { %s9491_s16 = scalar_select %p6374_p6, 1, 0 }
  0x10   : > { %p9217_p9 = scmp.eq.s32.totalorder %s6353_s9, 0  ;;  %p6381_p10 = pnand %p4509_p7, %p227_p8 }
  0x11   : > { %s6279_s18 = smov [#allocation2]   ;;  %s6280_s21 = smov [#allocation5]  }
  0x12   : > { %s9492_s17 = scalar_select %p6381_p10, 1, 0 }
  0x13   : > { %s245_s19 = sshll.u32 %s6279_s18, 4  ;;  %p5979_p11 = pneg %p6381_p10  ;;  %s246_s19 = int_to_ptr.vmem [resolvable:$true] %s245_s19 }
  0x14   : > { %s261_s22 = sshll.u32 %s6280_s21, 4  ;;  %s6151_s25 = scalar_lea.hbm %s9211_s3, 1024  ;;  %s6393_s22 = int_to_ptr.vmem [resolvable:$true] %s261_s22 }
  0x15   : > { %p6389_p12 = pnand %p9217_p9, %p5979_p11  ;;  %p6152_p13 = scmp.ne.s32.totalorder %s9211_s3, %s6151_s25 }
  0x16   : > { %p6158_p3 = scmp.lt.u32.totalorder %s6151_s25, %s9211_s3 }
  0x17   : > { %p6153_p0 = pneg %p6389_p12 }
  0x19   : > { %p6154_p1 = pnand %p6153_p0, %p6152_p13 }
  0x1b   : > { %p6155_p2 = pneg %p6154_p1 }
  0x1d   : > { %p6160_p4 = pnand %p6158_p3, %p6155_p2 }
  0x1f   : > { %6163 = shalt.err (!%p6160_p4)
}
  0x20   : > { %s6164_s18 = scalar_lea.vmem %s246_s19, 1024  ;;  %p6172_p9 = scmp.lt.s32.totalorder %s246_s19, %s246_s19 }
  0x21   : > { %p6165_p7 = scmp.ne.s32.totalorder %s246_s19, %s6164_s18  ;;  %p6173_p6 = scmp.lt.s32.totalorder %s6164_s18, %s6164_s18 }
  0x23   : > { %p6167_p8 = pnand %p6165_p7, %p6153_p0  ;;  %p6174_p5 = por %p6173_p6, %p6172_p9 }
  0x25   : > { %p6168_p11 = pneg %p6167_p8 }
  0x27   : > { %p6175_p10 = pnand %p6174_p5, %p6168_p11 }
  0x29   : > { %6178 = shalt.err (!%p6175_p10)
}
  0x2a   : > { %s6281_s21 = smov 64   ;;  %s6282_s23 = smov 4  }
  0x2b   : > { %5982 = dma.hbm_to_vmem [thread:$0]  (!%p6389_p12), %s9211_s3, 1024, %s246_s19, [#allocation3], %s6281_s21, %s6281_s21, %s6282_s23  }
  0x2c   : > { %s6179_s12 = scalar_lea.hbm %s9213_s5, 9216 }
  0x2d   : > { %p6180_p13 = scmp.ne.s32.totalorder %s9213_s5, %s6179_s12  ;;  %p6186_p9 = scmp.lt.u32.totalorder %s6179_s12, %s9213_s5 }
  0x2f   : > { %p6182_p5 = pnand %p6180_p13, %p6153_p0 }
  0x31   : > { %p6183_p6 = pneg %p6182_p5 }
  0x33   : > { %p6188_p10 = pnand %p6186_p9, %p6183_p6 }
  0x35   : > { %6191 = shalt.err (!%p6188_p10)
}
  0x36   : > { %s6192_s19 = scalar_lea.vmem %s6393_s22, 9216  ;;  %p6200_p4 = scmp.lt.s32.totalorder %s6393_s22, %s6393_s22 }
  0x37   : > { %p6193_p1 = scmp.ne.s32.totalorder %s6393_s22, %s6192_s19  ;;  %p6201_p7 = scmp.lt.s32.totalorder %s6192_s19, %s6192_s19 }
  0x39   : > { %p6195_p2 = pnand %p6193_p1, %p6153_p0  ;;  %p6202_p8 = por %p6201_p7, %p6200_p4 }
  0x3b   : > { %p6196_p3 = pneg %p6195_p2 }
  0x3d   : > { %p6203_p11 = pnand %p6202_p8, %p6196_p3 }
  0x3f   : > { %6206 = shalt.err (!%p6203_p11)
}
  0x40   : > { %5985 = dma.hbm_to_vmem [thread:$0]  (!%p6389_p12), %s9213_s5, 9216, %s6393_s22, [#allocation6], %s6281_s21, %s6281_s21, %s6282_s23  }
  0x41   : > { %p9494_p13 = scmp.ne.s32.totalorder %s9492_s17, 0 }
  0x43   : > { %291 = sbr.rel (%p9494_p13) target bundleno = 916 (0x394), region = 52 }
  0x4a   : > { %p9495_p5 = scmp.eq.s32.totalorder %s6353_s9, 0 }
  0x4c   : > { %6252 = dma.done.wait (%p9495_p5), [#allocation3], 1024   ;;  %p9496_p0 = pmov %p9495_p5 }
  0x4e   : > { %6254 = vsyncadd (%p9496_p0), [#allocation3], 4294966272  ;;  %p9497_p6 = pmov %p9496_p0 }
  0x4f   : > { %p9498_p9 = pmov %p9496_p0 }
  0x50   : > { %6256 = dma.done.wait (%p9497_p6), [#allocation6], 9216  }
  0x51   : > { %6258 = vsyncadd (%p9498_p9), [#allocation6], 4294958080  ;;  %v6283_v0 = vmov 0   ;;  %v789_v1 = vld [vmem:[%s9215_s7] sm:$0xff]  ;;  %p329_p12 = scmp.lt.s32.totalorder %s6353_s9, 1  ;;  %v790_v4 = vld [vmem:[%s9215_s7 + $0x8] sm:$0xff] }
  0x52   : > { %6035 = vset.pattern.permute.xlu1 %v6283_v0  ;;  %6034 = vset.pattern.permute.xlu0 %v6283_v0  ;;  %v757_v2 = vld [vmem:[%s9214_s6] sm:$0xff]  ;;  %vm888_vm0 = vcmp.ge.s32.totalorder %v789_v1, 1  ;;  %vm889_vm2 = vcmp.ge.s32.totalorder %v790_v4, 1  ;;  %v758_v7 = vld [vmem:[%s9214_s6 + $0x8] sm:$0xff]  ;;  %v791_v9 = vld [vmem:[%s9215_s7 + $0x10] sm:$0xff]  ;;  %s4992_s21 = sshll.u32 %s6353_s9, 12 }
  0x53   : > { %vm1819_vm1 = vcmp.le.s32.totalorder %v757_v2, 14  ;;  %v6036_v3 = vld [vmem:[#allocation2] sm:$0xff]   ;;  %v920_v5 = vsel %vm888_vm0, 1, %v6283_v0  ;;  %vm1820_vm3 = vcmp.le.s32.totalorder %v758_v7, 14  ;;  %v6037_v8 = vld [vmem:[#allocation2 + $0x8] sm:$0xff]   ;;  %v921_v10 = vsel %vm889_vm2, 1, %v6283_v0  ;;  %s9158_s26 = scalar_lea.hbm %s9216_s8, %s4992_s21 }
  0x54   : > { %v1851_v6 = vsel %vm1819_vm1, 1, %v6283_v0  ;;  %953 = vperm.xlu0 %6034, %v920_v5   ;;  %5233 = vmatprep.subr.bf16.mxu0 %v6036_v3  ;;  %v1852_v11 = vsel %vm1820_vm3, 1, %v6283_v0  ;;  %vm890_vm4 = vcmp.ge.s32.totalorder %v791_v9, 1  ;;  %v792_v12 = vld [vmem:[%s9215_s7 + $0x18] sm:$0xff]  ;;  %v759_v13 = vld [vmem:[%s9214_s6 + $0x10] sm:$0xff]  ;;  %s330_s20 = scalar_select %p329_p12, %s6353_s9, 1 }
  0x55   : > { %1884 = vperm.xlu1 %6035, %v1851_v6   ;;  %5234 = vmatpush3.bf16.msra.mxu0 %v6036_v3  ;;  %vm891_vm5 = vcmp.ge.s32.totalorder %v792_v12, 1  ;;  %v760_v14 = vld [vmem:[%s9214_s6 + $0x18] sm:$0xff]  ;;  %v6038_v15 = vld [vmem:[#allocation2 + $0x10] sm:$0xff]   ;;  %v922_v16 = vsel %vm890_vm4, 1, %v6283_v0  ;;  %vm1821_vm6 = vcmp.le.s32.totalorder %v759_v13, 14  ;;  %v793_v18 = vld [vmem:[%s9215_s7 + $0x20] sm:$0xff] }
  0x56   : > { %5235 = vmatprep.subr.bf16.mxu0 %v6037_v8  ;;  %v923_v17 = vsel %vm891_vm5, 1, %v6283_v0  ;;  %vm1822_vm7 = vcmp.le.s32.totalorder %v760_v14, 14  ;;  %v794_v19 = vld [vmem:[%s9215_s7 + $0x28] sm:$0xff]  ;;  %s4991_s25 = sshll.u32 %s330_s20, 8  ;;  %v6039_v20 = vld [vmem:[#allocation2 + $0x18] sm:$0xff]   ;;  %v1853_v21 = vsel %vm1821_vm6, 1, %v6283_v0 }
  0x57   : > { %v1854_v22 = vsel %vm1822_vm7, 1, %v6283_v0  ;;  %vm892_vm8 = vcmp.ge.s32.totalorder %v793_v18, 1  ;;  %vm893_vm9 = vcmp.ge.s32.totalorder %v794_v19, 1  ;;  %v761_v23 = vld [vmem:[%s9214_s6 + $0x20] sm:$0xff]  ;;  %s6502_s18 = scalar_lea.vmem %s9208_s0, %s4991_s25  ;;  %v762_v24 = vld [vmem:[%s9214_s6 + $0x28] sm:$0xff]  ;;  %v795_v30 = vld [vmem:[%s9215_s7 + $0x30] sm:$0xff] }
  0x58   : > { %956 = vperm.xlu0 %6034, %v921_v10   ;;  %v6040_v25 = vld [vmem:[#allocation2 + $0x20] sm:$0xff]   ;;  %v924_v26 = vsel %vm892_vm8, 1, %v6283_v0  ;;  %v925_v27 = vsel %vm893_vm9, 1, %v6283_v0  ;;  %vm1823_vm10 = vcmp.le.s32.totalorder %v761_v23, 14  ;;  %v336_v29 = vld [vmem:[%s6502_s18 + $0x8] sm:$0xff]  ;;  %vm1824_vm11 = vcmp.le.s32.totalorder %v762_v24, 14 }
  0x59   : > { %1887 = vperm.xlu1 %6035, %v1852_v11   ;;  %5236 = vmatpush3.bf16.msra.mxu0 %v6037_v8  ;;  %v335_v28 = vld [vmem:[%s6502_s18] sm:$0xff]  ;;  %v796_v33 = vld [vmem:[%s9215_s7 + $0x38] sm:$0xff]  ;;  %v337_v36 = vld [vmem:[%s6502_s18 + $0x10] sm:$0xff]  ;;  %v1855_v40 = vsel %vm1823_vm10, 1, %v6283_v0  ;;  %v1856_v41 = vsel %vm1824_vm11, 1, %v6283_v0  ;;  %vm894_vm12 = vcmp.ge.s32.totalorder %v795_v30, 1 }
  0x5a   : > { %5237 = vmatprep.subr.bf16.mxu0 %v6038_v15  ;;  %v6517_v31 = vld [vmem:[%s9209_s1] ss:$0 sm:$0xff]  ;;  %v338_v37 = vld [vmem:[%s6502_s18 + $0x18] sm:$0xff]  ;;  %v6041_v38 = vld [vmem:[#allocation2 + $0x28] sm:$0xff]   ;;  %vm895_vm13 = vcmp.ge.s32.totalorder %v796_v33, 1  ;;  %v926_v54 = vsel %vm894_vm12, 1, %v6283_v0 }
  0x5b   : > { %v6522_v32 = vld [vmem:[%s9210_s2] ss:$0 sm:$0xff]  ;;  %v374_v34 = vmul.f32 %v6517_v31, %v335_v28  ;;  %v375_v35 = vmul.f32 %v6517_v31, %v336_v29  ;;  %v340_v44 = vld [vmem:[%s6502_s18 + $0x28] sm:$0xff]  ;;  %v376_v45 = vmul.f32 %v6517_v31, %v337_v36  ;;  %v377_v46 = vmul.f32 %v6517_v31, %v338_v37  ;;  %v763_v47 = vld [vmem:[%s9214_s6 + $0x30] sm:$0xff]  ;;  %p10248_p1 = scmp.ne.s32.totalorder %s9490_s15, 0  ;;  %s6284_s12 = smov [#allocation7]  }
  0x5c   : > { %959 = vperm.xlu0 %6034, %v922_v16   ;;  %v339_v39 = vld [vmem:[%s6502_s18 + $0x20] sm:$0xff]  ;;  %v764_v48 = vld [vmem:[%s9214_s6 + $0x38] sm:$0xff]  ;;  %v6042_v52 = vld [vmem:[#allocation2 + $0x30] sm:$0xff]   ;;  %v379_v53 = vmul.f32 %v6517_v31, %v340_v44  ;;  %v927_v55 = vsel %vm895_vm13, 1, %v6283_v0  ;;  %vm1825_vm14 = vcmp.le.s32.totalorder %v763_v47, 14  ;;  %s6211_s13 = sshll.u32 %s6284_s12, 4  ;;  %s6212_s13 = int_to_ptr.vmem [resolvable:$false] %s6211_s13 }
  0x5d   : > { %962 = vperm.xlu1 %6035, %v923_v17   ;;  %5238 = vmatpush3.bf16.msra.mxu0 %v6038_v15  ;;  %v413_v42 = vadd.f32 %v6522_v32, %v374_v34  ;;  %v414_v43 = vadd.f32 %v6522_v32, %v375_v35  ;;  %v378_v51 = vmul.f32 %v6517_v31, %v339_v39  ;;  %vm1826_vm15 = vcmp.le.s32.totalorder %v764_v48, 14  ;;  %v797_v57 = vld [vmem:[%s9215_s7 + $0x40] sm:$0xff]  ;;  %v798_v58 = vld [vmem:[%s9215_s7 + $0x48] sm:$0xff]  ;;  %v341_v63 = vld [vmem:[%s6502_s18 + $0x30] sm:$0xff]  ;;  %s6213_s19 = scalar_lea.vmem %s6212_s13, 8192 }
  0x5e   : > { %5239 = vmatprep.subr.bf16.mxu0 %v6039_v20  ;;  %v415_v59 = vadd.f32 %v6522_v32, %v376_v45  ;;  %v416_v60 = vadd.f32 %v6522_v32, %v377_v46  ;;  %v418_v62 = vadd.f32 %v6522_v32, %v379_v53  ;;  %v342_v1 = vld [vmem:[%s6502_s18 + $0x38] sm:$0xff]  ;;  %v343_v3 = vld [vmem:[%s6502_s18 + $0x40] sm:$0xff]  ;;  %v344_v4 = vld [vmem:[%s6502_s18 + $0x48] sm:$0xff]  ;;  %v1857_v5 = vsel %vm1825_vm14, 1, %v6283_v0 }
  0x5f   : > { %v445_v49 = vmax.f32 %v413_v42, 0.0  ;;  %v446_v50 = vmax.f32 %v414_v43, 0.0  ;;  %v417_v61 = vadd.f32 %v6522_v32, %v378_v51  ;;  %v6043_v2 = vld [vmem:[#allocation2 + $0x38] sm:$0xff]   ;;  %v1858_v6 = vsel %vm1826_vm15, 1, %v6283_v0  ;;  %v765_v9 = vld [vmem:[%s9214_s6 + $0x40] sm:$0xff]  ;;  %v766_v12 = vld [vmem:[%s9214_s6 + $0x48] sm:$0xff] }
  0x60   : > { %1890 = vperm.xlu0 %6034, %v1853_v21   ;;  %vm896_vm0 = vcmp.ge.s32.totalorder %v797_v57, 1  ;;  %vm897_vm1 = vcmp.ge.s32.totalorder %v798_v58, 1  ;;  %v447_v7 = vmax.f32 %v415_v59, 0.0  ;;  %v448_v8 = vmax.f32 %v416_v60, 0.0  ;;  %v800_v21 = vld [vmem:[%s9215_s7 + $0x58] sm:$0xff]  ;;  %v347_v29 = vld [vmem:[%s6502_s18 + $0x60] sm:$0xff] }
  0x61   : > { %1893 = vperm.xlu1 %6035, %v1854_v22   ;;  %5240 = vmatpush3.bf16.msra.mxu0 %v6039_v20  ;;  %v477_v56 = vpack.c.bf16 %v446_v50, %v445_v49  ;;  %v380_v10 = vmul.f32 %v6517_v31, %v341_v63  ;;  %v381_v11 = vmul.f32 %v6517_v31, %v342_v1  ;;  %v449_v13 = vmax.f32 %v417_v61, 0.0  ;;  %v799_v20 = vld [vmem:[%s9215_s7 + $0x50] sm:$0xff]  ;;  %v346_v28 = vld [vmem:[%s6502_s18 + $0x58] sm:$0xff]  ;;  %v348_v30 = vld [vmem:[%s6502_s18 + $0x68] sm:$0xff] }
  0x62   : > { %5241 = vmatprep.subr.bf16.mxu0 %v6040_v25  ;;  %v450_v14 = vmax.f32 %v418_v62, 0.0  ;;  %v382_v15 = vmul.f32 %v6517_v31, %v343_v3  ;;  %v383_v16 = vmul.f32 %v6517_v31, %v344_v4  ;;  %v928_v17 = vsel %vm896_vm0, 1, %v6283_v0  ;;  %v767_v37 = vld [vmem:[%s9214_s6 + $0x50] sm:$0xff]  ;;  %v801_v48 = vld [vmem:[%s9215_s7 + $0x60] sm:$0xff]  ;;  %v802_v49 = vld [vmem:[%s9215_s7 + $0x68] sm:$0xff] }
  0x63   : > { %5249 = vmatprep.mubr.bf16.mxu0 %v477_v56  ;;  %v929_v18 = vsel %vm897_vm1, 1, %v6283_v0  ;;  %vm1827_vm2 = vcmp.le.s32.totalorder %v765_v9, 14  ;;  %v478_v19 = vpack.c.bf16 %v448_v8, %v447_v7  ;;  %vm1828_vm3 = vcmp.le.s32.totalorder %v766_v12, 14  ;;  %v350_v56 = vld [vmem:[%s6502_s18 + $0x78] sm:$0xff]  ;;  %v351_v59 = vld [vmem:[%s6502_s18 + $0x80] sm:$0xff]  ;;  %v352_v60 = vld [vmem:[%s6502_s18 + $0x88] sm:$0xff] }
  0x64   : > { %965 = vperm.xlu0 %6034, %v924_v26   ;;  %v419_v22 = vadd.f32 %v6522_v32, %v380_v10  ;;  %v420_v23 = vadd.f32 %v6522_v32, %v381_v11  ;;  %v479_v24 = vpack.c.bf16 %v450_v14, %v449_v13  ;;  %v422_v26 = vadd.f32 %v6522_v32, %v383_v16  ;;  %v769_v63 = vld [vmem:[%s9214_s6 + $0x60] sm:$0xff]  ;;  %v770_v1 = vld [vmem:[%s9214_s6 + $0x68] sm:$0xff]  ;;  %v803_v9 = vld [vmem:[%s9215_s7 + $0x70] sm:$0xff] }
  0x65   : > { %968 = vperm.xlu1 %6035, %v925_v27   ;;  %5242 = vmatpush3.bf16.msra.mxu0 %v6040_v25  ;;  %v421_v25 = vadd.f32 %v6522_v32, %v382_v15  ;;  %v345_v27 = vld [vmem:[%s6502_s18 + $0x50] sm:$0xff]  ;;  %v1859_v33 = vsel %vm1827_vm2, 1, %v6283_v0  ;;  %v1860_v34 = vsel %vm1828_vm3, 1, %v6283_v0  ;;  %vm898_vm4 = vcmp.ge.s32.totalorder %v799_v20, 1  ;;  %v354_v12 = vld [vmem:[%s6502_s18 + $0x98] sm:$0xff] }
  0x66   : > { %5243 = vmatprep.subr.bf16.mxu0 %v6041_v38  ;;  %vm899_vm5 = vcmp.ge.s32.totalorder %v800_v21, 1  ;;  %v451_v35 = vmax.f32 %v419_v22, 0.0  ;;  %v452_v36 = vmax.f32 %v420_v23, 0.0  ;;  %v384_v39 = vmul.f32 %v6517_v31, %v345_v27  ;;  %v353_v11 = vld [vmem:[%s6502_s18 + $0x90] sm:$0xff]  ;;  %v804_v14 = vld [vmem:[%s9215_s7 + $0x78] sm:$0xff]  ;;  %v356_v21 = vld [vmem:[%s6502_s18 + $0xa8] sm:$0xff] }
  0x67   : > { %v454_v42 = vmax.f32 %v422_v26, 0.0  ;;  %v386_v43 = vmul.f32 %v6517_v31, %v347_v29  ;;  %v387_v44 = vmul.f32 %v6517_v31, %v348_v30  ;;  %v930_v45 = vsel %vm898_vm4, 1, %v6283_v0  ;;  %v771_v23 = vld [vmem:[%s9214_s6 + $0x70] sm:$0xff] }
  0x68   : > { %1896 = vperm.xlu0 %6034, %v1855_v40   ;;  %v385_v40 = vmul.f32 %v6517_v31, %v346_v28  ;;  %vm1829_vm6 = vcmp.le.s32.totalorder %v767_v37, 14  ;;  %v931_v46 = vsel %vm899_vm5, 1, %v6283_v0  ;;  %v480_v47 = vpack.c.bf16 %v452_v36, %v451_v35  ;;  %v805_v36 = vld [vmem:[%s9215_s7 + $0x80] sm:$0xff]  ;;  %v806_v37 = vld [vmem:[%s9215_s7 + $0x88] sm:$0xff] }
  0x69   : > { %1899 = vperm.xlu1 %6035, %v1856_v41   ;;  %5244 = vmatpush3.bf16.msra.mxu0 %v6041_v38  ;;  %v768_v38 = vld [vmem:[%s9214_s6 + $0x58] sm:$0xff]  ;;  %v453_v41 = vmax.f32 %v421_v25, 0.0  ;;  %v423_v50 = vadd.f32 %v6522_v32, %v384_v39  ;;  %v425_v53 = vadd.f32 %v6522_v32, %v386_v43  ;;  %v1861_v57 = vsel %vm1829_vm6, 1, %v6283_v0  ;;  %v357_v43 = vld [vmem:[%s6502_s18 + $0xb0] sm:$0xff] }
  0x6a   : > { %5245 = vmatprep.subr.bf16.mxu0 %v6042_v52  ;;  %vm1830_vm7 = vcmp.le.s32.totalorder %v768_v38, 14  ;;  %v424_v51 = vadd.f32 %v6522_v32, %v385_v40  ;;  %vm900_vm8 = vcmp.ge.s32.totalorder %v801_v48, 1  ;;  %vm901_vm9 = vcmp.ge.s32.totalorder %v802_v49, 1  ;;  %v365_v38 = vld [vmem:[%s6502_s18 + $0xf0] sm:$0xff]  ;;  %v366_v40 = vld [vmem:[%s6502_s18 + $0xf8] sm:$0xff]  ;;  %v359_v49 = vld [vmem:[%s6502_s18 + $0xc0] sm:$0xff] }
  0x6b   : > { %v1862_v58 = vsel %vm1830_vm7, 1, %v6283_v0  ;;  %v455_v61 = vmax.f32 %v423_v50, 0.0  ;;  %v389_v3 = vmul.f32 %v6517_v31, %v350_v56  ;;  %v457_v4 = vmax.f32 %v425_v53, 0.0  ;;  %v358_v48 = vld [vmem:[%s6502_s18 + $0xb8] sm:$0xff] }
  0x6c   : > { %971 = vperm.xlu0 %6034, %v926_v54   ;;  %v426_v54 = vadd.f32 %v6522_v32, %v387_v44  ;;  %v456_v62 = vmax.f32 %v424_v51, 0.0  ;;  %v391_v7 = vmul.f32 %v6517_v31, %v352_v60  ;;  %v932_v8 = vsel %vm900_vm8, 1, %v6283_v0  ;;  %v360_v51 = vld [vmem:[%s6502_s18 + $0xc8] sm:$0xff]  ;;  %v6697_v60 = vld [vmem:[%s9214_s6 + $0x80] sm:$0xff] }
  0x6d   : > { %974 = vperm.xlu1 %6035, %v927_v55   ;;  %5246 = vmatpush3.bf16.msra.mxu0 %v6042_v52  ;;  %v481_v52 = vpack.c.bf16 %v454_v42, %v453_v41  ;;  %v349_v55 = vld [vmem:[%s6502_s18 + $0x70] sm:$0xff]  ;;  %v933_v10 = vsel %vm901_vm9, 1, %v6283_v0  ;;  %vm1831_vm10 = vcmp.le.s32.totalorder %v769_v63, 14  ;;  %vm1832_vm11 = vcmp.le.s32.totalorder %v770_v1, 14 }
  0x6e   : > { %5247 = vmatprep.subr.bf16.mxu0 %v6043_v2  ;;  %v482_v13 = vpack.c.bf16 %v456_v62, %v455_v61  ;;  %v428_v16 = vadd.f32 %v6522_v32, %v389_v3  ;;  %v430_v20 = vadd.f32 %v6522_v32, %v391_v7  ;;  %v1863_v22 = vsel %vm1831_vm10, 1, %v6283_v0 }
  0x6f   : > { %v1864_v25 = vsel %vm1832_vm11, 1, %v6283_v0  ;;  %vm902_vm12 = vcmp.ge.s32.totalorder %v803_v9, 1  ;;  %v392_v26 = vmul.f32 %v6517_v31, %v353_v11  ;;  %v393_v27 = vmul.f32 %v6517_v31, %v354_v12  ;;  %v6719_v11 = vld [vmem:[%s9215_s7 + $0x90] sm:$0xff]  ;;  %v6724_v12 = vld [vmem:[%s9215_s7 + $0x98] sm:$0xff] }
  0x70   : > { %1902 = vperm.xlu0 %6034, %v1857_v5   ;;  %v458_v5 = vmax.f32 %v426_v54, 0.0  ;;  %v460_v29 = vmax.f32 %v428_v16, 0.0  ;;  %vm903_vm13 = vcmp.ge.s32.totalorder %v804_v14, 1  ;;  %v462_v35 = vmax.f32 %v430_v20, 0.0  ;;  %v363_v20 = vld [vmem:[%s6502_s18 + $0xe0] sm:$0xff] }
  0x71   : > { %1905 = vperm.xlu1 %6035, %v1858_v6   ;;  %5248 = vmatpush3.bf16.msra.mxu0 %v6043_v2  ;;  %v388_v2 = vmul.f32 %v6517_v31, %v349_v55  ;;  %v390_v6 = vmul.f32 %v6517_v31, %v351_v59  ;;  %v934_v39 = vsel %vm902_vm12, 1, %v6283_v0  ;;  %vm1833_vm14 = vcmp.le.s32.totalorder %v771_v23, 14 }
  0x72   : > { %v431_v41 = vadd.f32 %v6522_v32, %v392_v26  ;;  %v432_v42 = vadd.f32 %v6522_v32, %v393_v27  ;;  %v935_v44 = vsel %vm903_vm13, 1, %v6283_v0  ;;  %v405_v53 = vmul.f32 %v6517_v31, %v366_v40  ;;  %v6743_v26 = vld [vmem:[%s9214_s6 + $0x90] sm:$0xff] }
  0x73   : > { %v427_v15 = vadd.f32 %v6522_v32, %v388_v2  ;;  %v1865_v54 = vsel %vm1833_vm14, 1, %v6283_v0  ;;  %vm904_vm0 = vcmp.ge.s32.totalorder %v805_v36, 1  ;;  %vm905_vm1 = vcmp.ge.s32.totalorder %v806_v37, 1  ;;  %v6704_v2 = vld [vmem:[%s9214_s6 + $0x88] sm:$0xff] }
  0x74   : > { %977 = vperm.xlu0 %6034, %v928_v17   ;;  %5250 = vmatmul.mubr.bf16.vlgmr.msra.gmra.mrb[0].mxu0 %v478_v19  ;;  %v355_v17 = vld [vmem:[%s6502_s18 + $0xa0] sm:$0xff]  ;;  %v429_v19 = vadd.f32 %v6522_v32, %v390_v6  ;;  %v463_v56 = vmax.f32 %v431_v41, 0.0  ;;  %v444_v59 = vadd.f32 %v6522_v32, %v405_v53  ;;  %v396_v63 = vmul.f32 %v6517_v31, %v357_v43 }
  0x75   : > { %980 = vperm.xlu1 %6035, %v929_v18   ;;  %5253 = vmatprep.mubr.bf16.mxu0 %v479_v24  ;;  %v483_v18 = vpack.c.bf16 %v458_v5, %v457_v4  ;;  %v772_v24 = vld [vmem:[%s9214_s6 + $0x78] sm:$0xff]  ;;  %v459_v28 = vmax.f32 %v427_v15, 0.0  ;;  %v394_v30 = vmul.f32 %v6517_v31, %v355_v17  ;;  %v397_v1 = vmul.f32 %v6517_v31, %v358_v48  ;;  %v6769_v43 = vld [vmem:[%s9215_s7 + $0xa0] sm:$0xff] }
  0x76   : > { %vm1834_vm15 = vcmp.le.s32.totalorder %v772_v24, 14  ;;  %v398_v3 = vmul.f32 %v6517_v31, %v359_v49  ;;  %v399_v4 = vmul.f32 %v6517_v31, %v360_v51  ;;  %v476_v6 = vmax.f32 %v444_v59, 0.0  ;;  %v6788_v51 = vld [vmem:[%s9214_s6 + $0xa8] sm:$0xff] }
  0x77   : > { %v1866_v55 = vsel %vm1834_vm15, 1, %v6283_v0  ;;  %v936_v7 = vsel %vm904_vm0, 1, %v6283_v0  ;;  %vm1835_vm2 = vcmp.le.s32.totalorder %v6697_v60, 14  ;;  %vm1836_vm3 = vcmp.le.s32.totalorder %v6704_v2, 14 }
  0x78   : > { %1908 = vperm.xlu0 %6034, %v1859_v33   ;;  %v395_v33 = vmul.f32 %v6517_v31, %v356_v21  ;;  %v436_v14 = vadd.f32 %v6522_v32, %v397_v1  ;;  %v437_v16 = vadd.f32 %v6522_v32, %v398_v3  ;;  %v438_v17 = vadd.f32 %v6522_v32, %v399_v4  ;;  %v364_v21 = vld [vmem:[%s6502_s18 + $0xe8] sm:$0xff]  ;;  %v6825_v3 = vld [vmem:[%s9215_s7 + $0xc0] sm:$0xff] }
  0x79   : > { %1911 = vperm.xlu1 %6035, %v1860_v34   ;;  %v461_v34 = vmax.f32 %v429_v19, 0.0  ;;  %v362_v19 = vld [vmem:[%s6502_s18 + $0xd8] sm:$0xff]  ;;  %v1868_v23 = vsel %vm1836_vm3, 1, %v6283_v0  ;;  %vm906_vm4 = vcmp.ge.s32.totalorder %v6719_v11, 1  ;;  %vm907_vm5 = vcmp.ge.s32.totalorder %v6724_v12, 1  ;;  %v6830_v4 = vld [vmem:[%s9215_s7 + $0xc8] sm:$0xff] }
  0x7a   : > { %v938_v36 = vsel %vm906_vm4, 1, %v6283_v0  ;;  %vm1837_vm6 = vcmp.le.s32.totalorder %v6743_v26, 14  ;;  %v939_v37 = vsel %vm907_vm5, 1, %v6283_v0  ;;  %vm908_vm8 = vcmp.ge.s32.totalorder %v6769_v43, 1 }
  0x7b   : > { %v485_v50 = vpack.c.bf16 %v462_v35, %v461_v34  ;;  %v403_v34 = vmul.f32 %v6517_v31, %v364_v21  ;;  %v6752_v35 = vld [vmem:[%s9214_s6 + $0x98] sm:$0xff]  ;;  %vm1840_vm11 = vcmp.le.s32.totalorder %v6788_v51, 14  ;;  %vm912_vm0 = vcmp.ge.s32.totalorder %v6825_v3, 1  ;;  %v6878_v21 = vld [vmem:[%s9215_s7 + $0xe0] sm:$0xff] }
  0x7c   : > { %983 = vperm.xlu0 %6034, %v930_v45   ;;  %5254 = vmatmul.mubr.bf16.gmra.mrb[4].mxu0 %v480_v47  ;;  %v484_v45 = vpack.c.bf16 %v460_v29, %v459_v28  ;;  %v434_v47 = vadd.f32 %v6522_v32, %v395_v33  ;;  %v401_v28 = vmul.f32 %v6517_v31, %v362_v19  ;;  %v469_v29 = vmax.f32 %v437_v16, 0.0 }
  0x7d   : > { %986 = vperm.xlu1 %6035, %v931_v46   ;;  %5257 = vmatprep.mubr.bf16.mxu0 %v481_v52  ;;  %v433_v46 = vadd.f32 %v6522_v32, %v394_v30  ;;  %v404_v52 = vmul.f32 %v6517_v31, %v365_v38  ;;  %v470_v30 = vmax.f32 %v438_v17, 0.0  ;;  %v402_v33 = vmul.f32 %v6517_v31, %v363_v20  ;;  %v6865_v17 = vld [vmem:[%s9214_s6 + $0xd0] sm:$0xff]  ;;  %v6045_v20 = vld [vmem:[#allocation5 + $0x108] sm:$0xff]  }
  0x7e   : > { %v466_v62 = vmax.f32 %v434_v47, 0.0  ;;  %vm1838_vm7 = vcmp.le.s32.totalorder %v6752_v35, 14  ;;  %v1872_v59 = vsel %vm1840_vm11, 1, %v6283_v0 }
  0x7f   : > { %v465_v61 = vmax.f32 %v433_v46, 0.0  ;;  %v489_v40 = vpack.c.bf16 %v470_v30, %v469_v29  ;;  %v441_v41 = vadd.f32 %v6522_v32, %v402_v33  ;;  %v1870_v46 = vsel %vm1838_vm7, 1, %v6283_v0  ;;  %v6047_v33 = vld [vmem:[#allocation5 + $0x118] sm:$0xff]  }
  0x80   : > { %1914 = vperm.xlu0 %6034, %v1861_v57   ;;  %v464_v57 = vmax.f32 %v432_v42, 0.0  ;;  %v442_v42 = vadd.f32 %v6522_v32, %v403_v34  ;;  %v819_v34 = vld [vmem:[%s9215_s7 + $0xf0] sm:$0xff] }
  0x81   : > { %1917 = vperm.xlu1 %6035, %v1862_v58   ;;  %v443_v58 = vadd.f32 %v6522_v32, %v404_v52  ;;  %v487_v15 = vpack.c.bf16 %v466_v62, %v465_v61  ;;  %v940_v52 = vsel %vm908_vm8, 1, %v6283_v0  ;;  %v6811_v61 = vld [vmem:[%s9214_s6 + $0xb0] sm:$0xff]  ;;  %v6816_v62 = vld [vmem:[%s9214_s6 + $0xb8] sm:$0xff]  ;;  %vm916_vm8 = vcmp.ge.s32.totalorder %v6878_v21, 1 }
  0x82   : > { %v474_v49 = vmax.f32 %v442_v42, 0.0  ;;  %vm1841_vm14 = vcmp.le.s32.totalorder %v6811_v61, 14  ;;  %vm1842_vm15 = vcmp.le.s32.totalorder %v6816_v62, 14 }
  0x83   : > { %v475_v5 = vmax.f32 %v443_v58, 0.0 }
  0x84   : > { %989 = vperm.xlu0 %6034, %v932_v8   ;;  %5258 = vmatmul.mubr.bf16.gmra.mrb[8].mxu0 %v482_v13  ;;  %v937_v8 = vsel %vm905_vm1, 1, %v6283_v0  ;;  %v435_v13 = vadd.f32 %v6522_v32, %v396_v63  ;;  %vm913_vm1 = vcmp.ge.s32.totalorder %v6830_v4, 1 }
  0x85   : > { %992 = vperm.xlu1 %6035, %v933_v10   ;;  %5261 = vmatprep.mubr.bf16.mxu0 %v483_v18  ;;  %v6713_v9 = vpack.c.bf16 %v476_v6, %v475_v5  ;;  %v486_v10 = vpack.c.bf16 %v464_v57, %v463_v56  ;;  %v361_v18 = vld [vmem:[%s6502_s18 + $0xd0] sm:$0xff]  ;;  %v6802_v57 = vld [vmem:[%s9215_s7 + $0xb8] sm:$0xff]  ;;  %v6835_v5 = vld [vmem:[%s9214_s6 + $0xc0] sm:$0xff]  ;;  %v1873_v6 = vsel %vm1841_vm14, 1, %v6283_v0  ;;  %s326_s18 = sand.u32 1, %s6269_s28  }
  0x86   : > { %v467_v24 = vmax.f32 %v435_v13, 0.0  ;;  %v400_v27 = vmul.f32 %v6517_v31, %v361_v18  ;;  %v6797_v56 = vld [vmem:[%s9215_s7 + $0xb0] sm:$0xff]  ;;  %vm911_vm13 = vcmp.ge.s32.totalorder %v6802_v57, 1  ;;  %v6856_v13 = vld [vmem:[%s9215_s7 + $0xd8] sm:$0xff]  ;;  %s4516_s20 = sshll.u32 %s326_s18, 8  ;;  %s9167_s9 = scalar_lea.sflag [#allocation4], %s326_s18 }
  0x87   : > { %vm910_vm12 = vcmp.ge.s32.totalorder %v6797_v56, 1  ;;  %v943_v1 = vsel %vm911_vm13, 1, %v6283_v0  ;;  %v6870_v18 = vld [vmem:[%s9214_s6 + $0xd8] sm:$0xff]  ;;  %vm915_vm5 = vcmp.ge.s32.totalorder %v6856_v13, 1  ;;  %s9122_s22 = scalar_lea.vmem [#allocation7], %s4516_s20 }
  0x88   : > { %1920 = vperm.xlu0 %6034, %v1863_v22   ;;  %v1867_v22 = vsel %vm1835_vm2, 1, %v6283_v0  ;;  %v439_v31 = vadd.f32 %v6522_v32, %v400_v27  ;;  %v942_v63 = vsel %vm910_vm12, 1, %v6283_v0  ;;  %vm1843_vm2 = vcmp.le.s32.totalorder %v6835_v5, 14  ;;  %v6893_v27 = vld [vmem:[%s9214_s6 + $0xe0] sm:$0xff]  ;;  %s4424_s23 = sshll.u32 %s9122_s22, 4  ;;  %s9160_s23 = int_to_ptr.vmem [resolvable:$true] %s4424_s23 }
  0x89   : > { %1923 = vperm.xlu1 %6035, %v1864_v25   ;;  %v468_v25 = vmax.f32 %v436_v14, 0.0  ;;  %v945_v14 = vsel %vm913_vm1, 1, %v6283_v0  ;;  %v1875_v16 = vsel %vm1843_vm2, 1, %v6283_v0  ;;  %vm1846_vm7 = vcmp.le.s32.totalorder %v6870_v18, 14  ;;  %s6207_s10 = scalar_lea.vmem %s9160_s23, 4096  ;;  %p6214_p4 = scmp.lt.s32.totalorder %s9160_s23, %s6212_s13 }
  0x8a   : > { %v471_v47 = vmax.f32 %v439_v31, 0.0  ;;  %v1878_v30 = vsel %vm1846_vm7, 1, %v6283_v0  ;;  %v6048_v31 = vld [vmem:[#allocation5 + $0x120] sm:$0xff]   ;;  %vm918_vm12 = vcmp.ge.s32.totalorder %v819_v34, 1  ;;  %p6208_p10 = scmp.ne.s32.totalorder %s9160_s23, %s6207_s10  ;;  %p6215_p7 = scmp.lt.s32.totalorder %s6213_s19, %s6207_s10 }
  0x8b   : > { %v488_v38 = vpack.c.bf16 %v468_v25, %v467_v24  ;;  %v947_v24 = vsel %vm915_vm5, 1, %v6283_v0  ;;  %v6046_v25 = vld [vmem:[#allocation5 + $0x110] sm:$0xff]  }
  0x8c   : > { %995 = vperm.xlu0 %6034, %v934_v39   ;;  %5262 = vmatmul.mubr.bf16.gmra.mrb[12].mxu0 %v484_v45  ;;  %v440_v39 = vadd.f32 %v6522_v32, %v401_v28  ;;  %v1869_v45 = vsel %vm1837_vm6, 1, %v6283_v0  ;;  %v473_v32 = vmax.f32 %v441_v41, 0.0  ;;  %vm1845_vm6 = vcmp.le.s32.totalorder %v6865_v17, 14  ;;  %v6898_v28 = vld [vmem:[%s9214_s6 + $0xe8] sm:$0xff]  ;;  %p6209_p2 = pnand %p6208_p10, %p10248_p1  ;;  %p6216_p8 = por %p6215_p7, %p6214_p4 }
  0x8d   : > { %998 = vperm.xlu1 %6035, %v935_v44   ;;  %5265 = vmatprep.mubr.bf16.mxu0 %v485_v50  ;;  %v6774_v44 = vld [vmem:[%s9215_s7 + $0xa8] sm:$0xff]  ;;  %v6783_v50 = vld [vmem:[%s9214_s6 + $0xa0] sm:$0xff]  ;;  %v1877_v29 = vsel %vm1845_vm6, 1, %v6283_v0  ;;  %vm1848_vm11 = vcmp.le.s32.totalorder %v6898_v28, 14 }
  0x8e   : > { %v472_v48 = vmax.f32 %v440_v39, 0.0  ;;  %vm909_vm9 = vcmp.ge.s32.totalorder %v6774_v44, 1  ;;  %vm1839_vm10 = vcmp.le.s32.totalorder %v6783_v50, 14  ;;  %v6916_v39 = vld [vmem:[%s9214_s6 + $0xf0] sm:$0xff]  ;;  %v1880_v42 = vsel %vm1848_vm11, 1, %v6283_v0  ;;  %p6210_p3 = pneg %p6209_p2 }
  0x8f   : > { %v941_v53 = vsel %vm909_vm9, 1, %v6283_v0  ;;  %v1871_v58 = vsel %vm1839_vm10, 1, %v6283_v0  ;;  %vm1847_vm10 = vcmp.le.s32.totalorder %v6893_v27, 14  ;;  %vm1849_vm14 = vcmp.le.s32.totalorder %v6916_v39, 14 }
  0x90   : > { %1926 = vperm.xlu0 %6034, %v1865_v54   ;;  %v490_v54 = vpack.c.bf16 %v472_v48, %v471_v47  ;;  %v1879_v41 = vsel %vm1847_vm10, 1, %v6283_v0  ;;  %v6050_v48 = vld [vmem:[#allocation5 + $0x130] sm:$0xff]   ;;  %p6217_p11 = pnand %p6216_p8, %p6210_p3 }
  0x91   : > { %1929 = vperm.xlu1 %6035, %v1866_v55   ;;  %v491_v55 = vpack.c.bf16 %v474_v49, %v473_v32  ;;  %v1881_v32 = vsel %vm1849_vm14, 1, %v6283_v0 }
  0x94   : > { %1001 = vperm.xlu0 %6034, %v936_v7   ;;  %5266 = vmatmul.mubr.bf16.gmra.mrb[16].mxu0 %v486_v10  ;;  %v1874_v7 = vsel %vm1842_vm15, 1, %v6283_v0  ;;  %v6851_v10 = vld [vmem:[%s9215_s7 + $0xd0] sm:$0xff] }
  0x95   : > { %1004 = vperm.xlu1 %6035, %v937_v8   ;;  %5269 = vmatprep.mubr.bf16.mxu0 %v487_v15  ;;  %v6842_v8 = vld [vmem:[%s9214_s6 + $0xc8] sm:$0xff]  ;;  %v6044_v15 = vld [vmem:[#allocation5 + $0x100] sm:$0xff]   ;;  %vm914_vm4 = vcmp.ge.s32.totalorder %v6851_v10, 1 }
  0x96   : > { %vm1844_vm3 = vcmp.le.s32.totalorder %v6842_v8, 14  ;;  %5473 = vmatprep.subr.bf16.mxu1 %v6044_v15 }
  0x97   : > { %v1876_v19 = vsel %vm1844_vm3, 1, %v6283_v0  ;;  %5474 = vmatpush3.bf16.msra.mxu1 %v6044_v15 }
  0x98   : > { %1932 = vperm.xlu0 %6034, %v1867_v22   ;;  %5475 = vmatprep.subr.bf16.mxu1 %v6045_v20  ;;  %v946_v22 = vsel %vm914_vm4, 1, %v6283_v0 }
  0x99   : > { %1935 = vperm.xlu1 %6035, %v1868_v23   ;;  %v6884_v23 = vld [vmem:[%s9215_s7 + $0xe8] sm:$0xff] }
  0x9a   : > { %vm917_vm9 = vcmp.ge.s32.totalorder %v6884_v23, 1 }
  0x9b   : > { %5476 = vmatpush3.bf16.msra.mxu1 %v6045_v20 }
  0x9c   : > { %1007 = vperm.xlu0 %6034, %v938_v36   ;;  %5270 = vmatmul.mubr.bf16.gmra.mrb[20].mxu0 %v488_v38  ;;  %v948_v36 = vsel %vm916_vm8, 1, %v6283_v0  ;;  %v949_v38 = vsel %vm917_vm9, 1, %v6283_v0 }
  0x9d   : > { %1010 = vperm.xlu1 %6035, %v939_v37   ;;  %5273 = vmatprep.mubr.bf16.mxu0 %v489_v40  ;;  %v820_v37 = vld [vmem:[%s9215_s7 + $0xf8] sm:$0xff] }
  0x9e   : > { %5477 = vmatprep.subr.bf16.mxu1 %v6046_v25  ;;  %v6921_v40 = vld [vmem:[%s9214_s6 + $0xf8] sm:$0xff]  ;;  %vm919_vm13 = vcmp.ge.s32.totalorder %v820_v37, 1  ;;  %vm3299_vm1 = vcmp.le.s32.totalorder %v820_v37, 14  ;;  %v6123_v37 = vld [vmem:[%s9215_s7 + $0x10] sm:$0xff] }
  0x9f   : > { %5478 = vmatpush3.bf16.msra.mxu1 %v6046_v25  ;;  %v951_v47 = vsel %vm919_vm13, 1, %v6283_v0  ;;  %vm1850_vm15 = vcmp.le.s32.totalorder %v6921_v40, 14  ;;  %v6121_v25 = vld [vmem:[%s9214_s6 + $0x10] sm:$0xff]  ;;  %vm3270_vm9 = vcmp.le.s32.totalorder %v6123_v37, 14 }
  0xa0   : > { %1938 = vperm.xlu0 %6034, %v1869_v45   ;;  %5479 = vmatprep.subr.bf16.mxu1 %v6047_v33  ;;  %v6049_v45 = vld [vmem:[#allocation5 + $0x128] sm:$0xff]   ;;  %v1882_v49 = vsel %vm1850_vm15, 1, %v6283_v0  ;;  %vm1114_vm7 = vcmp.ge.s32.totalorder %v6121_v25, 1 }
  0xa1   : > { %1941 = vperm.xlu1 %6035, %v1870_v46   ;;  %v950_v46 = vsel %vm918_vm12, 1, %v6283_v0 }
  0xa3   : > { %5480 = vmatpush3.bf16.msra.mxu1 %v6047_v33 }
  0xa4   : > { %1013 = vperm.xlu0 %6034, %v940_v52   ;;  %5274 = vmatmul.mubr.bf16.gmra.mrb[24].mxu0 %v490_v54  ;;  %v6051_v52 = vld [vmem:[#allocation5 + $0x138] sm:$0xff]   ;;  %v3331_v54 = vsel %vm3299_vm1, 1, %v6283_v0 }
  0xa5   : > { %1016 = vperm.xlu1 %6035, %v941_v53   ;;  %5277 = vmatprep.mubr.bf16.mxu0 %v491_v55  ;;  %v6116_v55 = vld [vmem:[%s9215_s7] sm:$0xff] }
  0xa6   : > { %5481 = vmatprep.subr.bf16.mxu1 %v6048_v31  ;;  %vm3268_vm2 = vcmp.le.s32.totalorder %v6116_v55, 14 }
  0xa7   : > { %5482 = vmatpush3.bf16.msra.mxu1 %v6048_v31 }
  0xa8   : > { %1944 = vperm.xlu0 %6034, %v1871_v58   ;;  %5483 = vmatprep.subr.bf16.mxu1 %v6049_v45  ;;  %v6117_v58 = vld [vmem:[%s9215_s7 + $0x8] sm:$0xff] }
  0xa9   : > { %1947 = vperm.xlu1 %6035, %v1872_v59   ;;  %vm3269_vm3 = vcmp.le.s32.totalorder %v6117_v58, 14 }
  0xab   : > { %5484 = vmatpush3.bf16.msra.mxu1 %v6049_v45  ;;  %v3302_v45 = vsel %vm3270_vm9, 1, %v6283_v0 }
  0xac   : > { %1019 = vperm.xlu0 %6034, %v942_v63   ;;  %5278 = vmatmul.mubr.bf16.gmra.mrb[28].mxu0 %v6713_v9  ;;  %v944_v9 = vsel %vm912_vm0, 1, %v6283_v0  ;;  %vm3298_vm0 = vcmp.le.s32.totalorder %v819_v34, 14  ;;  %v1146_v34 = vsel %vm1114_vm7, 1, %v6283_v0 }
  0xad   : > { %1022 = vperm.xlu1 %6035, %v943_v1   ;;  %5485 = vmatprep.subr.bf16.mxu1 %v6050_v48  ;;  %v3330_v53 = vsel %vm3298_vm0, 1, %v6283_v0  ;;  %v3300_v1 = vsel %vm3268_vm2, 1, %v6283_v0 }
  0xaf   : > { %5486 = vmatpush3.bf16.msra.mxu1 %v6050_v48 }
  0xb0   : > { %1950 = vperm.xlu0 %6034, %v1873_v6   ;;  %5487 = vmatprep.subr.bf16.mxu1 %v6051_v52  ;;  %v3301_v6 = vsel %vm3269_vm3, 1, %v6283_v0 }
  0xb1   : > { %1953 = vperm.xlu1 %6035, %v1874_v7   ;;  %v6118_v7 = vld [vmem:[%s9214_s6 + $0x8] sm:$0xff] }
  0xb2   : > { %vm1113_vm4 = vcmp.ge.s32.totalorder %v6118_v7, 1 }
  0xb3   : > { %5488 = vmatpush3.bf16.msra.mxu1 %v6051_v52  ;;  %v1145_v20 = vsel %vm1113_vm4, 1, %v6283_v0 }
  0xb4   : > { %1025 = vperm.xlu0 %6034, %v944_v9   ;;  %v6119_v9 = vld [vmem:[%s9214_s6] sm:$0xff] }
  0xb5   : > { %1028 = vperm.xlu1 %6035, %v945_v14   ;;  %vm1112_vm5 = vcmp.ge.s32.totalorder %v6119_v9, 1  ;;  %v6128_v9 = vld [vmem:[%s9214_s6 + $0x38] sm:$0xff] }
  0xb6   : > { %vm1119_vm14 = vcmp.ge.s32.totalorder %v6128_v9, 1 }
  0xb8   : > { %1956 = vperm.xlu0 %6034, %v1875_v16   ;;  %v6052_v16 = vld [vmem:[#allocation5 + $0xc0] sm:$0xff]  }
  0xb9   : > { %1959 = vperm.xlu1 %6035, %v1876_v19   ;;  %v6955_v19 = vld [vmem:[#allocation5 + $0x1c0] sm:$0xff]   ;;  %5281 = vmatprep.subr.bf16.mxu0 %v6052_v16 }
  0xba   : > { %5521 = vmatprep.subr.bf16.mxu1 %v6955_v19  ;;  %5282 = vmatpush3.bf16.msra.mxu0 %v6052_v16  ;;  %v6129_v16 = vld [vmem:[%s9214_s6 + $0x30] sm:$0xff] }
  0xbb   : > { %vm1118_vm15 = vcmp.ge.s32.totalorder %v6129_v16, 1  ;;  %v6060_v16 = vld [vmem:[#allocation5 + $0xe0] sm:$0xff]  }
  0xbc   : > { %1031 = vperm.xlu0 %6034, %v946_v22   ;;  %v1144_v22 = vsel %vm1112_vm5, 1, %v6283_v0  ;;  %v1150_v25 = vsel %vm1118_vm15, 1, %v6283_v0 }
  0xbd   : > { %1034 = vperm.xlu1 %6035, %v947_v24   ;;  %v6120_v24 = vld [vmem:[%s9214_s6 + $0x18] sm:$0xff] }
  0xbe   : > { %vm1115_vm6 = vcmp.ge.s32.totalorder %v6120_v24, 1  ;;  %v1151_v24 = vsel %vm1119_vm14, 1, %v6283_v0 }
  0xbf   : > { %v1147_v33 = vsel %vm1115_vm6, 1, %v6283_v0 }
  0xc0   : > { %1962 = vperm.xlu0 %6034, %v1877_v29  }
  0xc1   : > { %1965 = vperm.xlu1 %6035, %v1878_v30  }
  0xc4   : > { %1037 = vperm.xlu0 %6034, %v948_v36   ;;  %v6122_v36 = vld [vmem:[%s9215_s7 + $0x18] sm:$0xff] }
  0xc5   : > { %1040 = vperm.xlu1 %6035, %v949_v38   ;;  %vm3271_vm8 = vcmp.le.s32.totalorder %v6122_v36, 14 }
  0xc8   : > { %1968 = vperm.xlu0 %6034, %v1879_v41   ;;  %v6054_v41 = vld [vmem:[#allocation5 + $0xc8] sm:$0xff]  }
  0xc9   : > { %1971 = vperm.xlu1 %6035, %v1880_v42   ;;  %v3303_v42 = vsel %vm3271_vm8, 1, %v6283_v0  ;;  %5283 = vmatprep.subr.bf16.mxu0 %v6054_v41 }
  0xca   : > { %5284 = vmatpush3.bf16.msra.mxu0 %v6054_v41  ;;  %v6058_v41 = vld [vmem:[#allocation5 + $0xd8] sm:$0xff]  }
  0xcc   : > { %1043 = vperm.xlu0 %6034, %v950_v46   ;;  %v6124_v46 = vld [vmem:[%s9215_s7 + $0x28] sm:$0xff] }
  0xcd   : > { %1046 = vperm.xlu1 %6035, %v951_v47   ;;  %vm3273_vm10 = vcmp.le.s32.totalorder %v6124_v46, 14  ;;  %v6125_v47 = vld [vmem:[%s9215_s7 + $0x20] sm:$0xff]  ;;  %v6132_v46 = vld [vmem:[%s9215_s7 + $0x48] sm:$0xff] }
  0xce   : > { %vm3272_vm11 = vcmp.le.s32.totalorder %v6125_v47, 14  ;;  %vm3277_vm2 = vcmp.le.s32.totalorder %v6132_v46, 14  ;;  %v6133_v47 = vld [vmem:[%s9215_s7 + $0x40] sm:$0xff] }
  0xcf   : > { %v3304_v52 = vsel %vm3272_vm11, 1, %v6283_v0  ;;  %vm3276_vm3 = vcmp.le.s32.totalorder %v6133_v47, 14  ;;  %v6138_v47 = vld [vmem:[%s9215_s7 + $0x58] sm:$0xff] }
  0xd0   : > { %1974 = vperm.xlu0 %6034, %v1881_v32   ;;  %vm3279_vm8 = vcmp.le.s32.totalorder %v6138_v47, 14 }
  0xd1   : > { %1977 = vperm.xlu1 %6035, %v1882_v49   ;;  %v3305_v49 = vsel %vm3273_vm10, 1, %v6283_v0 }
  0xd3   : > { %v6939_v59 = vpop.permute.xlu0 %953 }
  0xd4   : > { %v6941_v63 = vpop.permute.xlu1 %1884  ;;  %3423 = vperm.xlu0 %6034, %v3330_v53   ;;  %v6126_v53 = vld [vmem:[%s9214_s6 + $0x28] sm:$0xff] }
  0xd5   : > { %3426 = vperm.xlu1 %6035, %v3331_v54   ;;  %vm1117_vm12 = vcmp.ge.s32.totalorder %v6126_v53, 1  ;;  %v6127_v54 = vld [vmem:[%s9214_s6 + $0x20] sm:$0xff]  ;;  %v3309_v53 = vsel %vm3277_vm2, 1, %v6283_v0 }
  0xd6   : > { %vm1116_vm13 = vcmp.ge.s32.totalorder %v6127_v54, 1  ;;  %v3308_v54 = vsel %vm3276_vm3, 1, %v6283_v0 }
  0xd7   : > { %v6951_v14 = vpop.permute.xlu0 %956  ;;  %v1148_v7 = vsel %vm1116_vm13, 1, %v6283_v0 }
  0xd8   : > { %v6953_v15 = vpop.permute.xlu1 %1887  ;;  %3333 = vperm.xlu0 %6034, %v3300_v1   ;;  %v6056_v1 = vld [vmem:[#allocation5 + $0xd0] sm:$0xff]  }
  0xd9   : > { %3336 = vperm.xlu1 %6035, %v3301_v6   ;;  %v1149_v6 = vsel %vm1117_vm12, 1, %v6283_v0  ;;  %5285 = vmatprep.subr.bf16.mxu0 %v6056_v1 }
  0xda   : > { %5286 = vmatpush3.bf16.msra.mxu0 %v6056_v1  ;;  %v6134_v1 = vld [vmem:[%s9214_s6 + $0x48] sm:$0xff] }
  0xdb   : > { %v6966_v29 = vpop.permute.xlu0 %959  ;;  %5287 = vmatprep.subr.bf16.mxu0 %v6058_v41  ;;  %vm1121_vm4 = vcmp.ge.s32.totalorder %v6134_v1, 1 }
  0xdc   : > { %v6968_v30 = vpop.permute.xlu1 %962  ;;  %1177 = vperm.xlu0 %6034, %v1144_v22  }
  0xdd   : > { %1180 = vperm.xlu1 %6035, %v1145_v20  }
  0xde   : > { %5288 = vmatpush3.bf16.msra.mxu0 %v6058_v41 }
  0xdf   : > { %v6978_v38 = vpop.permute.xlu0 %1890  ;;  %5289 = vmatprep.subr.bf16.mxu0 %v6060_v16 }
  0xe0   : > { %v6980_v31 = vpop.permute.xlu1 %1893  ;;  %1183 = vperm.xlu0 %6034, %v1146_v34   ;;  %v6131_v34 = vld [vmem:[%s9215_s7 + $0x30] sm:$0xff] }
  0xe1   : > { %1186 = vperm.xlu1 %6035, %v1147_v33   ;;  %v6130_v33 = vld [vmem:[%s9215_s7 + $0x38] sm:$0xff]  ;;  %vm3274_vm1 = vcmp.le.s32.totalorder %v6131_v34, 14  ;;  %v6137_v34 = vld [vmem:[%s9214_s6 + $0x50] sm:$0xff] }
  0xe2   : > { %vm3275_vm0 = vcmp.le.s32.totalorder %v6130_v33, 14  ;;  %v6136_v33 = vld [vmem:[%s9214_s6 + $0x58] sm:$0xff]  ;;  %vm1122_vm7 = vcmp.ge.s32.totalorder %v6137_v34, 1  ;;  %5290 = vmatpush3.bf16.msra.mxu0 %v6060_v16  ;;  %v3311_v16 = vsel %vm3279_vm8, 1, %v6283_v0  ;;  %vm1128_vm8 = vcmp.ge.s32.totalorder %v6697_v60, 1 }
  0xe3   : > { %v6990_v48 = vpop.permute.xlu0 %965  ;;  %vm1123_vm6 = vcmp.ge.s32.totalorder %v6136_v33, 1  ;;  %v1154_v46 = vsel %vm1122_vm7, 1, %v6283_v0  ;;  %v6141_v33 = vld [vmem:[%s9215_s7 + $0x60] sm:$0xff]  ;;  %vm1129_vm7 = vcmp.ge.s32.totalorder %v6704_v2, 1 }
  0xe4   : > { %v6992_v32 = vpop.permute.xlu1 %968  ;;  %3339 = vperm.xlu0 %6034, %v3302_v45   ;;  %v3306_v45 = vsel %vm3274_vm1, 1, %v6283_v0  ;;  %vm3280_vm11 = vcmp.le.s32.totalorder %v6141_v33, 14 }
  0xe5   : > { %3342 = vperm.xlu1 %6035, %v3303_v42   ;;  %v3307_v42 = vsel %vm3275_vm0, 1, %v6283_v0  ;;  %v3312_v47 = vsel %vm3280_vm11, 1, %v6283_v0 }
  0xe7   : > { %v7002_v55 = vpop.permute.xlu0 %1896 }
  0xe8   : > { %v7004_v58 = vpop.permute.xlu1 %1899  ;;  %3345 = vperm.xlu0 %6034, %v3304_v52  }
  0xe9   : > { %3348 = vperm.xlu1 %6035, %v3305_v49  }
  0xeb   : > { %v7014_v20 = vpop.permute.xlu0 %971 }
  0xec   : > { %v7016_v22 = vpop.permute.xlu1 %974  ;;  %1189 = vperm.xlu0 %6034, %v1148_v7  }
  0xed   : > { %1192 = vperm.xlu1 %6035, %v1149_v6   ;;  %v6135_v6 = vld [vmem:[%s9214_s6 + $0x40] sm:$0xff] }
  0xee   : > { %vm1120_vm5 = vcmp.ge.s32.totalorder %v6135_v6, 1  ;;  %v6062_v6 = vld [vmem:[#allocation5 + $0xe8] sm:$0xff]  }
  0xef   : > { %v7026_v36 = vpop.permute.xlu0 %1902  ;;  %5291 = vmatprep.subr.bf16.mxu0 %v6062_v6 }
  0xf0   : > { %9499 = vst [vmem:[#allocation13_spill] sm:$0xff] %v7026_v36  ;;  %v7028_v37 = vpop.permute.xlu1 %1905  ;;  %1195 = vperm.xlu0 %6034, %v1150_v25   ;;  %v1152_v25 = vsel %vm1120_vm5, 1, %v6283_v0  ;;  %5292 = vmatpush3.bf16.msra.mxu0 %v6062_v6 }
  0xf1   : > { %9500 = vst [vmem:[#allocation14_spill] sm:$0xff] %v7028_v37  ;;  %1198 = vperm.xlu1 %6035, %v1151_v24   ;;  %v1153_v24 = vsel %vm1121_vm4, 1, %v6283_v0 }
  0xf3   : > { %v7038_v49 = vpop.permute.xlu0 %977 }
  0xf4   : > { %v7040_v52 = vpop.permute.xlu1 %980  ;;  %3351 = vperm.xlu0 %6034, %v3306_v45   ;;  %v1155_v45 = vsel %vm1123_vm6, 1, %v6283_v0 }
  0xf5   : > { %3354 = vperm.xlu1 %6035, %v3307_v42  }
  0xf7   : > { %v7050_v7 = vpop.permute.xlu0 %1908 }
  0xf8   : > { %9501 = vst [vmem:[#allocation15_spill] sm:$0xff] %v7050_v7  ;;  %v7052_v9 = vpop.permute.xlu1 %1911  ;;  %3357 = vperm.xlu0 %6034, %v3308_v54  }
  0xf9   : > { %9502 = vst [vmem:[#allocation16_spill] sm:$0xff] %v7052_v9  ;;  %3360 = vperm.xlu1 %6035, %v3309_v53   ;;  %v6139_v53 = vld [vmem:[%s9215_s7 + $0x50] sm:$0xff] }
  0xfa   : > { %vm3278_vm9 = vcmp.le.s32.totalorder %v6139_v53, 14  ;;  %v6142_v53 = vld [vmem:[%s9214_s6 + $0x68] sm:$0xff] }
  0xfb   : > { %v7062_v41 = vpop.permute.xlu0 %983  ;;  %vm1125_vm12 = vcmp.ge.s32.totalorder %v6142_v53, 1  ;;  %v6144_v53 = vld [vmem:[%s9214_s6 + $0x78] sm:$0xff] }
  0xfc   : > { %9503 = vst [vmem:[#allocation17_spill] sm:$0xff] %v7062_v41  ;;  %v7064_v42 = vpop.permute.xlu1 %986  ;;  %1201 = vperm.xlu0 %6034, %v1152_v25   ;;  %v6140_v25 = vld [vmem:[%s9215_s7 + $0x68] sm:$0xff]  ;;  %vm1127_vm14 = vcmp.ge.s32.totalorder %v6144_v53, 1  ;;  %v6146_v53 = vld [vmem:[%s9215_s7 + $0x78] sm:$0xff] }
  0xfd   : > { %9504 = vst [vmem:[#allocation18_spill] sm:$0xff] %v7064_v42  ;;  %1204 = vperm.xlu1 %6035, %v1153_v24   ;;  %v3310_v24 = vsel %vm3278_vm9, 1, %v6283_v0  ;;  %vm3281_vm10 = vcmp.le.s32.totalorder %v6140_v25, 14  ;;  %v6143_v25 = vld [vmem:[%s9214_s6 + $0x60] sm:$0xff]  ;;  %vm3283_vm0 = vcmp.le.s32.totalorder %v6146_v53, 14 }
  0xfe   : > { %vm1124_vm13 = vcmp.ge.s32.totalorder %v6143_v25, 1  ;;  %v6145_v25 = vld [vmem:[%s9214_s6 + $0x70] sm:$0xff] }
  0xff   : > { %v7074_v54 = vpop.permute.xlu0 %1914  ;;  %vm1126_vm15 = vcmp.ge.s32.totalorder %v6145_v25, 1 }
 0x100   : > { %9505 = vst [vmem:[#allocation19_spill] sm:$0xff] %v7074_v54  ;;  %v7076_v1 = vpop.permute.xlu1 %1917  ;;  %1207 = vperm.xlu0 %6034, %v1154_v46   ;;  %v3313_v46 = vsel %vm3281_vm10, 1, %v6283_v0  ;;  %v1158_v54 = vsel %vm1126_vm15, 1, %v6283_v0 }
 0x101   : > { %9506 = vst [vmem:[#allocation20_spill] sm:$0xff] %v7076_v1  ;;  %1210 = vperm.xlu1 %6035, %v1155_v45   ;;  %v1156_v1 = vsel %vm1124_vm13, 1, %v6283_v0  ;;  %vm1130_vm13 = vcmp.ge.s32.totalorder %v6743_v26, 1 }
 0x103   : > { %v7086_v34 = vpop.permute.xlu0 %989 }
 0x104   : > { %9507 = vst [vmem:[#allocation21_spill] sm:$0xff] %v7086_v34  ;;  %v7088_v45 = vpop.permute.xlu1 %992  ;;  %3363 = vperm.xlu0 %6034, %v3310_v24   ;;  %v1157_v24 = vsel %vm1125_vm12, 1, %v6283_v0  ;;  %vm1131_vm12 = vcmp.ge.s32.totalorder %v6752_v35, 1  ;;  %v1162_v35 = vsel %vm1130_vm13, 1, %v6283_v0 }
 0x105   : > { %9508 = vst [vmem:[#allocation22_spill] sm:$0xff] %v7088_v45  ;;  %3366 = vperm.xlu1 %6035, %v3311_v16   ;;  %v6064_v16 = vld [vmem:[#allocation5 + $0xf0] sm:$0xff]   ;;  %v1163_v26 = vsel %vm1131_vm12, 1, %v6283_v0 }
 0x106   : > { %5293 = vmatprep.subr.bf16.mxu0 %v6064_v16 }
 0x107   : > { %v7098_v6 = vpop.permute.xlu0 %1920  ;;  %5294 = vmatpush3.bf16.msra.mxu0 %v6064_v16  ;;  %v6147_v16 = vld [vmem:[%s9215_s7 + $0x70] sm:$0xff] }
 0x108   : > { %9509 = vst [vmem:[#allocation23_spill] sm:$0xff] %v7098_v6  ;;  %v7100_v33 = vpop.permute.xlu1 %1923  ;;  %3369 = vperm.xlu0 %6034, %v3312_v47   ;;  %v6066_v47 = vld [vmem:[#allocation5 + $0xf8] sm:$0xff]   ;;  %v1159_v6 = vsel %vm1127_vm14, 1, %v6283_v0  ;;  %vm3282_vm1 = vcmp.le.s32.totalorder %v6147_v16, 14 }
 0x109   : > { %9510 = vst [vmem:[#allocation24_spill] sm:$0xff] %v7100_v33  ;;  %3372 = vperm.xlu1 %6035, %v3313_v46   ;;  %5295 = vmatprep.subr.bf16.mxu0 %v6066_v47  ;;  %v3314_v53 = vsel %vm3282_vm1, 1, %v6283_v0  ;;  %vm3287_vm1 = vcmp.le.s32.totalorder %v6724_v12, 14 }
 0x10b   : > { %v7110_v33 = vpop.permute.xlu0 %995  ;;  %5296 = vmatpush3.bf16.msra.mxu0 %v6066_v47  ;;  %v6149_v47 = vld [vmem:[%s9215_s7 + $0x80] sm:$0xff] }
 0x10c   : > { %9511 = vst [vmem:[#allocation25_spill] sm:$0xff] %v7110_v33  ;;  %v7112_v46 = vpop.permute.xlu1 %998  ;;  %1213 = vperm.xlu0 %6034, %v1156_v1   ;;  %v9513_v1 = vmov 0  ;;  %v6148_v33 = vld [vmem:[%s9215_s7 + $0x88] sm:$0xff]  ;;  %vm3284_vm6 = vcmp.le.s32.totalorder %v6149_v47, 14  ;;  %v9518_v47 = vmov 0 }
 0x10d   : > { %9512 = vst [vmem:[#allocation26_spill] sm:$0xff] %v7112_v46  ;;  %1216 = vperm.xlu1 %6035, %v1157_v24   ;;  %v3315_v24 = vsel %vm3283_vm0, 1, %v6283_v0  ;;  %vm3285_vm5 = vcmp.le.s32.totalorder %v6148_v33, 14 }
 0x10e   : > { %v3317_v16 = vsel %vm3285_vm5, 1, %v6283_v0 }
 0x10f   : > { %v1927_v25 = vpop.permute.xlu0 %1926 }
 0x110   : > { %v1930_v46 = vpop.permute.xlu1 %1929  ;;  %vm1993_vm2 = vcmp.eq.s32.totalorder %v1927_v25, 1  ;;  %1219 = vperm.xlu0 %6034, %v1158_v54   ;;  %v3316_v25 = vsel %vm3284_vm6, 1, %v6283_v0 }
 0x111   : > { %vm1994_vm3 = vcmp.eq.s32.totalorder %v1930_v46, 1  ;;  %1222 = vperm.xlu1 %6035, %v1159_v6   ;;  %v6068_v6 = vld [vmem:[#allocation5] sm:$0xff]  }
 0x112   : > { %vm7122_vm4 = vmpackc.low %vm1994_vm3, %vm1993_vm2  ;;  %5329 = vmatprep.subr.bf16.mxu0 %v6068_v6  ;;  %vm3286_vm2 = vcmp.le.s32.totalorder %v6719_v11, 14 }
 0x113   : > { %v9514_v1 = vsel %vm7122_vm4, 4294967295, %v9513_v1  ;;  %v7134_v54 = vpop.permute.xlu0 %1001 }
 0x114   : > { %9515 = vst [vmem:[#allocation27_spill] sm:$0xff] %v9514_v1  ;;  %9516 = vst [vmem:[#allocation28_spill] sm:$0xff] %v7134_v54  ;;  %v7136_v46 = vpop.permute.xlu1 %1004  ;;  %3375 = vperm.xlu0 %6034, %v3314_v53   ;;  %v1160_v53 = vsel %vm1128_vm8, 1, %v6283_v0  ;;  %vm3288_vm8 = vcmp.le.s32.totalorder %v6769_v43, 14  ;;  %v9531_v43 = vmov 0 }
 0x115   : > { %9517 = vst [vmem:[#allocation29_spill] sm:$0xff] %v7136_v46  ;;  %3378 = vperm.xlu1 %6035, %v3315_v24   ;;  %v1161_v24 = vsel %vm1129_vm7, 1, %v6283_v0  ;;  %vm3289_vm7 = vcmp.le.s32.totalorder %v6774_v44, 14 }
 0x117   : > { %v1933_v33 = vpop.permute.xlu0 %1932 }
 0x118   : > { %v1936_v1 = vpop.permute.xlu1 %1935  ;;  %vm1995_vm9 = vcmp.eq.s32.totalorder %v1933_v33, 1  ;;  %3381 = vperm.xlu0 %6034, %v3316_v25   ;;  %v9526_v25 = vmov 0  ;;  %v3319_v33 = vsel %vm3287_vm1, 1, %v6283_v0 }
 0x119   : > { %vm1996_vm10 = vcmp.eq.s32.totalorder %v1936_v1, 1  ;;  %3384 = vperm.xlu1 %6035, %v3317_v16   ;;  %v9523_v1 = vmov 0 }
 0x11a   : > { %vm7142_vm11 = vmpackc.low %vm1996_vm10, %vm1995_vm9  ;;  %vm1133_vm9 = vcmp.ge.s32.totalorder %v6788_v51, 1  ;;  %vm1132_vm10 = vcmp.ge.s32.totalorder %v6783_v50, 1 }
 0x11b   : > { %v9519_v47 = vsel %vm7142_vm11, 4294967295, %v9518_v47  ;;  %v7150_v2 = vpop.permute.xlu0 %1007  ;;  %v1165_v44 = vsel %vm1133_vm9, 1, %v6283_v0  ;;  %vm3291_vm9 = vcmp.le.s32.totalorder %v6802_v57, 14 }
 0x11c   : > { %9520 = vst [vmem:[#allocation30_spill] sm:$0xff] %v9519_v47  ;;  %9521 = vst [vmem:[#allocation31_spill] sm:$0xff] %v7150_v2  ;;  %v7152_v60 = vpop.permute.xlu1 %1010  ;;  %vm9232_vm14 = vcmp.eq.s32.totalorder %v7150_v2, 1  ;;  %1225 = vperm.xlu0 %6034, %v1160_v53   ;;  %v3321_v53 = vsel %vm3289_vm7, 1, %v6283_v0 }
 0x11d   : > { %9522 = vst [vmem:[#allocation32_spill] sm:$0xff] %v7152_v60  ;;  %vm9229_vm15 = vcmp.eq.s32.totalorder %v7152_v60, 1  ;;  %1228 = vperm.xlu1 %6035, %v1161_v24   ;;  %v3318_v24 = vsel %vm3286_vm2, 1, %v6283_v0  ;;  %vm1135_vm2 = vcmp.ge.s32.totalorder %v6816_v62, 1 }
 0x11e   : > { %vm7160_vm0 = vmpackc.low %vm9229_vm15, %vm9232_vm14 }
 0x11f   : > { %v9524_v1 = vsel %vm7160_vm0, 4294967295, %v9523_v1  ;;  %v1939_v6 = vpop.permute.xlu0 %1938 }
 0x120   : > { %9525 = vst [vmem:[#allocation33_spill] sm:$0xff] %v9524_v1  ;;  %v1942_v16 = vpop.permute.xlu1 %1941  ;;  %vm1997_vm3 = vcmp.eq.s32.totalorder %v1939_v6, 1  ;;  %1231 = vperm.xlu0 %6034, %v1162_v35   ;;  %v6055_v1 = vld [vmem:[#allocation5 + $0x1c8] sm:$0xff]  }
 0x121   : > { %vm1998_vm5 = vcmp.eq.s32.totalorder %v1942_v16, 1  ;;  %1234 = vperm.xlu1 %6035, %v1163_v26   ;;  %v3320_v26 = vsel %vm3288_vm8, 1, %v6283_v0  ;;  %v1164_v16 = vsel %vm1132_vm10, 1, %v6283_v0  ;;  %vm3290_vm10 = vcmp.le.s32.totalorder %v6797_v56, 14 }
 0x122   : > { %vm7168_vm6 = vmpackc.low %vm1998_vm5, %vm1997_vm3  ;;  %vm1134_vm3 = vcmp.ge.s32.totalorder %v6811_v61, 1  ;;  %v1167_v61 = vsel %vm1135_vm2, 1, %v6283_v0  ;;  %vm3293_vm2 = vcmp.le.s32.totalorder %v6830_v4, 14 }
 0x123   : > { %v9527_v25 = vsel %vm7168_vm6, 4294967295, %v9526_v25  ;;  %v7176_v12 = vpop.permute.xlu0 %1013  ;;  %v1166_v62 = vsel %vm1134_vm3, 1, %v6283_v0  ;;  %vm3292_vm3 = vcmp.le.s32.totalorder %v6825_v3, 14  ;;  %v9544_v3 = vmov 0 }
 0x124   : > { %9528 = vst [vmem:[#allocation34_spill] sm:$0xff] %v9527_v25  ;;  %9529 = vst [vmem:[#allocation35_spill] sm:$0xff] %v7176_v12  ;;  %v7178_v11 = vpop.permute.xlu1 %1016  ;;  %3387 = vperm.xlu0 %6034, %v3318_v24   ;;  %v9581_v12 = vmov 0 }
 0x125   : > { %9530 = vst [vmem:[#allocation36_spill] sm:$0xff] %v7178_v11  ;;  %3390 = vperm.xlu1 %6035, %v3319_v33   ;;  %v9536_v33 = vmov 0 }
 0x127   : > { %v1945_v35 = vpop.permute.xlu0 %1944 }
 0x128   : > { %v1948_v6 = vpop.permute.xlu1 %1947  ;;  %vm1999_vm12 = vcmp.eq.s32.totalorder %v1945_v35, 1  ;;  %3393 = vperm.xlu0 %6034, %v3320_v26   ;;  %v9539_v26 = vmov 0  ;;  %v3323_v35 = vsel %vm3291_vm9, 1, %v6283_v0  ;;  %vm1136_vm9 = vcmp.ge.s32.totalorder %v6835_v5, 1 }
 0x129   : > { %vm2000_vm13 = vcmp.eq.s32.totalorder %v1948_v6, 1  ;;  %3396 = vperm.xlu1 %6035, %v3321_v53   ;;  %v3322_v6 = vsel %vm3290_vm10, 1, %v6283_v0 }
 0x12a   : > { %vm7184_vm1 = vmpackc.low %vm2000_vm13, %vm1999_vm12 }
 0x12b   : > { %v9532_v43 = vsel %vm7184_vm1, 4294967295, %v9531_v43  ;;  %v7192_v51 = vpop.permute.xlu0 %1019 }
 0x12c   : > { %9533 = vst [vmem:[#allocation37_spill] sm:$0xff] %v9532_v43  ;;  %9534 = vst [vmem:[#allocation38_spill] sm:$0xff] %v7192_v51  ;;  %v7194_v50 = vpop.permute.xlu1 %1022  ;;  %vm9231_vm5 = vcmp.eq.s32.totalorder %v7192_v51, 1  ;;  %1237 = vperm.xlu0 %6034, %v1164_v16   ;;  %v3324_v16 = vsel %vm3292_vm3, 1, %v6283_v0  ;;  %vm1138_vm3 = vcmp.ge.s32.totalorder %v6865_v17, 1 }
 0x12d   : > { %9535 = vst [vmem:[#allocation39_spill] sm:$0xff] %v7194_v50  ;;  %vm9230_vm7 = vcmp.eq.s32.totalorder %v7194_v50, 1  ;;  %1240 = vperm.xlu1 %6035, %v1165_v44   ;;  %v3325_v44 = vsel %vm3293_vm2, 1, %v6283_v0  ;;  %vm1139_vm2 = vcmp.ge.s32.totalorder %v6870_v18, 1  ;;  %v1170_v18 = vsel %vm1138_vm3, 1, %v6283_v0 }
 0x12e   : > { %vm7202_vm8 = vmpackc.low %vm9230_vm7, %vm9231_vm5  ;;  %v1171_v17 = vsel %vm1139_vm2, 1, %v6283_v0  ;;  %vm3297_vm2 = vcmp.le.s32.totalorder %v6884_v23, 14  ;;  %vm3296_vm3 = vcmp.le.s32.totalorder %v6878_v21, 14 }
 0x12f   : > { %v9537_v33 = vsel %vm7202_vm8, 4294967295, %v9536_v33  ;;  %v1951_v24 = vpop.permute.xlu0 %1950 }
 0x130   : > { %9538 = vst [vmem:[#allocation40_spill] sm:$0xff] %v9537_v33  ;;  %v1954_v53 = vpop.permute.xlu1 %1953  ;;  %vm2001_vm12 = vcmp.eq.s32.totalorder %v1951_v24, 1  ;;  %1243 = vperm.xlu0 %6034, %v1166_v62   ;;  %v1168_v24 = vsel %vm1136_vm9, 1, %v6283_v0  ;;  %vm3295_vm9 = vcmp.le.s32.totalorder %v6856_v13, 14 }
 0x131   : > { %vm2002_vm13 = vcmp.eq.s32.totalorder %v1954_v53, 1  ;;  %1246 = vperm.xlu1 %6035, %v1167_v61   ;;  %v9549_v53 = vmov 0 }
 0x132   : > { %vm7210_vm15 = vmpackc.low %vm2002_vm13, %vm2001_vm12  ;;  %vm1137_vm12 = vcmp.ge.s32.totalorder %v6842_v8, 1 }
 0x133   : > { %v9540_v26 = vsel %vm7210_vm15, 4294967295, %v9539_v26  ;;  %v7218_v57 = vpop.permute.xlu0 %1025  ;;  %v1169_v4 = vsel %vm1137_vm12, 1, %v6283_v0 }
 0x134   : > { %9541 = vst [vmem:[#allocation41_spill] sm:$0xff] %v9540_v26  ;;  %9542 = vst [vmem:[#allocation42_spill] sm:$0xff] %v7218_v57  ;;  %v7220_v56 = vpop.permute.xlu1 %1028  ;;  %3399 = vperm.xlu0 %6034, %v3322_v6  }
 0x135   : > { %9543 = vst [vmem:[#allocation43_spill] sm:$0xff] %v7220_v56  ;;  %3402 = vperm.xlu1 %6035, %v3323_v35  }
 0x137   : > { %v1957_v61 = vpop.permute.xlu0 %1956 }
 0x138   : > { %v1960_v62 = vpop.permute.xlu1 %1959  ;;  %vm2003_vm10 = vcmp.eq.s32.totalorder %v1957_v61, 1  ;;  %3405 = vperm.xlu0 %6034, %v3324_v16   ;;  %v3327_v16 = vsel %vm3295_vm9, 1, %v6283_v0  ;;  %vm1140_vm9 = vcmp.ge.s32.totalorder %v6893_v27, 1 }
 0x139   : > { %vm2004_vm13 = vcmp.eq.s32.totalorder %v1960_v62, 1  ;;  %3408 = vperm.xlu1 %6035, %v3325_v44   ;;  %v9552_v44 = vmov 0  ;;  %v853_v62 = vlaneseq  ;;  %v1172_v27 = vsel %vm1140_vm9, 1, %v6283_v0 }
 0x13a   : > { %vm7226_vm7 = vmpackc.low %vm2004_vm13, %vm2003_vm10  ;;  %vm3294_vm10 = vcmp.le.s32.totalorder %v6851_v10, 14 }
 0x13b   : > { %v9545_v3 = vsel %vm7226_vm7, 4294967295, %v9544_v3  ;;  %v7234_v8 = vpop.permute.xlu0 %1031  ;;  %v3326_v61 = vsel %vm3294_vm10, 1, %v6283_v0 }
 0x13c   : > { %9546 = vst [vmem:[#allocation44_spill] sm:$0xff] %v9545_v3  ;;  %9547 = vst [vmem:[#allocation45_spill] sm:$0xff] %v7234_v8  ;;  %v7236_v5 = vpop.permute.xlu1 %1034  ;;  %vm9243_vm5 = vcmp.eq.s32.totalorder %v7234_v8, 1  ;;  %1249 = vperm.xlu0 %6034, %v1168_v24   ;;  %v3328_v24 = vsel %vm3296_vm3, 1, %v6283_v0  ;;  %vm1143_vm3 = vcmp.ge.s32.totalorder %v6921_v40, 1 }
 0x13d   : > { %9548 = vst [vmem:[#allocation46_spill] sm:$0xff] %v7236_v5  ;;  %vm9237_vm14 = vcmp.eq.s32.totalorder %v7236_v5, 1  ;;  %1252 = vperm.xlu1 %6035, %v1169_v4   ;;  %v3329_v4 = vsel %vm3297_vm2, 1, %v6283_v0 }
 0x13e   : > { %vm7244_vm12 = vmpackc.low %vm9237_vm14, %vm9243_vm5  ;;  %vm1142_vm14 = vcmp.ge.s32.totalorder %v6916_v39, 1 }
 0x13f   : > { %v9550_v53 = vsel %vm7244_vm12, 4294967295, %v9549_v53  ;;  %v1963_v35 = vpop.permute.xlu0 %1962 }
 0x140   : > { %9551 = vst [vmem:[#allocation47_spill] sm:$0xff] %v9550_v53  ;;  %v1966_v6 = vpop.permute.xlu1 %1965  ;;  %vm2005_vm13 = vcmp.eq.s32.totalorder %v1963_v35, 1  ;;  %1255 = vperm.xlu0 %6034, %v1170_v18   ;;  %v7273_v18 = vshrl.u32 %v853_v62, 7 }
 0x141   : > { %vm2006_vm7 = vcmp.eq.s32.totalorder %v1966_v6, 1  ;;  %1258 = vperm.xlu1 %6035, %v1171_v17   ;;  %v7269_v17 = vld [vmem:[%s9212_s4] ss:$0 sm:$0xff]  ;;  %v9557_v6 = vmov 0 }
 0x142   : > { %vm7252_vm15 = vmpackc.low %vm2006_vm7, %vm2005_vm13  ;;  %vm1141_vm7 = vcmp.ge.s32.totalorder %v6898_v28, 1  ;;  %vm9321_vm9 = vcmp.lt.s32.totalorder %v7273_v18, 7 }
 0x143   : > { %v9553_v44 = vsel %vm7252_vm15, 4294967295, %v9552_v44  ;;  %v7260_v13 = vpop.permute.xlu0 %1037  ;;  %v1173_v28 = vsel %vm1141_vm7, 1, %v6283_v0 }
 0x144   : > { %9554 = vst [vmem:[#allocation48_spill] sm:$0xff] %v9553_v44  ;;  %9555 = vst [vmem:[#allocation49_spill] sm:$0xff] %v7260_v13  ;;  %v7262_v10 = vpop.permute.xlu1 %1040  ;;  %3411 = vperm.xlu0 %6034, %v3326_v61  }
 0x145   : > { %9556 = vst [vmem:[#allocation50_spill] sm:$0xff] %v7262_v10  ;;  %3414 = vperm.xlu1 %6035, %v3327_v16  }
 0x147   : > { %v1969_v21 = vpop.permute.xlu0 %1968  ;;  %v5251_v35 = vpop.f32.mrb[0].mxu0 }
 0x148   : > { %v1972_v23 = vpop.permute.xlu1 %1971  ;;  %vm2007_vm10 = vcmp.eq.s32.totalorder %v1969_v21, 1  ;;  %3417 = vperm.xlu0 %6034, %v3328_v24   ;;  %v607_v16 = vadd.f32 %v5251_v35, %v7269_v17  ;;  %v598_v61 = vpop.f32.mrb[1].mxu0 }
 0x149   : > { %vm2008_vm13 = vcmp.eq.s32.totalorder %v1972_v23, 1  ;;  %3420 = vperm.xlu1 %6035, %v3329_v4   ;;  %v599_v44 = vadd.f32 %v7269_v17, %v598_v61  ;;  %v5252_v62 = vpop.f32.mrb[2].mxu0 }
 0x14a   : > { %vm7275_vm2 = vmpackc.low %vm2008_vm13, %vm2007_vm10  ;;  %v727_v4 = vmax.f32 %v607_v16, 0.0  ;;  %v610_v24 = vadd.f32 %v5252_v62, %v7269_v17  ;;  %vm9298_vm10 = vcmp.lt.s32.totalorder %v7273_v18, 1  ;;  %v601_v21 = vpop.f32.mrb[3].mxu0  ;;  %v1175_v62 = vsel %vm1143_vm3, 1, %v6283_v0 }
 0x14b   : > { %v9558_v6 = vsel %vm7275_vm2, 4294967295, %v9557_v6  ;;  %v7287_v23 = vpop.permute.xlu0 %1043  ;;  %v7289_v35 = vmax.f32 %v599_v44, 0.0  ;;  %v1174_v44 = vsel %vm1142_vm14, 1, %v6283_v0 }
 0x14c   : > { %9559 = vst [vmem:[#allocation51_spill] sm:$0xff] %v9558_v6  ;;  %9560 = vst [vmem:[#allocation52_spill] sm:$0xff] %v7287_v23  ;;  %v602_v6 = vadd.f32 %v7269_v17, %v601_v21  ;;  %vm9253_vm7 = vcmp.eq.s32.totalorder %v7287_v23, 1  ;;  %v7293_v61 = vpop.permute.xlu1 %1046  ;;  %1261 = vperm.xlu0 %6034, %v1172_v27   ;;  %v7296_v16 = vmax.f32 %v610_v24, 0.0  ;;  %v823_v21 = vrot.slane %v727_v4, 7 }
 0x14d   : > { %9561 = vst [vmem:[#allocation53_spill] sm:$0xff] %v7293_v61  ;;  %1264 = vperm.xlu1 %6035, %v1173_v28   ;;  %vm9266_vm13 = vcmp.eq.s32.totalorder %v7293_v61, 1  ;;  %v3205_v53 = vrot.slane %v727_v4, 1  ;;  %v9562_v27 = vmov 0 }
 0x14e   : > { %v726_v28 = vmax.f32 %v602_v6, 0.0  ;;  %vm7310_vm5 = vmpackc.low %vm9266_vm13, %vm9253_vm7  ;;  %v9254_v24 = vrot.slane %v7296_v16, 7  ;;  %v3206_v39 = vrot.slane %v7296_v16, 1  ;;  %v7318_v26 = vpack.c.bf16 %v7296_v16, %v727_v4 }
 0x14f   : > { %v9563_v27 = vsel %vm7310_vm5, 4294967295, %v9562_v27  ;;  %v1975_v0 = vpop.permute.xlu0 %1974  ;;  %v5255_v43 = vpop.f32.mrb[4].mxu0 }
 0x150   : > { %9564 = vst [vmem:[#allocation54_spill] sm:$0xff] %v9563_v27  ;;  %9565 = vst [vmem:[#allocation55_spill] sm:$0xff] %v7318_v26  ;;  %v822_v3 = vrot.slane %v726_v28, 7  ;;  %v3204_v6 = vrot.slane %v726_v28, 1  ;;  %vm2009_vm14 = vcmp.eq.s32.totalorder %v1975_v0, 1  ;;  %v1978_v33 = vpop.permute.xlu1 %1977  ;;  %1267 = vperm.xlu0 %6034, %v1174_v44   ;;  %v7321_v25 = vpack.c.bf16 %v726_v28, %v7289_v35  ;;  %v614_v27 = vpop.f32.mrb[5].mxu0 }
 0x151   : > { %1270 = vperm.xlu1 %6035, %v1175_v62   ;;  %v7327_v40 = vsel %vm9298_vm10, %v823_v21, %v9254_v24  ;;  %vm2010_vm3 = vcmp.eq.s32.totalorder %v1978_v33, 1  ;;  %v623_v4 = vadd.f32 %v5255_v43, %v7269_v17  ;;  %v7332_v0 = vsel %vm9321_vm9, %v3205_v53, %v3206_v39  ;;  %v5256_v24 = vpop.f32.mrb[6].mxu0 }
 0x152   : > { %9566 = vst [vmem:[#allocation56_spill] sm:$0xff] %v7321_v25  ;;  %9567 = vst [vmem:[#allocation57_spill] sm:$0xff] %v7332_v0  ;;  %v7336_v62 = vsel %vm9298_vm10, %v822_v3, %v823_v21  ;;  %v9568_v44 = vmov 0  ;;  %v615_v28 = vadd.f32 %v7269_v17, %v614_v27  ;;  %5489 = vmatprep.mubr.bf16.mxu1 %v7321_v25  ;;  %v9571_v43 = vrot.slane %v7289_v35, 1 }
 0x153   : > { %vm7338_vm7 = vmpackc.low %vm2010_vm3, %vm2009_vm14  ;;  %v7352_v47 = vsel %vm9321_vm9, %v3204_v6, %v3205_v53  ;;  %v7356_v5 = vmax.f32 %v623_v4, 0.0  ;;  %v626_v27 = vadd.f32 %v5256_v24, %v7269_v17  ;;  %5490 = vmatmul.mubr.bf16.vlgmr.msra.gmra.mrb[0].mxu1 %v7318_v26  ;;  %v7360_v25 = vpop.permute.xlu0 %3423  ;;  %v9576_v4 = vrot.slane %v7289_v35, 7 }
 0x154   : > { %v9569_v44 = vsel %vm7338_vm7, 4294967295, %v9568_v44  ;;  %v7348_v33 = vsel %vm9321_vm9, %v9571_v43, %v3204_v6  ;;  %9573 = vst [vmem:[#allocation60_spill] sm:$0xff] %v7352_v47  ;;  %9574 = vst [vmem:[#allocation61_spill] sm:$0xff] %v7360_v25  ;;  %v7364_v8 = vmax.f32 %v615_v28, 0.0  ;;  %5522 = vmatpush3.bf16.msra.mxu1 %v6955_v19  ;;  %v7368_v6 = vpop.permute.xlu1 %3426  ;;  %vm9271_vm14 = vcmp.eq.s32.totalorder %v6951_v14, 1  ;;  %v6057_v43 = vld [vmem:[#allocation5 + $0x1d0] sm:$0xff]  }
 0x155   : > { %9570 = vst [vmem:[#allocation58_spill] sm:$0xff] %v9569_v44  ;;  %9572 = vst [vmem:[#allocation59_spill] sm:$0xff] %v7348_v33  ;;  %v617_v44 = vpop.f32.mrb[7].mxu0  ;;  %v7374_v24 = vsel %vm9298_vm10, %v9576_v4, %v822_v3  ;;  %v7377_v21 = vmax.f32 %v626_v27, 0.0  ;;  %5523 = vmatprep.subr.bf16.mxu1 %v6055_v1  ;;  %vm9274_vm3 = vcmp.eq.s32.totalorder %v6966_v29, 1  ;;  %v3209_v3 = vrot.slane %v7356_v5, 1 }
 0x156   : > { %v618_v53 = vadd.f32 %v7269_v17, %v617_v44  ;;  %9575 = vst [vmem:[#allocation62_spill] sm:$0xff] %v7368_v6  ;;  %v3207_v44 = vrot.slane %v7364_v8, 1  ;;  %v7386_v19 = vsel %vm9271_vm14, %v7374_v24, 0.0  ;;  %v7397_v51 = vsel %vm9274_vm3, %v7336_v62, 0.0 }
 0x157   : > { %v3210_v4 = vrot.slane %v7377_v21, 1  ;;  %v3334_v50 = vpop.permute.xlu0 %3333  ;;  %v7392_v27 = vpack.c.bf16 %v7377_v21, %v7356_v5  ;;  %9578 = vst [vmem:[#allocation64_spill] sm:$0xff] %v7397_v51  ;;  %v5259_v10 = vpop.f32.mrb[8].mxu0  ;;  %v6059_v51 = vld [vmem:[#allocation5 + $0x1d8] sm:$0xff]  }
 0x158   : > { %v7381_v28 = vmax.f32 %v618_v53, 0.0  ;;  %vm3428_vm13 = vcmp.eq.s32.totalorder %v3334_v50, 1  ;;  %v3337_v2 = vpop.permute.xlu1 %3336  ;;  %5524 = vmatpush3.bf16.msra.mxu1 %v6055_v1  ;;  %v639_v57 = vadd.f32 %v5259_v10, %v7269_v17  ;;  %v630_v11 = vpop.f32.mrb[9].mxu0  ;;  %v7409_v53 = vsel %vm9321_vm9, %v3206_v39, %v3207_v44 }
 0x159   : > { %9577 = vst [vmem:[#allocation63_spill] sm:$0xff] %v7392_v27  ;;  %v3460_v56 = vsel %vm3428_vm13, %v7348_v33, 0.0  ;;  %vm3429_vm14 = vcmp.eq.s32.totalorder %v3337_v2, 1  ;;  %5525 = vmatprep.subr.bf16.mxu1 %v6057_v43  ;;  %9580 = vst [vmem:[#allocation66_spill] sm:$0xff] %v7409_v53  ;;  %v631_v1 = vadd.f32 %v7269_v17, %v630_v11  ;;  %v5260_v23 = vpop.f32.mrb[10].mxu0 }
 0x15a   : > { %v3208_v60 = vrot.slane %v7381_v28, 1  ;;  %v7403_v13 = vpack.c.bf16 %v7381_v28, %v7364_v8  ;;  %v3461_v50 = vsel %vm3429_vm14, %v7352_v47, 0.0  ;;  %vm7412_vm3 = vmpackc.low %vm3429_vm14, %vm3428_vm13  ;;  %v7426_v33 = vmax.f32 %v639_v57, 0.0  ;;  %v633_v46 = vpop.f32.mrb[11].mxu0 }
 0x15b   : > { %v9582_v12 = vsel %vm7412_vm3, 4294967295, %v9581_v12  ;;  %v7424_v39 = vpack.c.bf16 %v3461_v50, %v3460_v56  ;;  %v642_v47 = vadd.f32 %v5260_v23, %v7269_v17  ;;  %v7430_v11 = vpop.permute.xlu0 %1177  ;;  %v7436_v2 = vmax.f32 %v631_v1, 0.0  ;;  %v6061_v50 = vld [vmem:[#allocation5 + $0x1e0] sm:$0xff]  }
 0x15c   : > { %9579 = vst [vmem:[#allocation65_spill] sm:$0xff] %v7403_v13  ;;  %9583 = vst [vmem:[#allocation67_spill] sm:$0xff] %v9582_v12  ;;  %5493 = vmatprep.mubr.bf16.mxu1 %v7403_v13  ;;  %v7422_v10 = vsel %vm9321_vm9, %v3208_v60, %v3209_v3  ;;  %v7434_v12 = vsel %vm9321_vm9, %v3207_v44, %v3208_v60  ;;  %v634_v54 = vadd.f32 %v7269_v17, %v633_v46  ;;  %v7439_v61 = vpop.permute.xlu1 %1180 }
 0x15d   : > { %9584 = vst [vmem:[#allocation68_spill] sm:$0xff] %v7422_v10  ;;  %9585 = vst [vmem:[#allocation69_spill] sm:$0xff] %v7424_v39  ;;  %5494 = vmatmul.mubr.bf16.gmra.mrb[4].mxu1 %v7392_v27  ;;  %v825_v56 = vrot.slane %v7364_v8, 7  ;;  %v7444_v23 = vmax.f32 %v642_v47, 0.0  ;;  %v3211_v39 = vrot.slane %v7436_v2, 1  ;;  %v7451_v44 = vsel %vm9321_vm9, %v3209_v3, %v3210_v4 }
 0x15e   : > { %9586 = vst [vmem:[#allocation70_spill] sm:$0xff] %v7430_v11  ;;  %9587 = vst [vmem:[#allocation71_spill] sm:$0xff] %v7434_v12  ;;  %5526 = vmatpush3.bf16.msra.mxu1 %v6057_v43  ;;  %v7447_v60 = vmax.f32 %v634_v54, 0.0  ;;  %v3213_v46 = vrot.slane %v7426_v33, 1  ;;  %v9592_v8 = vrot.slane %v7381_v28, 7  ;;  %vm9689_vm3 = vcmp.eq.s32.totalorder %v6939_v59, 1 }
 0x15f   : > { %9588 = vst [vmem:[#allocation72_spill] sm:$0xff] %v7439_v61  ;;  %5527 = vmatprep.subr.bf16.mxu1 %v6059_v51  ;;  %9589 = vst [vmem:[#allocation73_spill] sm:$0xff] %v7451_v44  ;;  %v3214_v43 = vrot.slane %v7444_v23, 1  ;;  %v7455_v1 = vpop.permute.xlu0 %1183  ;;  %v7459_v47 = vpack.c.bf16 %v7444_v23, %v7426_v33  ;;  %v5263_v11 = vpop.f32.mrb[12].mxu0  ;;  %v7477_v13 = vsel %vm9321_vm9, %v3210_v4, %v3211_v39 }
 0x160   : > { %9590 = vst [vmem:[#allocation74_spill] sm:$0xff] %v7455_v1  ;;  %v7465_v54 = vsel %vm9298_vm10, %v825_v56, %v9592_v8  ;;  %v3212_v57 = vrot.slane %v7447_v60, 1  ;;  %v7468_v3 = vpop.permute.xlu1 %1186  ;;  %v7472_v61 = vpack.c.bf16 %v7447_v60, %v7436_v2  ;;  %v655_v1 = vadd.f32 %v5263_v11, %v7269_v17  ;;  %v646_v27 = vpop.f32.mrb[13].mxu0  ;;  %9595 = vst [vmem:[#allocation78_spill] sm:$0xff] %v7477_v13  ;;  %v6063_v8 = vld [vmem:[#allocation5 + $0x1e8] sm:$0xff]  }
 0x161   : > { %9591 = vst [vmem:[#allocation75_spill] sm:$0xff] %v7459_v47  ;;  %9593 = vst [vmem:[#allocation76_spill] sm:$0xff] %v7468_v3  ;;  %v7481_v45 = vsel %vm9321_vm9, %v3213_v46, %v3214_v43  ;;  %v647_v3 = vadd.f32 %v7269_v17, %v646_v27  ;;  %v5264_v34 = vpop.f32.mrb[14].mxu0 }
 0x162   : > { %9594 = vst [vmem:[#allocation77_spill] sm:$0xff] %v7472_v61  ;;  %5528 = vmatpush3.bf16.msra.mxu1 %v6059_v51  ;;  %9596 = vst [vmem:[#allocation79_spill] sm:$0xff] %v7481_v45  ;;  %5497 = vmatprep.mubr.bf16.mxu1 %v7472_v61  ;;  %v7489_v11 = vsel %vm9321_vm9, %v3212_v57, %v3213_v46  ;;  %v7493_v4 = vsel %vm9321_vm9, %v3211_v39, %v3212_v57  ;;  %v7495_v42 = vmax.f32 %v655_v1, 0.0  ;;  %v649_v6 = vpop.f32.mrb[15].mxu0  ;;  %v6065_v61 = vld [vmem:[#allocation5 + $0x1f0] sm:$0xff]  }
 0x163   : > { %5529 = vmatprep.subr.bf16.mxu1 %v6061_v50  ;;  %9597 = vst [vmem:[#allocation80_spill] sm:$0xff] %v7489_v11  ;;  %9598 = vst [vmem:[#allocation81_spill] sm:$0xff] %v7493_v4  ;;  %v658_v41 = vadd.f32 %v5264_v34, %v7269_v17  ;;  %v3340_v27 = vpop.permute.xlu0 %3339  ;;  %v9599_v51 = vrot.slane %v7296_v16, 7  ;;  %v7507_v25 = vmax.f32 %v647_v3, 0.0  ;;  %v650_v39 = vadd.f32 %v7269_v17, %v649_v6 }
 0x164   : > { %v3343_v57 = vpop.permute.xlu1 %3342  ;;  %vm3430_vm13 = vcmp.eq.s32.totalorder %v3340_v27, 1  ;;  %v9600_v3 = vmov 0  ;;  %vm9694_vm2 = vmmov %vm9689_vm3 }
 0x165   : > { %5498 = vmatmul.mubr.bf16.gmra.mrb[8].mxu1 %v7459_v47  ;;  %v7505_v46 = vsel %vm9298_vm10, %v9599_v51, %v825_v56  ;;  %v7512_v1 = vmax.f32 %v658_v41, 0.0  ;;  %vm3431_vm14 = vcmp.eq.s32.totalorder %v3343_v57, 1  ;;  %v3215_v16 = vrot.slane %v7507_v25, 1 }
 0x166   : > { %5530 = vmatpush3.bf16.msra.mxu1 %v6061_v50  ;;  %v7515_v47 = vmax.f32 %v650_v39, 0.0  ;;  %v3463_v56 = vsel %vm3431_vm14, %v7409_v53, 0.0  ;;  %vm7518_vm10 = vmpackc.low %vm3431_vm14, %vm3430_vm13  ;;  %v3462_v6 = vsel %vm3430_vm13, %v7332_v0, 0.0  ;;  %v3217_v51 = vrot.slane %v7495_v42, 1 }
 0x167   : > { %5531 = vmatprep.subr.bf16.mxu1 %v6063_v8  ;;  %v9601_v3 = vsel %vm7518_vm10, 4294967295, %v9600_v3  ;;  %v7523_v50 = vpop.permute.xlu0 %3345  ;;  %v7527_v41 = vpack.c.bf16 %v7512_v1, %v7495_v42  ;;  %v7531_v39 = vpack.c.bf16 %v3463_v56, %v3462_v6  ;;  %v5267_v34 = vpop.f32.mrb[16].mxu0 }
 0x168   : > { %9602 = vst [vmem:[#allocation82_spill] sm:$0xff] %v9601_v3  ;;  %9603 = vst [vmem:[#allocation83_spill] sm:$0xff] %v7523_v50  ;;  %v3216_v27 = vrot.slane %v7515_v47, 1  ;;  %v7533_v57 = vpop.permute.xlu1 %3348  ;;  %vm9317_vm14 = vcmp.eq.s32.totalorder %v7523_v50, 1  ;;  %v671_v0 = vadd.f32 %v5267_v34, %v7269_v17  ;;  %v662_v53 = vpop.f32.mrb[17].mxu0  ;;  %v7543_v9 = vpack.c.bf16 %v7515_v47, %v7507_v25 }
 0x169   : > { %9604 = vst [vmem:[#allocation84_spill] sm:$0xff] %v7527_v41  ;;  %9605 = vst [vmem:[#allocation85_spill] sm:$0xff] %v7531_v39  ;;  %vm9309_vm13 = vcmp.eq.s32.totalorder %v7533_v57, 1  ;;  %v3464_v3 = vsel %vm9317_vm14, %v7434_v12, 0.0  ;;  %v5268_v6 = vpop.f32.mrb[18].mxu0  ;;  %v7551_v39 = vsel %vm9321_vm9, %v3214_v43, %v3215_v16  ;;  %v6067_v12 = vld [vmem:[#allocation5 + $0x1f8] sm:$0xff]  }
 0x16a   : > { %9606 = vst [vmem:[#allocation86_spill] sm:$0xff] %v7533_v57  ;;  %5532 = vmatpush3.bf16.msra.mxu1 %v6063_v8  ;;  %9607 = vst [vmem:[#allocation87_spill] sm:$0xff] %v7543_v9  ;;  %v3465_v56 = vsel %vm9309_vm13, %v7422_v10, 0.0  ;;  %v663_v8 = vadd.f32 %v7269_v17, %v662_v53  ;;  %v7555_v34 = vsel %vm9321_vm9, %v3216_v27, %v3217_v51  ;;  %v3218_v50 = vrot.slane %v7512_v1, 1  ;;  %v665_v10 = vpop.f32.mrb[19].mxu0 }
 0x16b   : > { %5533 = vmatprep.subr.bf16.mxu1 %v6065_v61  ;;  %9608 = vst [vmem:[#allocation88_spill] sm:$0xff] %v7551_v39  ;;  %9609 = vst [vmem:[#allocation89_spill] sm:$0xff] %v7555_v34  ;;  %v7558_v7 = vpack.c.bf16 %v3465_v56, %v3464_v3  ;;  %v674_v37 = vadd.f32 %v5268_v6, %v7269_v17  ;;  %5501 = vmatprep.mubr.bf16.mxu1 %v7543_v9  ;;  %v7562_v53 = vpop.permute.xlu0 %1189  ;;  %v827_v6 = vrot.slane %v7356_v5, 7 }
 0x16c   : > { %9611 = vst [vmem:[#allocation91_spill] sm:$0xff] %v7562_v53  ;;  %v7567_v57 = vmax.f32 %v663_v8, 0.0  ;;  %v666_v36 = vadd.f32 %v7269_v17, %v665_v10  ;;  %v7571_v3 = vpop.permute.xlu1 %1192  ;;  %v7575_v56 = vsel %vm9321_vm9, %v3215_v16, %v3216_v27  ;;  %v7579_v53 = vmax.f32 %v671_v0, 0.0  ;;  %v7589_v16 = vld [vmem:[#allocation5 + $0x80] sm:$0xff]  }
 0x16d   : > { %9610 = vst [vmem:[#allocation90_spill] sm:$0xff] %v7558_v7  ;;  %5502 = vmatmul.mubr.bf16.gmra.mrb[12].mxu1 %v7527_v41  ;;  %9612 = vst [vmem:[#allocation92_spill] sm:$0xff] %v7571_v3  ;;  %v828_v7 = vrot.slane %v7377_v21, 7  ;;  %v7581_v43 = vmax.f32 %v674_v37, 0.0  ;;  %v829_v5 = vrot.slane %v7436_v2, 7  ;;  %vm9622_vm14 = vcmp.lt.s32.totalorder %v7273_v18, 1 }
 0x16e   : > { %9613 = vst [vmem:[#allocation93_spill] sm:$0xff] %v7575_v56  ;;  %5534 = vmatpush3.bf16.msra.mxu1 %v6065_v61  ;;  %v7585_v41 = vmax.f32 %v666_v36, 0.0  ;;  %9614 = vst [vmem:[#allocation94_spill] sm:$0xff] %v7589_v16  ;;  %v7601_v36 = vsel %vm9321_vm9, %v3217_v51, %v3218_v50  ;;  %v9620_v51 = vrot.slane %v7567_v57, 1 }
 0x16f   : > { %5535 = vmatprep.subr.bf16.mxu1 %v6067_v12  ;;  %v7593_v21 = vpop.permute.xlu0 %1195  ;;  %v7597_v37 = vpack.c.bf16 %v7581_v43, %v7579_v53  ;;  %9617 = vst [vmem:[#allocation97_spill] sm:$0xff] %v7601_v36  ;;  %v5271_v2 = vpop.f32.mrb[20].mxu0  ;;  %v7622_v3 = vsel %vm9622_vm14, %v827_v6, %v828_v7  ;;  %vm9625_vm13 = vmmov %vm9622_vm14  ;;  %vm9627_vm14 = vcmp.eq.s32.totalorder %v6968_v30, 1 }
 0x170   : > { %9615 = vst [vmem:[#allocation95_spill] sm:$0xff] %v7593_v21  ;;  %v7606_v8 = vpop.permute.xlu1 %1198  ;;  %v7610_v0 = vpack.c.bf16 %v7585_v41, %v7567_v57  ;;  %v687_v21 = vadd.f32 %v5271_v2, %v7269_v17  ;;  %v678_v9 = vpop.f32.mrb[21].mxu0  ;;  %v7618_v27 = vsel %vm9321_vm9, %v3218_v50, %v9620_v51  ;;  %9623 = vst [vmem:[#allocation101_spill] sm:$0xff] %v7622_v3  ;;  %v9624_v2 = vrot.slane %v7381_v28, 7 }
 0x171   : > { %9616 = vst [vmem:[#allocation96_spill] sm:$0xff] %v7597_v37  ;;  %9618 = vst [vmem:[#allocation98_spill] sm:$0xff] %v7606_v8  ;;  %v5272_v8 = vpop.f32.mrb[22].mxu0  ;;  %v7638_v51 = vsel %vm9627_vm14, %v7327_v40, 0.0  ;;  %v679_v10 = vadd.f32 %v7269_v17, %v678_v9  ;;  %v9629_v28 = vrot.slane %v7447_v60, 7 }
 0x172   : > { %9619 = vst [vmem:[#allocation99_spill] sm:$0xff] %v7610_v0  ;;  %5536 = vmatpush3.bf16.msra.mxu1 %v6067_v12  ;;  %9621 = vst [vmem:[#allocation100_spill] sm:$0xff] %v7618_v27  ;;  %5505 = vmatprep.mubr.bf16.mxu1 %v7610_v0  ;;  %v7633_v50 = vsel %vm9625_vm13, %v9624_v2, %v827_v6  ;;  %v690_v61 = vadd.f32 %v5272_v8, %v7269_v17  ;;  %v681_v0 = vpop.f32.mrb[23].mxu0  ;;  %v3220_v2 = vrot.slane %v7585_v41, 1 }
 0x173   : > { %5569 = vmatprep.subr.bf16.mxu1 %v7589_v16  ;;  %9626 = vst [vmem:[#allocation102_spill] sm:$0xff] %v7633_v50  ;;  %9628 = vst [vmem:[#allocation103_spill] sm:$0xff] %v7638_v51  ;;  %v3352_v16 = vpop.permute.xlu0 %3351  ;;  %v682_v27 = vadd.f32 %v7269_v17, %v681_v0  ;;  %v7658_v51 = vmax.f32 %v687_v21, 0.0 }
 0x174   : > { %vm9630_vm9 = vmmov %vm9625_vm13  ;;  %v3355_v9 = vpop.permute.xlu1 %3354  ;;  %vm3434_vm13 = vcmp.eq.s32.totalorder %v3352_v16, 1  ;;  %v7660_v50 = vmax.f32 %v690_v61, 0.0  ;;  %v9633_v16 = vmov 0 }
 0x175   : > { %v7648_v6 = vsel %vm9630_vm9, %v829_v5, %v9629_v28  ;;  %5506 = vmatmul.mubr.bf16.gmra.mrb[16].mxu1 %v7597_v37  ;;  %vm9631_vm14 = vmmov %vm9630_vm9  ;;  %vm3435_vm9 = vcmp.eq.s32.totalorder %v3355_v9, 1  ;;  %v7664_v0 = vmax.f32 %v682_v27, 0.0  ;;  %v3466_v21 = vsel %vm3434_vm13, %v7451_v44, 0.0 }
 0x176   : > { %v7655_v8 = vsel %vm9631_vm14, %v828_v7, %v829_v5  ;;  %v3467_v37 = vsel %vm3435_vm9, %v7477_v13, 0.0  ;;  %vm7667_vm10 = vmpackc.low %vm3435_vm9, %vm3434_vm13  ;;  %v7672_v5 = vmax.f32 %v679_v10, 0.0  ;;  %v7679_v9 = vpack.c.bf16 %v7660_v50, %v7658_v51 }
 0x177   : > { %9632 = vst [vmem:[#allocation104_spill] sm:$0xff] %v7655_v8  ;;  %v9634_v16 = vsel %vm7667_vm10, 4294967295, %v9633_v16  ;;  %v7675_v61 = vpop.permute.xlu0 %3357  ;;  %v7683_v12 = vpack.c.bf16 %v3467_v37, %v3466_v21  ;;  %v5275_v10 = vpop.f32.mrb[24].mxu0  ;;  %vm9642_vm13 = vcmp.lt.s32.totalorder %v7273_v18, 7 }
 0x178   : > { %9635 = vst [vmem:[#allocation105_spill] sm:$0xff] %v9634_v16  ;;  %9636 = vst [vmem:[#allocation106_spill] sm:$0xff] %v7675_v61  ;;  %v7685_v13 = vpop.permute.xlu1 %3360  ;;  %vm9344_vm14 = vcmp.eq.s32.totalorder %v7675_v61, 1  ;;  %v703_v16 = vadd.f32 %v5275_v10, %v7269_v17  ;;  %v694_v44 = vpop.f32.mrb[25].mxu0  ;;  %v7695_v27 = vpack.c.bf16 %v7664_v0, %v7672_v5  ;;  %v9641_v61 = vrot.slane %v7579_v53, 1 }
 0x179   : > { %9637 = vst [vmem:[#allocation107_spill] sm:$0xff] %v7679_v9  ;;  %9638 = vst [vmem:[#allocation108_spill] sm:$0xff] %v7683_v12  ;;  %vm9340_vm9 = vcmp.eq.s32.totalorder %v7685_v13, 1  ;;  %v3468_v7 = vsel %vm9344_vm14, %v7493_v4, 0.0  ;;  %v695_v21 = vadd.f32 %v7269_v17, %v694_v44  ;;  %v5276_v28 = vpop.f32.mrb[26].mxu0 }
 0x17a   : > { %9639 = vst [vmem:[#allocation109_spill] sm:$0xff] %v7685_v13  ;;  %9640 = vst [vmem:[#allocation110_spill] sm:$0xff] %v7695_v27  ;;  %v3469_v37 = vsel %vm9340_vm9, %v7489_v11, 0.0  ;;  %v7707_v10 = vsel %vm9642_vm13, %v3220_v2, %v9641_v61  ;;  %v706_v36 = vadd.f32 %v5276_v28, %v7269_v17  ;;  %5509 = vmatprep.mubr.bf16.mxu1 %v7695_v27  ;;  %v697_v11 = vpop.f32.mrb[27].mxu0  ;;  %v9646_v13 = vrot.slane %v7567_v57, 1 }
 0x17b   : > { %9643 = vst [vmem:[#allocation111_spill] sm:$0xff] %v7707_v10  ;;  %v7710_v3 = vpack.c.bf16 %v3469_v37, %v3468_v7  ;;  %v7714_v44 = vpop.permute.xlu0 %1201  ;;  %vm9647_vm9 = vmmov %vm9642_vm13  ;;  %v7722_v8 = vmax.f32 %v703_v16, 0.0  ;;  %v7724_v61 = vmax.f32 %v695_v21, 0.0  ;;  %v698_v7 = vadd.f32 %v7269_v17, %v697_v11 }
 0x17c   : > { %9645 = vst [vmem:[#allocation113_spill] sm:$0xff] %v7714_v44  ;;  %v7720_v12 = vsel %vm9647_vm9, %v9646_v13, %v3220_v2  ;;  %v7728_v28 = vpop.permute.xlu1 %1204  ;;  %v7735_v2 = vmax.f32 %v706_v36, 0.0  ;;  %v9650_v44 = vrot.slane %v7444_v23, 7  ;;  %vm9652_vm9 = vcmp.lt.s32.totalorder %v7273_v18, 1 }
 0x17d   : > { %9644 = vst [vmem:[#allocation112_spill] sm:$0xff] %v7710_v3  ;;  %9648 = vst [vmem:[#allocation114_spill] sm:$0xff] %v7720_v12  ;;  %5510 = vmatmul.mubr.bf16.gmra.mrb[20].mxu1 %v7679_v9  ;;  %v7739_v11 = vmax.f32 %v698_v7, 0.0  ;;  %v9657_v21 = vrot.slane %v7447_v60, 7  ;;  %v9663_v3 = vrot.slane %v7507_v25, 7  ;;  %v9666_v9 = vrot.slane %v7444_v23, 7 }
 0x17e   : > { %9649 = vst [vmem:[#allocation115_spill] sm:$0xff] %v7728_v28  ;;  %v9651_v28 = vrot.slane %v7426_v33, 7  ;;  %v7756_v7 = vpack.c.bf16 %v7735_v2, %v7722_v8  ;;  %vm9658_vm14 = vmmov %vm9652_vm9  ;;  %v9720_v10 = vrot.slane %v7672_v5, 1 }
 0x17f   : > { %v7752_v4 = vpop.permute.xlu0 %1207  ;;  %v7775_v33 = vpack.c.bf16 %v7739_v11, %v7724_v61  ;;  %vm9667_vm10 = vmmov %vm9652_vm9 }
 0x180   : > { %v7747_v37 = vsel %vm9652_vm9, %v9651_v28, %v9650_v44  ;;  %9654 = vst [vmem:[#allocation117_spill] sm:$0xff] %v7752_v4  ;;  %9655 = vst [vmem:[#allocation118_spill] sm:$0xff] %v7756_v7  ;;  %v9656_v16 = vmov %v9651_v28  ;;  %v7771_v13 = vpop.permute.xlu1 %1210  ;;  %v5279_v4 = vpop.f32.mrb[28].mxu0  ;;  %v9662_v28 = vrot.slane %v7515_v47, 7 }
 0x181   : > { %9653 = vst [vmem:[#allocation116_spill] sm:$0xff] %v7747_v37  ;;  %v7764_v44 = vsel %vm9658_vm14, %v9657_v21, %v9656_v16  ;;  %9660 = vst [vmem:[#allocation120_spill] sm:$0xff] %v7771_v13  ;;  %v719_v16 = vadd.f32 %v5279_v4, %v7269_v17  ;;  %v710_v21 = vpop.f32.mrb[29].mxu0  ;;  %5513 = vmatprep.mubr.bf16.mxu1 %v7775_v33  ;;  %v9665_v4 = vmov %v9663_v3 }
 0x182   : > { %9659 = vst [vmem:[#allocation119_spill] sm:$0xff] %v7764_v44  ;;  %9661 = vst [vmem:[#allocation121_spill] sm:$0xff] %v7775_v33  ;;  %v711_v60 = vadd.f32 %v7269_v17, %v710_v21  ;;  %v5280_v13 = vpop.f32.mrb[30].mxu0  ;;  %v7799_v27 = vsel %vm9667_vm10, %v9666_v9, %v9665_v4  ;;  %v9673_v33 = vrot.slane %v7579_v53, 1 }
 0x183   : > { %vm9664_vm14 = vmmov %vm9652_vm9  ;;  %v7817_v23 = vmax.f32 %v719_v16, 0.0  ;;  %v722_v9 = vadd.f32 %v5280_v13, %v7269_v17  ;;  %v713_v4 = vpop.f32.mrb[31].mxu0  ;;  %v3364_v44 = vpop.permute.xlu0 %3363  ;;  %v9676_v16 = vrot.slane %v7512_v1, 7  ;;  %v9677_v13 = vrot.slane %v7495_v42, 7 }
 0x184   : > { %v7787_v36 = vsel %vm9664_vm14, %v9663_v3, %v9662_v28  ;;  %v9668_v3 = vrot.slane %v7672_v5, 1  ;;  %v9669_v28 = vrot.slane %v7581_v43, 1  ;;  %vm9670_vm14 = vmmov %vm9642_vm13  ;;  %v714_v12 = vadd.f32 %v7269_v17, %v713_v4 }
 0x185   : > { %vm9674_vm9 = vmmov %vm9642_vm13  ;;  %5514 = vmatmul.mubr.bf16.gmra.mrb[24].mxu1 %v7756_v7  ;;  %vm3438_vm10 = vcmp.eq.s32.totalorder %v3364_v44, 1 }
 0x186   : > { %v7807_v37 = vsel %vm9670_vm14, %v9669_v28, %v9668_v3  ;;  %v9672_v21 = vmov %v9669_v28  ;;  %v7824_v28 = vmax.f32 %v711_v60, 0.0  ;;  %v7838_v60 = vmax.f32 %v722_v9, 0.0 }
 0x187   : > { %9671 = vst [vmem:[#allocation122_spill] sm:$0xff] %v7807_v37  ;;  %v7815_v25 = vsel %vm9674_vm9, %v9673_v33, %v9672_v21  ;;  %v3367_v33 = vpop.permute.xlu1 %3366  ;;  %vm9678_vm9 = vcmp.lt.s32.totalorder %v7273_v18, 1  ;;  %v7842_v44 = vmax.f32 %v714_v12, 0.0  ;;  %v9679_v37 = vmov 0 }
 0x188   : > { %9675 = vst [vmem:[#allocation123_spill] sm:$0xff] %v7815_v25  ;;  %v7834_v21 = vsel %vm9678_vm9, %v9677_v13, %v9676_v16  ;;  %vm3439_vm14 = vcmp.eq.s32.totalorder %v3367_v33, 1  ;;  %v9368_v33 = vrot.slane %v7838_v60, 7  ;;  %v3470_v16 = vsel %vm3438_vm10, %v7481_v45, 0.0  ;;  %v7854_v13 = vpop.permute.xlu0 %3369 }
 0x189   : > { %v3471_v7 = vsel %vm3439_vm14, %v7551_v39, 0.0  ;;  %vm7845_vm13 = vmpackc.low %vm3439_vm14, %vm3438_vm10  ;;  %9682 = vst [vmem:[#allocation125_spill] sm:$0xff] %v7854_v13  ;;  %v7858_v12 = vpack.c.bf16 %v7838_v60, %v7817_v23  ;;  %vm9364_vm10 = vcmp.eq.s32.totalorder %v7854_v13, 1  ;;  %v7877_v3 = vpack.c.bf16 %v7842_v44, %v7824_v28  ;;  %v9757_v13 = vld [vmem:[#allocation16_spill] sm:$0xff] }
 0x18a   : > { %v9680_v37 = vsel %vm7845_vm13, 4294967295, %v9679_v37  ;;  %v7864_v4 = vpack.c.bf16 %v3471_v7, %v3470_v16  ;;  %v3472_v17 = vsel %vm9364_vm10, %v7575_v56, 0.0  ;;  %v9687_v7 = vrot.slane %v7289_v35, 7  ;;  %vm9688_vm13 = vmmov %vm9678_vm9 }
 0x18b   : > { %9681 = vst [vmem:[#allocation124_spill] sm:$0xff] %v9680_v37  ;;  %9683 = vst [vmem:[#allocation126_spill] sm:$0xff] %v7858_v12  ;;  %v7866_v9 = vpop.permute.xlu1 %3372  ;;  %vm9690_vm9 = vcmp.eq.s32.totalorder %v6951_v14, 1  ;;  %v9696_v14 = vrot.slane %v7515_v47, 7  ;;  %v9700_v39 = vmov 0  ;;  %5517 = vmatprep.mubr.bf16.mxu1 %v7877_v3  ;;  %v6070_v47 = vld [vmem:[#allocation5 + $0x8] sm:$0xff]  }
 0x18c   : > { %9684 = vst [vmem:[#allocation127_spill] sm:$0xff] %v7864_v4  ;;  %9685 = vst [vmem:[#allocation128_spill] sm:$0xff] %v7866_v9  ;;  %v887_v16 = vsel %vm9688_vm13, %v9368_v33, %v9687_v7  ;;  %vm9693_vm5 = vcmp.eq.s32.totalorder %v7866_v9, 1  ;;  %v9695_v33 = vrot.slane %v7495_v42, 7  ;;  %v9756_v9 = vld [vmem:[#allocation15_spill] sm:$0xff]  ;;  %v8104_v4 = vld [vmem:[#allocation5 + $0x88] sm:$0xff]  }
 0x18d   : > { %9686 = vst [vmem:[#allocation129_spill] sm:$0xff] %v7877_v3  ;;  %vm7889_vm14 = vmpackc.low %vm9690_vm9, %vm9689_vm3  ;;  %v3473_v56 = vsel %vm9693_vm5, %v7555_v34, 0.0  ;;  %v1080_v37 = vsel %vm9694_vm2, %v887_v16, 0.0  ;;  %v4539_v7 = vpack.c.bf16 %v7374_v24, %v887_v16  ;;  %vm9699_vm9 = vcmp.eq.s32.totalorder %v6953_v15, 1  ;;  %v7920_v24 = vpop.permute.xlu0 %1213  ;;  %5518 = vmatmul.mubr.bf16.gmra.mrb[28].mxu1 %v7858_v12 }
 0x18e   : > { %vm9697_vm3 = vmmov %vm9688_vm13  ;;  %vm9698_vm13 = vcmp.eq.s32.totalorder %v6941_v63, 1  ;;  %v7917_v59 = vpack.c.bf16 %v3473_v56, %v3472_v17  ;;  %9704 = vst [vmem:[#allocation132_spill] sm:$0xff] %v7920_v24  ;;  %v7923_v42 = vpack.c.bf16 %v7386_v19, %v1080_v37  ;;  %v9706_v63 = vrot.slane %v7585_v41, 7  ;;  %v9749_v19 = vld [vmem:[#allocation14_spill] sm:$0xff] }
 0x18f   : > { %v7907_v45 = vsel %vm9697_vm3, %v9696_v14, %v9695_v33  ;;  %vm7913_vm7 = vmpackc.low %vm9699_vm9, %vm9698_vm13  ;;  %v9707_v15 = vrot.slane %v7567_v57, 7  ;;  %vm9709_vm2 = vcmp.eq.s32.totalorder %v6966_v29, 1  ;;  %v7941_v56 = vpop.permute.xlu1 %1216  ;;  %5297 = vmatprep.mubr.msk.bf16.mxu0 %vm7889_vm14, %v4539_v7  ;;  %v9713_v17 = vrot.slane %v7512_v1, 7 }
 0x190   : > { %v9701_v39 = vsel %vm7913_vm7, 4294967295, %v9700_v39  ;;  %9703 = vst [vmem:[#allocation131_spill] sm:$0xff] %v7917_v59  ;;  %9705 = vst [vmem:[#allocation133_spill] sm:$0xff] %v7923_v42  ;;  %v9715_v29 = vrot.slane %v7658_v51, 1  ;;  %5537 = vmatprep.mubr.msk.bf16.mxu1 %vm7913_vm7, %v7318_v26  ;;  %v9725_v7 = vpack.c.bf16 %v7327_v40, %v7336_v62  ;;  %v9729_v40 = vpack.c.bf16 %v7465_v54, %v7505_v46  ;;  %v6150_v62 = vld [vmem:[#allocation5] sm:$0xff]  }
 0x191   : > { %9702 = vst [vmem:[#allocation130_spill] sm:$0xff] %v9701_v39  ;;  %vm9708_vm5 = vmmov %vm9697_vm3  ;;  %vm9710_vm3 = vcmp.eq.s32.totalorder %v6968_v30, 1  ;;  %v9712_v37 = vmov %v9707_v15  ;;  %v9716_v30 = vrot.slane %v7664_v0, 1  ;;  %v9733_v33 = vrot.slane %v7664_v0, 7  ;;  %v9759_v39 = vld [vmem:[#allocation62_spill] sm:$0xff] }
 0x192   : > { %v7933_v16 = vsel %vm9708_vm5, %v9707_v15, %v9706_v63  ;;  %vm4541_vm13 = vmpackc.low %vm9710_vm3, %vm9709_vm2  ;;  %9711 = vst [vmem:[#allocation134_spill] sm:$0xff] %v7941_v56  ;;  %vm9723_vm2 = vcmp.eq.s32.totalorder %v6990_v48, 1  ;;  %vm9724_vm3 = vcmp.eq.s32.totalorder %v6992_v32, 1  ;;  %v9752_v26 = vrot.slane %v7658_v51, 7 }
 0x193   : > { %vm9714_vm9 = vmmov %vm9708_vm5  ;;  %vm9717_vm5 = vcmp.lt.s32.totalorder %v7273_v18, 7  ;;  %v9719_v15 = vmov %v9716_v30  ;;  %5298 = vmatmul.mubr.msk.bf16.vlgmr.msra.gmra.mrb[32].mxu0 %vm4541_vm13, %v9725_v7  ;;  %v9797_v24 = vrot.slane %v7824_v28, 7  ;;  %v9810_v3 = vrot.slane %v7735_v2, 1 }
 0x194   : > { %v7951_v14 = vsel %vm9714_vm9, %v9713_v17, %v9712_v37  ;;  %v7959_v63 = vsel %vm9717_vm5, %v9716_v30, %v9715_v29  ;;  %vm9721_vm14 = vmmov %vm9717_vm5  ;;  %v9726_v29 = vrot.slane %v7581_v43, 7  ;;  %v9727_v30 = vrot.slane %v7579_v53, 7  ;;  %5330 = vmatpush3.bf16.msra.mxu0 %v6150_v62 }
 0x195   : > { %9718 = vst [vmem:[#allocation135_spill] sm:$0xff] %v7959_v63  ;;  %v7967_v57 = vsel %vm9721_vm14, %v9720_v10, %v9719_v15  ;;  %vm4544_vm9 = vmpackc.low %vm9724_vm3, %vm9723_vm2  ;;  %vm9728_vm5 = vcmp.lt.s32.totalorder %v7273_v18, 1  ;;  %v9731_v17 = vrot.slane %v7585_v41, 7  ;;  %v9737_v62 = vrot.slane %v7581_v43, 7  ;;  %v8020_v41 = vpop.permute.xlu0 %1219  ;;  %5331 = vmatprep.subr.bf16.mxu0 %v6070_v47  ;;  %v8047_v10 = vpop.permute.xlu1 %1222 }
 0x196   : > { %9722 = vst [vmem:[#allocation136_spill] sm:$0xff] %v7967_v57  ;;  %v7990_v15 = vsel %vm9728_vm5, %v9727_v30, %v9726_v29  ;;  %5301 = vmatprep.mubr.msk.bf16.mxu0 %vm4544_vm9, %v9729_v40  ;;  %v9730_v7 = vmov %v9727_v30  ;;  %vm9732_vm13 = vmmov %vm9728_vm5  ;;  %v9734_v29 = vrot.slane %v7672_v5, 7  ;;  %v9741_v5 = vrot.slane %v7660_v50, 1 }
 0x197   : > { %v8002_v37 = vsel %vm9732_vm13, %v9731_v17, %v9730_v7  ;;  %vm9735_vm14 = vmmov %vm9728_vm5  ;;  %9739 = vst [vmem:[#allocation137_spill] sm:$0xff] %v8020_v41  ;;  %v8022_v17 = vld [vmem:[#allocation5 + $0x10] sm:$0xff]   ;;  %vm9742_vm3 = vcmp.lt.s32.totalorder %v7273_v18, 7  ;;  %v9748_v7 = vld [vmem:[#allocation13_spill] sm:$0xff]  ;;  %v9800_v42 = vmov %v9797_v24 }
 0x198   : > { %v8010_v30 = vsel %vm9735_vm14, %v9734_v29, %v9733_v33  ;;  %v9736_v40 = vmov %v9734_v29  ;;  %vm9738_vm2 = vmmov %vm9728_vm5  ;;  %v9740_v29 = vrot.slane %v7724_v61, 1  ;;  %9750 = vst [vmem:[#allocation13_spill] sm:$0xff] %v8047_v10  ;;  %vm9769_vm5 = vcmp.eq.s32.totalorder %v6980_v31, 1  ;;  %5332 = vmatpush3.bf16.msra.mxu0 %v6070_v47 }
 0x199   : > { %v8018_v53 = vsel %vm9738_vm2, %v9737_v62, %v9736_v40  ;;  %v9744_v40 = vmov %v9741_v5  ;;  %v9745_v62 = vrot.slane %v7658_v51, 1  ;;  %vm9746_vm9 = vmmov %vm9742_vm3  ;;  %v9761_v51 = vrot.slane %v7724_v61, 7  ;;  %5333 = vmatprep.subr.bf16.mxu0 %v8022_v17 }
 0x19a   : > { %v8034_v43 = vsel %vm9742_vm3, %v9741_v5, %v9740_v29  ;;  %v9751_v5 = vrot.slane %v7660_v50, 7  ;;  %vm9753_vm14 = vmmov %vm9738_vm2  ;;  %v9758_v29 = vld [vmem:[#allocation61_spill] sm:$0xff]  ;;  %vm9768_vm3 = vcmp.eq.s32.totalorder %v6978_v38, 1  ;;  %v9776_v38 = vrot.slane %v7739_v11, 1 }
 0x19b   : > { %9743 = vst [vmem:[#allocation138_spill] sm:$0xff] %v8034_v43  ;;  %v8042_v1 = vsel %vm9746_vm9, %v9745_v62, %v9744_v40  ;;  %v9754_v40 = vmov %v9752_v26  ;;  %v9755_v62 = vmov %v9733_v33  ;;  %vm9767_vm9 = vcmp.eq.s32.totalorder %v6990_v48, 1  ;;  %vm8098_vm13 = vmpackc.low %vm9769_vm5, %vm9768_vm3 }
 0x19c   : > { %9747 = vst [vmem:[#allocation139_spill] sm:$0xff] %v8042_v1  ;;  %v8057_v34 = vsel %vm9753_vm14, %v9752_v26, %v9751_v5  ;;  %v8065_v33 = vsel %vm9738_vm2, %v9755_v62, %v9754_v40  ;;  %v9760_v5 = vrot.slane %v7739_v11, 7  ;;  %vm9762_vm14 = vmmov %vm9738_vm2  ;;  %v9764_v40 = vmov %v9761_v51  ;;  %5334 = vmatpush3.bf16.msra.mxu0 %v8022_v17 }
 0x19d   : > { %v9765_v62 = vrot.slane %v7660_v50, 7  ;;  %v8092_v26 = vsel %vm9767_vm9, %v7505_v46, 0.0  ;;  %v9774_v50 = vld [vmem:[#allocation18_spill] sm:$0xff]  ;;  %v9775_v46 = vrot.slane %v7722_v8, 1  ;;  %vm9777_vm9 = vcmp.lt.s32.totalorder %v7273_v18, 7  ;;  %vm9785_vm3 = vmmov %vm9738_vm2 }
 0x19e   : > { %v8079_v0 = vsel %vm9762_vm14, %v9761_v51, %v9760_v5  ;;  %v9770_v5 = vmov 0  ;;  %v9773_v51 = vld [vmem:[#allocation17_spill] sm:$0xff]  ;;  %vm9781_vm5 = vmmov %vm9777_vm9  ;;  %v9783_v47 = vrot.slane %v7735_v2, 7  ;;  %v9784_v48 = vrot.slane %v7722_v8, 7 }
 0x19f   : > { %9763 = vst [vmem:[#allocation14_spill] sm:$0xff] %v8079_v0  ;;  %v8087_v59 = vsel %vm9738_vm2, %v9765_v62, %v9764_v40  ;;  %v9771_v5 = vsel %vm8098_vm13, 4294967295, %v9770_v5  ;;  %v8114_v31 = vsel %vm9777_vm9, %v9776_v38, %v9775_v46  ;;  %v9779_v40 = vmov %v9776_v38  ;;  %v9793_v38 = vld [vmem:[#allocation22_spill] sm:$0xff] }
 0x1a0   : > { %9766 = vst [vmem:[#allocation15_spill] sm:$0xff] %v8087_v59  ;;  %9772 = vst [vmem:[#allocation16_spill] sm:$0xff] %v9771_v5  ;;  %v9780_v62 = vrot.slane %v7724_v61, 1  ;;  %v8130_v10 = vsel %vm9785_vm3, %v9784_v48, %v9783_v47  ;;  %vm9787_vm2 = vcmp.eq.s32.totalorder %v7002_v55, 1  ;;  %vm9788_vm9 = vcmp.eq.s32.totalorder %v7004_v58, 1  ;;  %v9792_v61 = vld [vmem:[#allocation21_spill] sm:$0xff] }
 0x1a1   : > { %9778 = vst [vmem:[#allocation17_spill] sm:$0xff] %v8114_v31  ;;  %9786 = vst [vmem:[#allocation140_spill] sm:$0xff] %v8130_v10  ;;  %v9789_v46 = vmov 0  ;;  %v9794_v55 = vrot.slane %v7739_v11, 7  ;;  %v9796_v47 = vrot.slane %v7842_v44, 7  ;;  %v9823_v1 = vrot.slane %v7838_v60, 7 }
 0x1a2   : > { %v8122_v41 = vsel %vm9781_vm5, %v9780_v62, %v9779_v40  ;;  %vm8136_vm10 = vmpackc.low %vm9788_vm9, %vm9787_vm2  ;;  %v3376_v40 = vpop.permute.xlu0 %3375  ;;  %v9801_v62 = vrot.slane %v7735_v2, 7  ;;  %vm9804_vm5 = vcmp.eq.s32.totalorder %v7014_v20, 1  ;;  %v9843_v11 = vld [vmem:[#allocation19_spill] sm:$0xff]  ;;  %v9846_v10 = vld [vmem:[#allocation29_spill] sm:$0xff] }
 0x1a3   : > { %9782 = vst [vmem:[#allocation18_spill] sm:$0xff] %v8122_v41  ;;  %v9790_v46 = vsel %vm8136_vm10, 4294967295, %v9789_v46  ;;  %v8151_v58 = vsel %vm9785_vm3, %v9794_v55, %v9784_v48  ;;  %vm9798_vm2 = vmmov %vm9785_vm3  ;;  %vm9805_vm3 = vcmp.eq.s32.totalorder %v7016_v22, 1  ;;  %v9808_v48 = vld [vmem:[#allocation65_spill] sm:$0xff]  ;;  %v6074_v55 = vld [vmem:[#allocation5 + $0x18] sm:$0xff]   ;;  %vm9819_vm7 = vcmp.eq.s32.totalorder %v3376_v40, 1 }
 0x1a4   : > { %9791 = vst [vmem:[#allocation141_spill] sm:$0xff] %v9790_v46  ;;  %9795 = vst [vmem:[#allocation21_spill] sm:$0xff] %v8151_v58  ;;  %v8159_v56 = vsel %vm9798_vm2, %v9797_v24, %v9796_v47  ;;  %5538 = vmatmul.mubr.msk.bf16.vlgmr.msra.gmra.mrb[0].mxu1 %vm8098_vm13, %v9808_v48  ;;  %v3379_v24 = vpop.permute.xlu1 %3378  ;;  %v9817_v47 = vld [vmem:[#allocation94_spill] sm:$0xff]  ;;  %v9820_v41 = vld [vmem:[#allocation63_spill] sm:$0xff]  ;;  %v9838_v40 = vrot.slane %v7842_v44, 7  ;;  %5335 = vmatprep.subr.bf16.mxu0 %v6074_v55  ;;  %v9864_v58 = vrot.slane %v7817_v23, 1 }
 0x1a5   : > { %9799 = vst [vmem:[#allocation22_spill] sm:$0xff] %v8159_v56  ;;  %vm9802_vm9 = vmmov %vm9798_vm2  ;;  %5570 = vmatpush3.bf16.msra.mxu1 %v9817_v47  ;;  %vm3443_vm13 = vcmp.eq.s32.totalorder %v3379_v24, 1  ;;  %5541 = vmatprep.mubr.msk.bf16.mxu1 %vm8136_vm10, %v9820_v41  ;;  %v9824_v47 = vrot.slane %v7817_v23, 7  ;;  %v9828_v46 = vld [vmem:[#allocation26_spill] sm:$0xff]  ;;  %v9829_v41 = vld [vmem:[#allocation100_spill] sm:$0xff] }
 0x1a6   : > { %v8167_v12 = vsel %vm9802_vm9, %v9801_v62, %v9800_v42  ;;  %vm8173_vm14 = vmpackc.low %vm9805_vm3, %vm9804_vm5  ;;  %v9809_v62 = vrot.slane %v7824_v28, 1  ;;  %vm9811_vm5 = vcmp.lt.s32.totalorder %v7273_v18, 7  ;;  %vm9813_vm9 = vcmp.eq.s32.totalorder %v7038_v49, 1  ;;  %v9818_v42 = vld [vmem:[#allocation97_spill] sm:$0xff]  ;;  %5571 = vmatprep.subr.bf16.mxu1 %v8104_v4  ;;  %v9857_v48 = vld [vmem:[#allocation24_spill] sm:$0xff]  ;;  %5336 = vmatpush3.bf16.msra.mxu0 %v6074_v55 }
 0x1a7   : > { %9803 = vst [vmem:[#allocation142_spill] sm:$0xff] %v8167_v12  ;;  %vm9814_vm3 = vcmp.eq.s32.totalorder %v7040_v52, 1  ;;  %v3474_v5 = vsel %vm9819_vm7, %v9818_v42, 0.0  ;;  %v9827_v42 = vld [vmem:[#allocation25_spill] sm:$0xff]  ;;  %v3475_v2 = vsel %vm3443_vm13, %v9829_v41, 0.0  ;;  %vm9830_vm10 = vmmov %vm9819_vm7  ;;  %v9837_v57 = vmov %v9824_v47  ;;  %v9845_v12 = vld [vmem:[#allocation28_spill] sm:$0xff] }
 0x1a8   : > { %v8190_v31 = vsel %vm9811_vm5, %v9810_v3, %v9809_v62  ;;  %vm8196_vm2 = vmpackc.low %vm9814_vm3, %vm9813_vm9  ;;  %v9821_v62 = vrot.slane %v7722_v8, 1  ;;  %vm9825_vm9 = vcmp.lt.s32.totalorder %v7273_v18, 1  ;;  %v9831_v8 = vmov 0  ;;  %v8278_v17 = vpop.permute.xlu1 %3384  ;;  %v9867_v59 = vld [vmem:[#allocation35_spill] sm:$0xff] }
 0x1a9   : > { %9812 = vst [vmem:[#allocation143_spill] sm:$0xff] %v8190_v31  ;;  %v8220_v24 = vsel %vm9825_vm9, %v9824_v47, %v9823_v1  ;;  %vm8226_vm15 = vmpackc.low %vm3443_vm13, %vm9830_vm10  ;;  %v6073_v1 = vld [vmem:[#allocation5 + $0x90] sm:$0xff]   ;;  %v8253_v47 = vpack.c.bf16 %v3475_v2, %v3474_v5  ;;  %v9848_v31 = vld [vmem:[#allocation104_spill] sm:$0xff]  ;;  %v9853_v5 = vrot.slane %v7817_v23, 1  ;;  %v9854_v2 = vrot.slane %v7842_v44, 1  ;;  %5572 = vmatpush3.bf16.msra.mxu1 %v8104_v4 }
 0x1aa   : > { %v8212_v43 = vsel %vm9811_vm5, %v9821_v62, %v9810_v3  ;;  %9826 = vst [vmem:[#allocation144_spill] sm:$0xff] %v8220_v24  ;;  %v9832_v8 = vsel %vm8226_vm15, 4294967295, %v9831_v8  ;;  %v9834_v3 = vld [vmem:[#allocation101_spill] sm:$0xff]  ;;  %v9835_v62 = vld [vmem:[#allocation102_spill] sm:$0xff]  ;;  %vm9839_vm10 = vmmov %vm9825_vm9  ;;  %vm9432_vm3 = vcmp.eq.s32.totalorder %v8278_v17, 1  ;;  %v9870_v23 = vrot.slane %v7289_v35, 1  ;;  %5573 = vmatprep.subr.bf16.mxu1 %v6073_v1 }
 0x1ab   : > { %9822 = vst [vmem:[#allocation94_spill] sm:$0xff] %v8212_v43  ;;  %9833 = vst [vmem:[#allocation25_spill] sm:$0xff] %v9832_v8  ;;  %v9836_v63 = vpack.c.bf16 %v9834_v3, %v9835_v62  ;;  %v8244_v41 = vsel %vm9839_vm10, %v9838_v40, %v9837_v57  ;;  %v9841_v8 = vld [vmem:[#allocation53_spill] sm:$0xff]  ;;  %v9849_v43 = vpack.c.bf16 %v7648_v6, %v9848_v31  ;;  %v8260_v57 = vpop.permute.xlu0 %3381  ;;  %v9851_v40 = vld [vmem:[#allocation52_spill] sm:$0xff]  ;;  %v9881_v18 = vmov 0 }
 0x1ac   : > { %9840 = vst [vmem:[#allocation26_spill] sm:$0xff] %v8244_v41  ;;  %vm9842_vm13 = vcmp.eq.s32.totalorder %v9841_v8, 1  ;;  %9847 = vst [vmem:[#allocation101_spill] sm:$0xff] %v8253_v47  ;;  %vm9852_vm10 = vcmp.eq.s32.totalorder %v9851_v40, 1  ;;  %v6076_v8 = vld [vmem:[#allocation5 + $0x20] sm:$0xff]   ;;  %v9869_v44 = vld [vmem:[#allocation114_spill] sm:$0xff] }
 0x1ad   : > { %5302 = vmatmul.mubr.msk.bf16.gmra.mrb[36].mxu0 %vm8173_vm14, %v9836_v63  ;;  %v1111_v56 = vsel %vm9842_vm13, %v8220_v24, 0.0  ;;  %v9844_v63 = vld [vmem:[#allocation20_spill] sm:$0xff]  ;;  %9850 = vst [vmem:[#allocation102_spill] sm:$0xff] %v8260_v57  ;;  %v1110_v25 = vsel %vm9852_vm10, %v8244_v41, 0.0  ;;  %vm9855_vm13 = vmmov %vm9811_vm5  ;;  %vm9430_vm14 = vcmp.eq.s32.totalorder %v8260_v57, 1  ;;  %v9859_v41 = vmov %v9854_v2  ;;  %v9891_v55 = vld [vmem:[#allocation43_spill] sm:$0xff]  ;;  %5337 = vmatprep.subr.bf16.mxu0 %v6076_v8 }
 0x1ae   : > { %5305 = vmatprep.mubr.msk.bf16.mxu0 %vm8196_vm2, %v9849_v43  ;;  %v8274_v47 = vsel %vm9855_vm13, %v9854_v2, %v9853_v5  ;;  %v9856_v43 = vld [vmem:[#allocation23_spill] sm:$0xff]  ;;  %9858 = vst [vmem:[#allocation53_spill] sm:$0xff] %v8278_v17  ;;  %v8281_v40 = vpack.c.bf16 %v1111_v56, %v1110_v25  ;;  %v9860_v24 = vrot.slane %v7824_v28, 1  ;;  %vm9861_vm10 = vmmov %vm9811_vm5  ;;  %v9863_v2 = vrot.slane %v7838_v60, 1  ;;  %v9868_v25 = vld [vmem:[#allocation36_spill] sm:$0xff]  ;;  %5574 = vmatpush3.bf16.msra.mxu1 %v6073_v1 }
 0x1af   : > { %vm9865_vm13 = vmmov %vm9811_vm5  ;;  %v3476_v28 = vsel %vm9430_vm14, %v9869_v44, 0.0  ;;  %v6075_v57 = vld [vmem:[#allocation5 + $0x98] sm:$0xff]   ;;  %vm9876_vm14 = vcmp.eq.s32.totalorder %v9759_v39, 1  ;;  %v9878_v60 = vld [vmem:[#allocation103_spill] sm:$0xff]  ;;  %vm9880_vm2 = vcmp.eq.s32.totalorder %v9749_v19, 1  ;;  %v9888_v19 = vmov 0  ;;  %5338 = vmatpush3.bf16.msra.mxu0 %v6076_v8 }
 0x1b0   : > { %v8289_v5 = vsel %vm9861_vm10, %v9860_v24, %v9859_v41  ;;  %v8297_v0 = vsel %vm9865_vm13, %v9864_v58, %v9863_v2  ;;  %v9871_v41 = vmov %v9863_v2  ;;  %vm9872_vm10 = vmmov %vm9811_vm5  ;;  %v9874_v24 = vld [vmem:[#allocation111_spill] sm:$0xff]  ;;  %vm9875_vm13 = vcmp.eq.s32.totalorder %v9758_v29, 1  ;;  %v9877_v56 = vld [vmem:[#allocation64_spill] sm:$0xff]  ;;  %5575 = vmatprep.subr.bf16.mxu1 %v6075_v57 }
 0x1b1   : > { %9862 = vst [vmem:[#allocation19_spill] sm:$0xff] %v8289_v5  ;;  %9866 = vst [vmem:[#allocation20_spill] sm:$0xff] %v8297_v0  ;;  %v8314_v58 = vsel %vm9872_vm10, %v9871_v41, %v9870_v23  ;;  %v3477_v2 = vsel %vm9432_vm3, %v9874_v24, 0.0  ;;  %v3490_v4 = vsel %vm9875_vm13, %v8297_v0, 0.0  ;;  %v8327_v44 = vpack.c.bf16 %v9878_v60, %v9877_v56  ;;  %v8339_v41 = vpop.permute.xlu0 %1225  ;;  %v9903_v1 = vld [vmem:[#allocation116_spill] sm:$0xff]  ;;  %v9944_v39 = vld [vmem:[#allocation21_spill] sm:$0xff] }
 0x1b2   : > { %9873 = vst [vmem:[#allocation28_spill] sm:$0xff] %v8314_v58  ;;  %v3491_v35 = vsel %vm9876_vm14, %v8314_v58, 0.0  ;;  %vm9879_vm10 = vcmp.eq.s32.totalorder %v9748_v7, 1  ;;  %v8337_v23 = vpack.c.bf16 %v3477_v2, %v3476_v28  ;;  %vm9884_vm14 = vcmp.eq.s32.totalorder %v6992_v32, 1  ;;  %v9890_v28 = vld [vmem:[#allocation42_spill] sm:$0xff]  ;;  %v9892_v2 = vld [vmem:[#allocation77_spill] sm:$0xff]  ;;  %v8362_v32 = vpop.permute.xlu1 %1228  ;;  %5576 = vmatpush3.bf16.msra.mxu1 %v6075_v57 }
 0x1b3   : > { %vm8333_vm5 = vmpackc.low %vm9880_vm2, %vm9879_vm10  ;;  %v8341_v29 = vpack.c.bf16 %v3491_v35, %v3490_v4  ;;  %v1085_v56 = vsel %vm9884_vm14, %v7465_v54, 0.0  ;;  %vm9885_vm13 = vcmp.eq.s32.totalorder %v7014_v20, 1  ;;  %vm9886_vm2 = vcmp.eq.s32.totalorder %v9756_v9, 1  ;;  %v6078_v20 = vld [vmem:[#allocation5 + $0x28] sm:$0xff]   ;;  %v9952_v17 = vld [vmem:[#allocation84_spill] sm:$0xff] }
 0x1b4   : > { %v9882_v18 = vsel %vm8333_vm5, 4294967295, %v9881_v18  ;;  %v1086_v7 = vsel %vm9885_vm13, %v9835_v62, 0.0  ;;  %vm9887_vm10 = vcmp.eq.s32.totalorder %v9757_v13, 1  ;;  %5542 = vmatmul.mubr.msk.bf16.gmra.mrb[4].mxu1 %vm8333_vm5, %v9892_v2  ;;  %v8365_v54 = vpack.c.bf16 %v1085_v56, %v8092_v26  ;;  %v9896_v13 = vld [vmem:[#allocation75_spill] sm:$0xff]  ;;  %5339 = vmatprep.subr.bf16.mxu0 %v6078_v20  ;;  %v6079_v57 = vld [vmem:[#allocation5 + $0xa8] sm:$0xff]   ;;  %v9998_v58 = vld [vmem:[#allocation44_spill] sm:$0xff] }
 0x1b5   : > { %9883 = vst [vmem:[#allocation29_spill] sm:$0xff] %v8341_v29  ;;  %vm8353_vm3 = vmpackc.low %vm9887_vm10, %vm9886_vm2  ;;  %vm9893_vm14 = vcmp.eq.s32.totalorder %v7016_v22, 1  ;;  %vm9894_vm13 = vcmp.eq.s32.totalorder %v9773_v51, 1  ;;  %vm9895_vm2 = vcmp.eq.s32.totalorder %v9774_v50, 1  ;;  %vm9897_vm7 = vcmp.eq.s32.totalorder %v7038_v49, 1  ;;  %v6077_v49 = vld [vmem:[#allocation5 + $0xa0] sm:$0xff]   ;;  %v8409_v56 = vpop.permute.xlu0 %1231  ;;  %5340 = vmatpush3.bf16.msra.mxu0 %v6078_v20 }
 0x1b6   : > { %v9889_v19 = vsel %vm8353_vm3, 4294967295, %v9888_v19  ;;  %v1087_v9 = vsel %vm9893_vm14, %v9834_v3, 0.0  ;;  %vm4553_vm10 = vmpackc.low %vm9895_vm2, %vm9894_vm13  ;;  %5545 = vmatprep.mubr.msk.bf16.mxu1 %vm8353_vm3, %v9896_v13  ;;  %v1088_v26 = vsel %vm9897_vm7, %v9848_v31, 0.0  ;;  %vm9898_vm9 = vcmp.eq.s32.totalorder %v7040_v52, 1  ;;  %v9899_v3 = vld [vmem:[#allocation119_spill] sm:$0xff]  ;;  %5577 = vmatprep.subr.bf16.mxu1 %v6077_v49  ;;  %v9937_v13 = vld [vmem:[#allocation14_spill] sm:$0xff] }
 0x1b7   : > { %v8377_v62 = vpack.c.bf16 %v1087_v9, %v1086_v7  ;;  %v1089_v22 = vsel %vm9898_vm9, %v7648_v6, 0.0  ;;  %vm9900_vm14 = vmmov %vm9894_vm13  ;;  %vm9901_vm13 = vcmp.eq.s32.totalorder %v9792_v61, 1  ;;  %vm9902_vm2 = vcmp.eq.s32.totalorder %v9793_v38, 1  ;;  %v9911_v38 = vld [vmem:[#allocation49_spill] sm:$0xff]  ;;  %v9943_v20 = vld [vmem:[#allocation87_spill] sm:$0xff]  ;;  %5578 = vmatpush3.bf16.msra.mxu1 %v6077_v49 }
 0x1b8   : > { %v1090_v4 = vsel %vm9900_vm14, %v9899_v3, 0.0  ;;  %vm4556_vm15 = vmpackc.low %vm9902_vm2, %vm9901_vm13  ;;  %v9904_v35 = vpack.c.bf16 %v9903_v1, %v9899_v3  ;;  %v8395_v31 = vpack.c.bf16 %v1089_v22, %v1088_v26  ;;  %vm9905_vm7 = vcmp.eq.s32.totalorder %v9774_v50, 1  ;;  %v8422_v26 = vpop.permute.xlu1 %1234  ;;  %v9914_v3 = vld [vmem:[#allocation50_spill] sm:$0xff]  ;;  %5579 = vmatprep.subr.bf16.mxu1 %v6079_v57  ;;  %v6081_v49 = vld [vmem:[#allocation5 + $0xb0] sm:$0xff]  }
 0x1b9   : > { %v1091_v52 = vsel %vm9905_vm7, %v9903_v1, 0.0  ;;  %vm9906_vm9 = vmmov %vm9901_vm13  ;;  %v9908_v60 = vpack.c.bf16 %v7787_v36, %v7799_v27  ;;  %vm9910_vm13 = vcmp.eq.s32.totalorder %v9828_v46, 1  ;;  %vm9913_vm7 = vcmp.eq.s32.totalorder %v9846_v10, 1  ;;  %v9915_v1 = vld [vmem:[#allocation31_spill] sm:$0xff]  ;;  %v9992_v0 = vld [vmem:[#allocation18_spill] sm:$0xff] }
 0x1ba   : > { %5306 = vmatmul.mubr.msk.bf16.gmra.mrb[40].mxu0 %vm4553_vm10, %v9904_v35  ;;  %v1092_v6 = vsel %vm9906_vm9, %v7799_v27, 0.0  ;;  %vm9907_vm14 = vmmov %vm9902_vm2  ;;  %v8411_v7 = vpack.c.bf16 %v1091_v52, %v1090_v4  ;;  %vm9909_vm10 = vcmp.eq.s32.totalorder %v9827_v42, 1  ;;  %v1095_v61 = vsel %vm9910_vm13, %v7834_v21, 0.0  ;;  %v6080_v27 = vld [vmem:[#allocation5 + $0x30] sm:$0xff]   ;;  %v9917_v52 = vld [vmem:[#allocation32_spill] sm:$0xff] }
 0x1bb   : > { %v1093_v51 = vsel %vm9907_vm14, %v7787_v36, 0.0  ;;  %5309 = vmatprep.mubr.msk.bf16.mxu0 %vm4556_vm15, %v9908_v60  ;;  %v1094_v50 = vsel %vm9909_vm10, %v7907_v45, 0.0  ;;  %vm9912_vm15 = vcmp.eq.s32.totalorder %v9845_v12, 1  ;;  %v1097_v22 = vsel %vm9913_vm7, %v7933_v16, 0.0  ;;  %5341 = vmatprep.subr.bf16.mxu0 %v6080_v27 }
 0x1bc   : > { %v8413_v9 = vpack.c.bf16 %v1093_v51, %v1092_v6  ;;  %v8424_v36 = vpack.c.bf16 %v1095_v61, %v1094_v50  ;;  %v1096_v8 = vsel %vm9912_vm15, %v7951_v14, 0.0  ;;  %vm9916_vm14 = vcmp.eq.s32.totalorder %v9915_v1, 1  ;;  %5342 = vmatpush3.bf16.msra.mxu0 %v6080_v27  ;;  %5580 = vmatpush3.bf16.msra.mxu1 %v6079_v57  ;;  %v6083_v27 = vld [vmem:[#allocation5 + $0xb8] sm:$0xff]  }
 0x1bd   : > { %v8433_v4 = vpack.c.bf16 %v1097_v22, %v1096_v8  ;;  %v1098_v35 = vsel %vm9916_vm14, %v8002_v37, 0.0  ;;  %vm9918_vm10 = vcmp.eq.s32.totalorder %v9917_v52, 1  ;;  %vm9919_vm13 = vcmp.eq.s32.totalorder %v9843_v11, 1  ;;  %v9926_v11 = vld [vmem:[#allocation38_spill] sm:$0xff]  ;;  %v3388_v22 = vpop.permute.xlu0 %3387  ;;  %5581 = vmatprep.subr.bf16.mxu1 %v6081_v49  ;;  %v9970_v57 = vld [vmem:[#allocation96_spill] sm:$0xff] }
 0x1be   : > { %v1099_v6 = vsel %vm9918_vm10, %v7990_v15, 0.0  ;;  %vm9920_vm15 = vcmp.eq.s32.totalorder %v9844_v63, 1  ;;  %v9921_v51 = vmov 0  ;;  %vm9924_vm7 = vcmp.eq.s32.totalorder %v9867_v59, 1 }
 0x1bf   : > { %vm8445_vm2 = vmpackc.low %vm9920_vm15, %vm9919_vm13  ;;  %v8449_v60 = vpack.c.bf16 %v1099_v6, %v1098_v35  ;;  %v1100_v50 = vsel %vm9924_vm7, %v8018_v53, 0.0  ;;  %vm9925_vm14 = vcmp.eq.s32.totalorder %v9868_v25, 1  ;;  %vm9927_vm10 = vcmp.eq.s32.totalorder %v9926_v11, 1  ;;  %v9933_v35 = vld [vmem:[#allocation39_spill] sm:$0xff] }
 0x1c0   : > { %v9922_v51 = vsel %vm8445_vm2, 4294967295, %v9921_v51  ;;  %v1101_v61 = vsel %vm9925_vm14, %v8010_v30, 0.0  ;;  %v1102_v63 = vsel %vm9927_vm10, %v8065_v33, 0.0  ;;  %vm9928_vm13 = vcmp.eq.s32.totalorder %v9856_v43, 1  ;;  %v9935_v6 = vld [vmem:[#allocation15_spill] sm:$0xff]  ;;  %5546 = vmatmul.mubr.msk.bf16.gmra.mrb[8].mxu1 %vm8445_vm2, %v9943_v20 }
 0x1c1   : > { %9923 = vst [vmem:[#allocation104_spill] sm:$0xff] %v9922_v51  ;;  %vm9929_vm15 = vcmp.eq.s32.totalorder %v9857_v48, 1  ;;  %v9930_v8 = vmov 0  ;;  %v8468_v1 = vpack.c.bf16 %v1101_v61, %v1100_v50  ;;  %vm9934_vm7 = vcmp.eq.s32.totalorder %v9933_v35, 1  ;;  %v3391_v50 = vpop.permute.xlu1 %3390  ;;  %v6082_v61 = vld [vmem:[#allocation5 + $0x38] sm:$0xff]   ;;  %5582 = vmatpush3.bf16.msra.mxu1 %v6081_v49 }
 0x1c2   : > { %vm8464_vm9 = vmpackc.low %vm9929_vm15, %vm9928_vm13  ;;  %v1103_v52 = vsel %vm9934_vm7, %v8057_v34, 0.0  ;;  %vm9936_vm14 = vcmp.eq.s32.totalorder %v9890_v28, 1  ;;  %vm9938_vm10 = vcmp.eq.s32.totalorder %v9891_v55, 1  ;;  %vm9939_vm13 = vcmp.eq.s32.totalorder %v9827_v42, 1  ;;  %v9945_v42 = vld [vmem:[#allocation45_spill] sm:$0xff]  ;;  %5343 = vmatprep.subr.bf16.mxu0 %v6082_v61  ;;  %5583 = vmatprep.subr.bf16.mxu1 %v6083_v27 }
 0x1c3   : > { %v9931_v8 = vsel %vm8464_vm9, 4294967295, %v9930_v8  ;;  %v1104_v11 = vsel %vm9936_vm14, %v9935_v6, 0.0  ;;  %v1105_v43 = vsel %vm9938_vm10, %v9937_v13, 0.0  ;;  %vm9940_vm15 = vcmp.eq.s32.totalorder %v9828_v46, 1  ;;  %5549 = vmatprep.mubr.msk.bf16.mxu1 %vm8464_vm9, %v9952_v17  ;;  %v9963_v17 = vld [vmem:[#allocation22_spill] sm:$0xff]  ;;  %5344 = vmatpush3.bf16.msra.mxu0 %v6082_v61 }
 0x1c4   : > { %9932 = vst [vmem:[#allocation52_spill] sm:$0xff] %v9931_v8  ;;  %vm8483_vm3 = vmpackc.low %vm9940_vm15, %vm9939_vm13  ;;  %vm3446_vm7 = vcmp.eq.s32.totalorder %v3388_v22, 1  ;;  %v8490_v35 = vpack.c.bf16 %v1103_v52, %v1102_v63  ;;  %v8492_v2 = vpack.c.bf16 %v1105_v43, %v1104_v11  ;;  %vm9946_vm14 = vcmp.eq.s32.totalorder %v9945_v42, 1  ;;  %v9951_v22 = vld [vmem:[#allocation123_spill] sm:$0xff]  ;;  %v9953_v63 = vld [vmem:[#allocation140_spill] sm:$0xff] }
 0x1c5   : > { %v1106_v46 = vsel %vm9946_vm14, %v9944_v39, 0.0  ;;  %vm9947_vm10 = vcmp.eq.s32.totalorder %v9845_v12, 1  ;;  %vm9948_vm13 = vcmp.eq.s32.totalorder %v9846_v10, 1  ;;  %vm3447_vm2 = vcmp.eq.s32.totalorder %v3391_v50, 1  ;;  %v9954_v52 = vld [vmem:[#allocation46_spill] sm:$0xff]  ;;  %v8543_v48 = vpop.permute.xlu1 %3396  ;;  %5584 = vmatpush3.bf16.msra.mxu1 %v6083_v27 }
 0x1c6   : > { %vm8501_vm15 = vmpackc.low %vm9948_vm13, %vm9947_vm10  ;;  %v3478_v20 = vsel %vm3446_vm7, %v9951_v22, 0.0  ;;  %vm9955_vm5 = vcmp.eq.s32.totalorder %v9954_v52, 1  ;;  %v9956_v43 = vld [vmem:[#allocation142_spill] sm:$0xff]  ;;  %vm9957_vm14 = vcmp.eq.s32.totalorder %v9911_v38, 1  ;;  %v9959_v51 = vmov 0 }
 0x1c7   : > { %v1107_v11 = vsel %vm9955_vm5, %v9953_v63, 0.0  ;;  %v1108_v12 = vsel %vm9957_vm14, %v9956_v43, 0.0  ;;  %v9958_v10 = vld [vmem:[#allocation122_spill] sm:$0xff]  ;;  %vm8516_vm10 = vmpackc.low %vm3447_vm2, %vm3446_vm7  ;;  %v9962_v50 = vpack.c.bf16 %v7834_v21, %v7907_v45  ;;  %vm9964_vm5 = vcmp.eq.s32.totalorder %v9914_v3, 1  ;;  %v8539_v45 = vpop.permute.xlu0 %3393 }
 0x1c8   : > { %v3479_v42 = vsel %vm3447_vm2, %v9958_v10, 0.0  ;;  %v9960_v51 = vsel %vm8516_vm10, 4294967295, %v9959_v51  ;;  %v8525_v52 = vpack.c.bf16 %v1107_v11, %v1106_v46  ;;  %v1109_v22 = vsel %vm9964_vm5, %v9963_v17, 0.0  ;;  %v8546_v46 = vld [vmem:[#allocation5 + $0x180] sm:$0xff]   ;;  %v9968_v11 = vld [vmem:[#allocation99_spill] sm:$0xff]  ;;  %v9984_v27 = vld [vmem:[#allocation138_spill] sm:$0xff] }
 0x1c9   : > { %9961 = vst [vmem:[#allocation23_spill] sm:$0xff] %v9960_v51  ;;  %5310 = vmatmul.mubr.msk.bf16.gmra.mrb[44].mxu0 %vm8483_vm3, %v9962_v50  ;;  %v8532_v8 = vpack.c.bf16 %v3479_v42, %v3478_v20  ;;  %v9965_v51 = vpack.c.bf16 %v7933_v16, %v7951_v14  ;;  %v8541_v21 = vpack.c.bf16 %v1109_v22, %v1108_v12  ;;  %vm9452_vm3 = vcmp.eq.s32.totalorder %v8539_v45, 1  ;;  %v9966_v20 = vld [vmem:[#allocation136_spill] sm:$0xff]  ;;  %v9967_v14 = vld [vmem:[#allocation135_spill] sm:$0xff]  ;;  %v8562_v42 = vpop.permute.xlu1 %1240 }
 0x1ca   : > { %vm9450_vm2 = vcmp.eq.s32.totalorder %v8543_v48, 1  ;;  %v3480_v16 = vsel %vm9452_vm3, %v9966_v20, 0.0  ;;  %5550 = vmatmul.mubr.msk.bf16.gmra.mrb[12].mxu1 %vm7122_vm4, %v9968_v11  ;;  %5377 = vmatprep.subr.bf16.mxu0 %v8546_v46  ;;  %vm9972_vm7 = vcmp.eq.s32.totalorder %v9867_v59, 1  ;;  %vm9973_vm13 = vcmp.eq.s32.totalorder %v9868_v25, 1  ;;  %v9977_v25 = vld [vmem:[#allocation110_spill] sm:$0xff] }
 0x1cb   : > { %5313 = vmatprep.mubr.msk.bf16.mxu0 %vm8501_vm15, %v9965_v51  ;;  %v3481_v24 = vsel %vm9450_vm2, %v9967_v14, 0.0  ;;  %v8557_v22 = vpop.permute.xlu0 %1237  ;;  %5553 = vmatprep.mubr.msk.bf16.mxu1 %vm7142_vm11, %v9970_v57  ;;  %vm4568_vm15 = vmpackc.low %vm9973_vm13, %vm9972_vm7  ;;  %v9974_v61 = vpack.c.bf16 %v7990_v15, %v8002_v37  ;;  %v9976_v10 = vpack.c.bf16 %v8010_v30, %v8018_v53  ;;  %vm9979_vm14 = vcmp.eq.s32.totalorder %v9890_v28, 1  ;;  %v9981_v30 = vld [vmem:[#allocation139_spill] sm:$0xff]  ;;  %v10237_v37 = vld [vmem:[#allocation118_spill] sm:$0xff] }
 0x1cc   : > { %v8555_v51 = vpack.c.bf16 %v3481_v24, %v3480_v16  ;;  %v8577_v24 = vld [vmem:[#allocation5 + $0x140] sm:$0xff]   ;;  %vm9980_vm5 = vcmp.eq.s32.totalorder %v9891_v55, 1  ;;  %v9985_v11 = vmov 0 }
 0x1cd   : > { %v8584_v49 = vpop.permute.xlu1 %1246  ;;  %5617 = vmatprep.subr.bf16.mxu1 %v8577_v24  ;;  %vm4574_vm7 = vmpackc.low %vm9980_vm5, %vm9979_vm14  ;;  %vm9999_vm5 = vnez %v9998_v58 }
 0x1cf   : > { %v8582_v57 = vpop.permute.xlu0 %1243 }
 0x1d1   : > { %5314 = vmatmul.mubr.msk.bf16.gmra.mrb[48].mxu0 %vm7160_vm0, %v9974_v61  ;;  %v3403_v15 = vpop.permute.xlu1 %3402 }
 0x1d2   : > { %5317 = vmatprep.mubr.msk.bf16.mxu0 %vm4568_vm15, %v9976_v10  ;;  %5554 = vmatmul.mubr.msk.bf16.gmra.mrb[16].mxu1 %vm7168_vm6, %v9977_v25  ;;  %vm3451_vm13 = vcmp.eq.s32.totalorder %v3403_v15, 1  ;;  %v9982_v10 = vld [vmem:[#allocation107_spill] sm:$0xff]  ;;  %v9990_v15 = vpack.c.bf16 %v9937_v13, %v9935_v6  ;;  %v9994_v6 = vld [vmem:[#allocation121_spill] sm:$0xff] }
 0x1d3   : > { %v3400_v59 = vpop.permute.xlu0 %3399  ;;  %5557 = vmatprep.mubr.msk.bf16.mxu1 %vm7184_vm1, %v9982_v10  ;;  %v3483_v16 = vsel %vm3451_vm13, %v9984_v27, 0.0  ;;  %v10024_v27 = vld [vmem:[#allocation54_spill] sm:$0xff] }
 0x1d4   : > { %vm3450_vm0 = vcmp.eq.s32.totalorder %v3400_v59, 1  ;;  %v9988_v59 = vpack.c.bf16 %v8057_v34, %v8065_v33  ;;  %v9993_v33 = vld [vmem:[#allocation17_spill] sm:$0xff] }
 0x1d5   : > { %v3482_v53 = vsel %vm3450_vm0, %v9981_v30, 0.0  ;;  %vm8599_vm15 = vmpackc.low %vm3451_vm13, %vm3450_vm0  ;;  %v8615_v10 = vpop.permute.xlu1 %3408  ;;  %vm10001_vm13 = vcmp.eq.s32.totalorder %v9914_v3, 1  ;;  %v10008_v30 = vld [vmem:[#allocation48_spill] sm:$0xff] }
 0x1d6   : > { %v9986_v11 = vsel %vm8599_vm15, 4294967295, %v9985_v11  ;;  %v8608_v55 = vpack.c.bf16 %v3483_v16, %v3482_v53  ;;  %9991 = vst [vmem:[#allocation35_spill] sm:$0xff] %v8615_v10  ;;  %vm9449_vm14 = vcmp.eq.s32.totalorder %v8615_v10, 1 }
 0x1d7   : > { %9987 = vst [vmem:[#allocation24_spill] sm:$0xff] %v9986_v11  ;;  %v8613_v25 = vpop.permute.xlu0 %3405  ;;  %v3485_v53 = vsel %vm9449_vm14, %v9993_v33, 0.0  ;;  %v10007_v11 = vld [vmem:[#allocation129_spill] sm:$0xff] }
 0x1d8   : > { %vm9448_vm0 = vcmp.eq.s32.totalorder %v8613_v25, 1 }
 0x1d9   : > { %5318 = vmatmul.mubr.msk.bf16.gmra.mrb[52].mxu0 %vm7202_vm8, %v9988_v59  ;;  %v3484_v34 = vsel %vm9448_vm0, %v9992_v0, 0.0  ;;  %v9995_v59 = vld [vmem:[#allocation41_spill] sm:$0xff]  ;;  %v8632_v28 = vpop.permute.xlu1 %1252 }
 0x1da   : > { %5321 = vmatprep.mubr.msk.bf16.mxu0 %vm4574_vm7, %v9990_v15  ;;  %v8625_v16 = vpack.c.bf16 %v3485_v53, %v3484_v34  ;;  %vm9996_vm8 = vnez %v9995_v59  ;;  %v9997_v15 = vld [vmem:[#allocation118_spill] sm:$0xff]  ;;  %vm10000_vm7 = vcmp.eq.s32.totalorder %v9911_v38, 1  ;;  %v10002_v34 = vpack.c.bf16 %v9953_v63, %v9944_v39 }
 0x1db   : > { %v8627_v13 = vpop.permute.xlu0 %1249  ;;  %5558 = vmatmul.mubr.msk.bf16.gmra.mrb[20].mxu1 %vm9996_vm8, %v9994_v6  ;;  %vm4580_vm0 = vmpackc.low %vm10001_vm13, %vm10000_vm7  ;;  %v10004_v6 = vpack.c.bf16 %v9963_v17, %v9956_v43  ;;  %v10006_v38 = vld [vmem:[#allocation70_spill] sm:$0xff]  ;;  %vm10009_vm7 = vnez %v10008_v30  ;;  %v10010_v63 = vmov 0 }
 0x1dc   : > { %5561 = vmatprep.mubr.msk.bf16.mxu1 %vm9999_vm5, %v9997_v15  ;;  %v10005_v15 = vld [vmem:[#allocation72_spill] sm:$0xff]  ;;  %vm1272_vm2 = vcmp.eq.s32.totalorder %v10006_v38, 1  ;;  %v10013_v17 = vld [vmem:[#allocation94_spill] sm:$0xff]  ;;  %v10018_v38 = vmov 0 }
 0x1dd   : > { %v8651_v33 = vpop.permute.xlu1 %1258  ;;  %vm1273_vm14 = vcmp.eq.s32.totalorder %v10005_v15, 1  ;;  %v10017_v15 = vld [vmem:[#allocation143_spill] sm:$0xff]  ;;  %v10022_v30 = vld [vmem:[#allocation26_spill] sm:$0xff] }
 0x1df   : > { %v8649_v0 = vpop.permute.xlu0 %1255 }
 0x1e1   : > { %5322 = vmatmul.mubr.msk.bf16.gmra.mrb[56].mxu0 %vm7244_vm12, %v10002_v34  ;;  %v3415_v39 = vpop.permute.xlu1 %3414  ;;  %vm8658_vm12 = vmpackc.low %vm1273_vm14, %vm1272_vm2  ;;  %v10015_v34 = vld [vmem:[#allocation51_spill] sm:$0xff]  ;;  %vm10025_vm2 = vnez %v10024_v27  ;;  %v10029_v27 = vld [vmem:[#allocation74_spill] sm:$0xff] }
 0x1e2   : > { %5325 = vmatprep.mubr.msk.bf16.mxu0 %vm4580_vm0, %v10004_v6  ;;  %v10011_v63 = vsel %vm8658_vm12, 4294967295, %v10010_v63  ;;  %vm3455_vm0 = vcmp.eq.s32.totalorder %v3415_v39, 1  ;;  %v10014_v6 = vld [vmem:[#allocation126_spill] sm:$0xff]  ;;  %vm10016_vm3 = vnez %v10015_v34 }
 0x1e3   : > { %v3412_v3 = vpop.permute.xlu0 %3411  ;;  %5562 = vmatmul.mubr.msk.bf16.gmra.mrb[24].mxu1 %vm10009_vm7, %v10007_v11  ;;  %10012 = vst [vmem:[#allocation36_spill] sm:$0xff] %v10011_v63  ;;  %v3487_v53 = vsel %vm3455_vm0, %v10017_v15, 0.0  ;;  %v10021_v11 = vld [vmem:[#allocation144_spill] sm:$0xff]  ;;  %v10034_v15 = vld [vmem:[#allocation58_spill] sm:$0xff]  ;;  %v10047_v63 = vld [vmem:[#allocation69_spill] sm:$0xff] }
 0x1e4   : > { %vm3454_vm13 = vcmp.eq.s32.totalorder %v3412_v3, 1  ;;  %5565 = vmatprep.mubr.msk.bf16.mxu1 %vm10016_vm3, %v10014_v6  ;;  %v10023_v3 = vpack.c.bf16 %v10021_v11, %v10022_v30  ;;  %v10028_v30 = vld [vmem:[#allocation76_spill] sm:$0xff]  ;;  %vm10035_vm7 = vnez %v10034_v15 }
 0x1e5   : > { %v3486_v43 = vsel %vm3454_vm13, %v10013_v17, 0.0  ;;  %vm8667_vm15 = vmpackc.low %vm3455_vm0, %vm3454_vm13  ;;  %v8683_v6 = vpop.permute.xlu1 %3420  ;;  %vm1275_vm0 = vcmp.eq.s32.totalorder %v10028_v30, 1  ;;  %v10033_v17 = vld [vmem:[#allocation56_spill] sm:$0xff]  ;;  %v10039_v30 = vmov 0 }
 0x1e6   : > { %v10019_v38 = vsel %vm8667_vm15, 4294967295, %v10018_v38  ;;  %v8676_v10 = vpack.c.bf16 %v3487_v53, %v3486_v43  ;;  %vm9458_vm13 = vcmp.eq.s32.totalorder %v8683_v6, 1  ;;  %v10030_v53 = vld [vmem:[#allocation92_spill] sm:$0xff] }
 0x1e7   : > { %10020 = vst [vmem:[#allocation64_spill] sm:$0xff] %v10019_v38  ;;  %v8681_v39 = vpop.permute.xlu0 %3417  ;;  %v3489_v43 = vsel %vm9458_vm13, %v8274_v47, 0.0  ;;  %vm1277_vm15 = vcmp.eq.s32.totalorder %v10030_v53, 1  ;;  %v10044_v53 = vld [vmem:[#allocation95_spill] sm:$0xff]  ;;  %v6090_v15 = vld [vmem:[#allocation5 + $0x198] sm:$0xff]  }
 0x1e8   : > { %10026 = vst [vmem:[#allocation103_spill] sm:$0xff] %v8676_v10  ;;  %10027 = vst [vmem:[#allocation42_spill] sm:$0xff] %v8681_v39  ;;  %vm9456_vm14 = vcmp.eq.s32.totalorder %v8681_v39, 1  ;;  %v6086_v39 = vld [vmem:[#allocation5 + $0x188] sm:$0xff]  }
 0x1e9   : > { %5326 = vmatmul.mubr.msk.bf16.gmra.mrb[60].mxu0 %vm10025_vm2, %v10023_v3  ;;  %v3488_v11 = vsel %vm9456_vm14, %v8289_v5, 0.0  ;;  %vm1274_vm2 = vcmp.eq.s32.totalorder %v10029_v27, 1  ;;  %v10031_v3 = vld [vmem:[#allocation91_spill] sm:$0xff]  ;;  %v10036_v5 = vmov 0  ;;  %v10042_v27 = vld [vmem:[#allocation133_spill] sm:$0xff] }
 0x1ea   : > { %5345 = vmatprep.mubr.msk.bf16.mxu0 %vm8658_vm12, %v8281_v40  ;;  %vm1276_vm3 = vcmp.eq.s32.totalorder %v10031_v3, 1  ;;  %v8697_v38 = vpack.c.bf16 %v3489_v43, %v3488_v11  ;;  %vm8702_vm14 = vmpackc.low %vm1275_vm0, %vm1274_vm2  ;;  %v6088_v11 = vld [vmem:[#allocation5 + $0x190] sm:$0xff]   ;;  %v10043_v43 = vld [vmem:[#allocation98_spill] sm:$0xff]  ;;  %vm1278_vm2 = vcmp.eq.s32.totalorder %v10044_v53, 1 }
 0x1eb   : > { %5566 = vmatmul.mubr.msk.bf16.gmra.mrb[28].mxu1 %vm10035_vm7, %v10033_v17  ;;  %v10037_v5 = vsel %vm8702_vm14, 4294967295, %v10036_v5  ;;  %vm8709_vm13 = vmpackc.low %vm1277_vm15, %vm1276_vm3  ;;  %vm1279_vm0 = vcmp.eq.s32.totalorder %v10043_v43, 1  ;;  %v6087_v3 = vld [vmem:[#allocation5 + $0x148] sm:$0xff]   ;;  %v10046_v17 = vld [vmem:[#allocation113_spill] sm:$0xff] }
 0x1ec   : > { %10032 = vst [vmem:[#allocation43_spill] sm:$0xff] %v8697_v38  ;;  %10038 = vst [vmem:[#allocation119_spill] sm:$0xff] %v10037_v5  ;;  %5585 = vmatprep.mubr.msk.bf16.mxu1 %vm8658_vm12, %v8341_v29  ;;  %v10040_v30 = vsel %vm8709_vm13, 4294967295, %v10039_v30  ;;  %v10045_v29 = vld [vmem:[#allocation115_spill] sm:$0xff]  ;;  %vm1280_vm15 = vcmp.eq.s32.totalorder %v10046_v17, 1  ;;  %v10051_v43 = vld [vmem:[#allocation85_spill] sm:$0xff] }
 0x1ed   : > { %10041 = vst [vmem:[#allocation116_spill] sm:$0xff] %v10040_v30  ;;  %vm1281_vm3 = vcmp.eq.s32.totalorder %v10045_v29, 1  ;;  %vm8727_vm12 = vmpackc.low %vm1279_vm0, %vm1278_vm2  ;;  %v10052_v29 = vmov 0  ;;  %v6089_v17 = vld [vmem:[#allocation5 + $0x150] sm:$0xff]   ;;  %v10056_v53 = vld [vmem:[#allocation117_spill] sm:$0xff] }
 0x1ee   : > { %vm8735_vm7 = vmpackc.low %vm1281_vm3, %vm1280_vm15  ;;  %vm1282_vm2 = vcmp.eq.s32.totalorder %v10056_v53, 1  ;;  %v10057_v30 = vld [vmem:[#allocation134_spill] sm:$0xff]  ;;  %v10058_v5 = vld [vmem:[#allocation132_spill] sm:$0xff] }
 0x1ef   : > { %v10053_v29 = vsel %vm8735_vm7, 4294967295, %v10052_v29  ;;  %vm1285_vm3 = vcmp.eq.s32.totalorder %v10057_v30, 1  ;;  %vm1284_vm15 = vcmp.eq.s32.totalorder %v10058_v5, 1  ;;  %v10063_v30 = vmov 0  ;;  %v6093_v5 = vld [vmem:[#allocation5 + $0x160] sm:$0xff]   ;;  %v6095_v53 = vld [vmem:[#allocation5 + $0x168] sm:$0xff]  }
 0x1f0   : > { %10054 = vst [vmem:[#allocation50_spill] sm:$0xff] %v10053_v29  ;;  %v10067_v29 = vld [vmem:[#allocation112_spill] sm:$0xff]  ;;  %v10232_v12 = vld [vmem:[#allocation103_spill] sm:$0xff] }
 0x1f1   : > { %5346 = vmatmul.mubr.msk.bf16.vlgmr.msra.gmra.mrb[32].mxu0 %vm8702_vm14, %v10042_v27  ;;  %v10060_v27 = vmov 0 }
 0x1f2   : > { %5349 = vmatprep.mubr.msk.bf16.mxu0 %vm8709_vm13, %v8327_v44  ;;  %5378 = vmatpush3.bf16.msra.mxu0 %v8546_v46  ;;  %v10048_v46 = vmov 0 }
 0x1f3   : > { %5379 = vmatprep.subr.bf16.mxu0 %v6086_v39  ;;  %5586 = vmatmul.mubr.msk.bf16.vlgmr.msra.gmra.mrb[0].mxu1 %vm8702_vm14, %v10047_v63  ;;  %v10049_v46 = vsel %vm8727_vm12, 4294967295, %v10048_v46  ;;  %v6091_v63 = vld [vmem:[#allocation5 + $0x158] sm:$0xff]   ;;  %vm8759_vm14 = vmpackc.low %vm1285_vm3, %vm1284_vm15  ;;  %vm1289_vm3 = vcmp.eq.s32.totalorder %v8362_v32, 1  ;;  %vm1288_vm15 = vcmp.eq.s32.totalorder %v8339_v41, 1  ;;  %v10071_v32 = vmov 0  ;;  %v6097_v41 = vld [vmem:[#allocation5 + $0x170] sm:$0xff]  }
 0x1f4   : > { %10050 = vst [vmem:[#allocation49_spill] sm:$0xff] %v10049_v46  ;;  %5618 = vmatpush3.bf16.msra.mxu1 %v8577_v24  ;;  %5589 = vmatprep.mubr.msk.bf16.mxu1 %vm8709_vm13, %v10051_v43  ;;  %v6092_v24 = vld [vmem:[#allocation5 + $0x1a0] sm:$0xff]   ;;  %v10059_v43 = vld [vmem:[#allocation90_spill] sm:$0xff]  ;;  %v10064_v30 = vsel %vm8759_vm14, 4294967295, %v10063_v30  ;;  %v10068_v46 = vmov 0 }
 0x1f5   : > { %5619 = vmatprep.subr.bf16.mxu1 %v6087_v3 }
 0x1f6   : > { %5380 = vmatpush3.bf16.msra.mxu0 %v6086_v39  ;;  %v10055_v39 = vld [vmem:[#allocation120_spill] sm:$0xff] }
 0x1f7   : > { %5381 = vmatprep.subr.bf16.mxu0 %v6088_v11  ;;  %vm1283_vm0 = vcmp.eq.s32.totalorder %v10055_v39, 1  ;;  %v10065_v39 = vld [vmem:[#allocation13_spill] sm:$0xff] }
 0x1f8   : > { %5620 = vmatpush3.bf16.msra.mxu1 %v6087_v3  ;;  %vm8752_vm13 = vmpackc.low %vm1283_vm0, %vm1282_vm2  ;;  %v10062_v3 = vld [vmem:[#allocation108_spill] sm:$0xff]  ;;  %vm1287_vm0 = vcmp.eq.s32.totalorder %v10065_v39, 1  ;;  %v10073_v39 = vld [vmem:[#allocation131_spill] sm:$0xff] }
 0x1f9   : > { %5350 = vmatmul.mubr.msk.bf16.gmra.mrb[36].mxu0 %vm8727_vm12, %v8365_v54  ;;  %5621 = vmatprep.subr.bf16.mxu1 %v6089_v17  ;;  %v10061_v27 = vsel %vm8752_vm13, 4294967295, %v10060_v27 }
 0x1fa   : > { %5353 = vmatprep.mubr.msk.bf16.mxu0 %vm8735_vm7, %v8377_v62  ;;  %5382 = vmatpush3.bf16.msra.mxu0 %v6088_v11  ;;  %v6094_v11 = vld [vmem:[#allocation5 + $0x1a8] sm:$0xff]  }
 0x1fb   : > { %5383 = vmatprep.subr.bf16.mxu0 %v6090_v15  ;;  %5590 = vmatmul.mubr.msk.bf16.gmra.mrb[4].mxu1 %vm8727_vm12, %v10059_v43  ;;  %vm8783_vm12 = vmpackc.low %vm1289_vm3, %vm1288_vm15  ;;  %vm1293_vm3 = vcmp.eq.s32.totalorder %v8562_v42, 1  ;;  %vm1292_vm15 = vcmp.eq.s32.totalorder %v8557_v22, 1  ;;  %v10079_v22 = vmov 0  ;;  %v10081_v42 = vmov 0 }
 0x1fc   : > { %5593 = vmatprep.mubr.msk.bf16.mxu1 %vm8735_vm7, %v10062_v3  ;;  %5622 = vmatpush3.bf16.msra.mxu1 %v6089_v17  ;;  %v10066_v17 = vld [vmem:[#allocation137_spill] sm:$0xff]  ;;  %v10072_v32 = vsel %vm8783_vm12, 4294967295, %v10071_v32 }
 0x1fd   : > { %5623 = vmatprep.subr.bf16.mxu1 %v6091_v63  ;;  %vm1286_vm2 = vcmp.eq.s32.totalorder %v10066_v17, 1  ;;  %v10076_v17 = vld [vmem:[#allocation101_spill] sm:$0xff] }
 0x1fe   : > { %5384 = vmatpush3.bf16.msra.mxu0 %v6090_v15  ;;  %v6096_v15 = vld [vmem:[#allocation5 + $0x1b0] sm:$0xff]   ;;  %vm8776_vm7 = vmpackc.low %vm1287_vm0, %vm1286_vm2  ;;  %vm1291_vm0 = vcmp.eq.s32.totalorder %v8422_v26, 1  ;;  %vm1290_vm2 = vcmp.eq.s32.totalorder %v8409_v56, 1  ;;  %v10077_v56 = vmov 0  ;;  %v6101_v26 = vld [vmem:[#allocation5 + $0x200] sm:$0xff]  }
 0x1ff   : > { %5385 = vmatprep.subr.bf16.mxu0 %v6092_v24  ;;  %v10069_v46 = vsel %vm8776_vm7, 4294967295, %v10068_v46 }
 0x200   : > { %5624 = vmatpush3.bf16.msra.mxu1 %v6091_v63  ;;  %v10070_v63 = vld [vmem:[#allocation127_spill] sm:$0xff] }
 0x201   : > { %5354 = vmatmul.mubr.msk.bf16.gmra.mrb[40].mxu0 %vm8752_vm13, %v8395_v31  ;;  %5625 = vmatprep.subr.bf16.mxu1 %v6093_v5 }
 0x202   : > { %5357 = vmatprep.mubr.msk.bf16.mxu0 %vm8759_vm14, %v8411_v7  ;;  %5386 = vmatpush3.bf16.msra.mxu0 %v6092_v24  ;;  %v6098_v24 = vld [vmem:[#allocation5 + $0x1b8] sm:$0xff]  }
 0x203   : > { %5387 = vmatprep.subr.bf16.mxu0 %v6094_v11  ;;  %5594 = vmatmul.mubr.msk.bf16.gmra.mrb[8].mxu1 %vm8752_vm13, %v10067_v29  ;;  %vm8807_vm13 = vmpackc.low %vm1293_vm3, %vm1292_vm15  ;;  %vm1297_vm3 = vcmp.eq.s32.totalorder %v8632_v28, 1  ;;  %vm1296_vm15 = vcmp.eq.s32.totalorder %v8627_v13, 1  ;;  %v10083_v13 = vmov 0  ;;  %v10086_v28 = vmov 0 }
 0x204   : > { %5597 = vmatprep.mubr.msk.bf16.mxu1 %vm8759_vm14, %v10070_v63  ;;  %5626 = vmatpush3.bf16.msra.mxu1 %v6093_v5  ;;  %v6099_v5 = vld [vmem:[#allocation5 + $0x178] sm:$0xff]   ;;  %vm8800_vm14 = vmpackc.low %vm1291_vm0, %vm1290_vm2  ;;  %v10078_v56 = vsel %vm8807_vm13, 4294967295, %v10077_v56  ;;  %vm1295_vm0 = vcmp.eq.s32.totalorder %v8584_v49, 1  ;;  %vm1294_vm2 = vcmp.eq.s32.totalorder %v8582_v57, 1  ;;  %v1265_v57 = vpop.permute.xlu1 %1264  ;;  %v1262_v49 = vpop.permute.xlu0 %1261 }
 0x205   : > { %5627 = vmatprep.subr.bf16.mxu1 %v6095_v53 }
 0x206   : > { %5388 = vmatpush3.bf16.msra.mxu0 %v6094_v11  ;;  %v6100_v11 = vld [vmem:[#allocation5 + $0x40] sm:$0xff]  }
 0x207   : > { %5389 = vmatprep.subr.bf16.mxu0 %v6096_v15 }
 0x208   : > { %5628 = vmatpush3.bf16.msra.mxu1 %v6095_v53  ;;  %v10089_v53 = vmov 0 }
 0x209   : > { %5358 = vmatmul.mubr.msk.bf16.gmra.mrb[44].mxu0 %vm8776_vm7, %v8413_v9  ;;  %5629 = vmatprep.subr.bf16.mxu1 %v6097_v41 }
 0x20a   : > { %5361 = vmatprep.mubr.msk.bf16.mxu0 %vm8783_vm12, %v8424_v36  ;;  %5390 = vmatpush3.bf16.msra.mxu0 %v6096_v15  ;;  %v10074_v15 = vmov 0 }
 0x20b   : > { %5391 = vmatprep.subr.bf16.mxu0 %v6098_v24  ;;  %5598 = vmatmul.mubr.msk.bf16.gmra.mrb[12].mxu1 %vm8776_vm7, %v10073_v39  ;;  %v10075_v15 = vsel %vm8800_vm14, 4294967295, %v10074_v15  ;;  %vm8831_vm7 = vmpackc.low %vm1297_vm3, %vm1296_vm15 }
 0x20c   : > { %5601 = vmatprep.mubr.msk.bf16.mxu1 %vm8783_vm12, %v10076_v17  ;;  %5630 = vmatpush3.bf16.msra.mxu1 %v6097_v41  ;;  %vm8824_vm12 = vmpackc.low %vm1295_vm0, %vm1294_vm2  ;;  %v10082_v42 = vsel %vm8831_vm7, 4294967295, %v10081_v42  ;;  %vm1299_vm0 = vcmp.eq.s32.totalorder %v8651_v33, 1  ;;  %vm1298_vm2 = vcmp.eq.s32.totalorder %v8649_v0, 1  ;;  %v1271_v0 = vpop.permute.xlu1 %1270  ;;  %v1268_v33 = vpop.permute.xlu0 %1267  ;;  %v6102_v41 = vld [vmem:[#allocation5 + $0x48] sm:$0xff]  }
 0x20d   : > { %5631 = vmatprep.subr.bf16.mxu1 %v6099_v5  ;;  %v10080_v22 = vsel %vm8824_vm12, 4294967295, %v10079_v22  ;;  %vm8846_vm3 = vmpackc.low %vm1299_vm0, %vm1298_vm2  ;;  %vm1303_vm0 = vcmp.eq.s32.totalorder %v1271_v0, 1  ;;  %vm1302_vm2 = vcmp.eq.s32.totalorder %v1268_v33, 1  ;;  %v10097_v0 = vld [vmem:[#allocation67_spill] sm:$0xff]  ;;  %v10099_v33 = vld [vmem:[#allocation16_spill] sm:$0xff] }
 0x20e   : > { %5392 = vmatpush3.bf16.msra.mxu0 %v6098_v24  ;;  %v10084_v13 = vsel %vm8846_vm3, 4294967295, %v10083_v13  ;;  %v10092_v24 = vld [vmem:[#allocation130_spill] sm:$0xff] }
 0x20f   : > { %5425 = vmatprep.subr.bf16.mxu0 %v6100_v11  ;;  %10085 = vst [vmem:[#allocation31_spill] sm:$0xff] %v10084_v13  ;;  %v10105_v13 = vld [vmem:[#allocation86_spill] sm:$0xff] }
 0x210   : > { %5632 = vmatpush3.bf16.msra.mxu1 %v6099_v5  ;;  %v10094_v5 = vld [vmem:[#allocation60_spill] sm:$0xff] }
 0x211   : > { %5362 = vmatmul.mubr.msk.bf16.gmra.mrb[48].mxu0 %vm8800_vm14, %v8433_v4  ;;  %5665 = vmatprep.subr.bf16.mxu1 %v6101_v26 }
 0x212   : > { %5365 = vmatprep.mubr.msk.bf16.mxu0 %vm8807_vm13, %v8449_v60 }
 0x213   : > { %5602 = vmatmul.mubr.msk.bf16.gmra.mrb[16].mxu1 %vm8800_vm14, %v8337_v23  ;;  %vm1301_vm14 = vcmp.eq.s32.totalorder %v1265_v57, 1  ;;  %v10095_v57 = vld [vmem:[#allocation59_spill] sm:$0xff] }
 0x214   : > { %5605 = vmatprep.mubr.msk.bf16.mxu1 %vm8807_vm13, %v8532_v8  ;;  %vm1300_vm13 = vcmp.eq.s32.totalorder %v1262_v49, 1  ;;  %v10096_v49 = vpack.c.bf16 %v10094_v5, %v10095_v57  ;;  %v10107_v5 = vld [vmem:[#allocation66_spill] sm:$0xff]  ;;  %v10108_v57 = vld [vmem:[#allocation57_spill] sm:$0xff] }
 0x215   : > { %vm8853_vm15 = vmpackc.low %vm1301_vm14, %vm1300_vm13  ;;  %vm10093_vm13 = vnez %v10092_v24  ;;  %v10210_v24 = vld [vmem:[#allocation63_spill] sm:$0xff] }
 0x216   : > { %v10087_v28 = vsel %vm8853_vm15, 4294967295, %v10086_v28  ;;  %vm8866_vm14 = vmpackc.low %vm1303_vm0, %vm1302_vm2  ;;  %vm10098_vm0 = vnez %v10097_v0  ;;  %vm10100_vm2 = vnez %v10099_v33  ;;  %v10110_v0 = vld [vmem:[#allocation82_spill] sm:$0xff]  ;;  %v10235_v50 = vld [vmem:[#allocation31_spill] sm:$0xff] }
 0x217   : > { %10088 = vst [vmem:[#allocation32_spill] sm:$0xff] %v10087_v28  ;;  %v10090_v53 = vsel %vm8866_vm14, 4294967295, %v10089_v53  ;;  %v10101_v28 = vld [vmem:[#allocation141_spill] sm:$0xff] }
 0x218   : > { %10091 = vst [vmem:[#allocation38_spill] sm:$0xff] %v10090_v53  ;;  %v6103_v53 = vld [vmem:[#allocation5 + $0x208] sm:$0xff]  }
 0x219   : > { %5366 = vmatmul.mubr.msk.bf16.gmra.mrb[52].mxu0 %vm8824_vm12, %v8468_v1 }
 0x21a   : > { %5369 = vmatprep.mubr.msk.bf16.mxu0 %vm8831_vm7, %v8490_v35 }
 0x21b   : > { %5606 = vmatmul.mubr.msk.bf16.gmra.mrb[20].mxu1 %vm8824_vm12, %v8555_v51  ;;  %vm10115_vm12 = vnez %v9882_v18 }
 0x21c   : > { %5609 = vmatprep.mubr.msk.bf16.mxu1 %vm8831_vm7, %v8608_v55 }
 0x21e   : > { %v10238_v61 = vld [vmem:[#allocation32_spill] sm:$0xff] }
 0x221   : > { %5370 = vmatmul.mubr.msk.bf16.gmra.mrb[56].mxu0 %vm8846_vm3, %v8492_v2 }
 0x222   : > { %5373 = vmatprep.mubr.msk.bf16.mxu0 %vm8853_vm15, %v8525_v52 }
 0x223   : > { %5610 = vmatmul.mubr.msk.bf16.gmra.mrb[24].mxu1 %vm8846_vm3, %v8625_v16  ;;  %vm10106_vm3 = vcmp.eq.s32.totalorder %v10105_v13, 1  ;;  %v6108_v13 = vld [vmem:[#allocation5 + $0x60] sm:$0xff]  }
 0x224   : > { %5613 = vmatprep.mubr.msk.bf16.mxu1 %vm8853_vm15, %v8676_v10  ;;  %vm10102_vm15 = vnez %v10101_v28 }
 0x229   : > { %5374 = vmatmul.mubr.msk.bf16.gmra.mrb[60].mxu0 %vm8866_vm14, %v8541_v21 }
 0x22a   : > { %5393 = vmatprep.mubr.msk.bf16.mxu0 %vm10093_vm13, %v8327_v44  ;;  %v6104_v44 = vld [vmem:[#allocation5 + $0x50] sm:$0xff]  }
 0x22b   : > { %5614 = vmatmul.mubr.msk.bf16.gmra.mrb[28].mxu1 %vm8866_vm14, %v8697_v38  ;;  %v10103_v38 = vld [vmem:[#allocation83_spill] sm:$0xff] }
 0x22c   : > { %5633 = vmatprep.mubr.msk.bf16.mxu1 %vm10098_vm0, %v10096_v49  ;;  %vm10104_vm14 = vcmp.eq.s32.totalorder %v10103_v38, 1  ;;  %v10109_v49 = vpack.c.bf16 %v10107_v5, %v10108_v57  ;;  %vm10111_vm0 = vnez %v10110_v0  ;;  %v6105_v38 = vld [vmem:[#allocation5 + $0x210] sm:$0xff]   ;;  %v10121_v5 = vld [vmem:[#allocation78_spill] sm:$0xff]  ;;  %v10127_v0 = vld [vmem:[#allocation81_spill] sm:$0xff] }
 0x22d   : > { %vm4888_vm7 = vmpackc.low %vm10106_vm3, %vm10104_vm14  ;;  %vm10116_vm3 = vnez %v9889_v19 }
 0x231   : > { %5394 = vmatmul.mubr.msk.bf16.vlgmr.msra.gmra.mrb[32].mxu0 %vm10100_vm2, %v8365_v54  ;;  %v6106_v54 = vld [vmem:[#allocation5 + $0x58] sm:$0xff]  }
 0x232   : > { %5397 = vmatprep.mubr.msk.bf16.mxu0 %vm10102_vm15, %v8377_v62  ;;  %5426 = vmatpush3.bf16.msra.mxu0 %v6100_v11  ;;  %v10112_v62 = vld [vmem:[#allocation68_spill] sm:$0xff]  ;;  %v10113_v11 = vld [vmem:[#allocation71_spill] sm:$0xff] }
 0x233   : > { %5427 = vmatprep.subr.bf16.mxu0 %v6102_v41  ;;  %5634 = vmatmul.mubr.msk.bf16.vlgmr.msra.gmra.mrb[0].mxu1 %vm10111_vm0, %v10109_v49  ;;  %v10114_v10 = vpack.c.bf16 %v10112_v62, %v10113_v11  ;;  %v10124_v49 = vld [vmem:[#allocation105_spill] sm:$0xff] }
 0x234   : > { %5666 = vmatpush3.bf16.msra.mxu1 %v6101_v26  ;;  %v6107_v26 = vld [vmem:[#allocation5 + $0x218] sm:$0xff]  }
 0x235   : > { %5637 = vmatprep.mubr.msk.bf16.mxu1 %vm4888_vm7, %v10114_v10  ;;  %5667 = vmatprep.subr.bf16.mxu1 %v6103_v53  ;;  %v10119_v10 = vld [vmem:[#allocation109_spill] sm:$0xff] }
 0x236   : > { %5428 = vmatpush3.bf16.msra.mxu0 %v6102_v41  ;;  %v10117_v41 = vld [vmem:[#allocation106_spill] sm:$0xff]  ;;  %vm10120_vm7 = vcmp.eq.s32.totalorder %v10119_v10, 1 }
 0x237   : > { %5429 = vmatprep.subr.bf16.mxu0 %v6104_v44  ;;  %vm10118_vm14 = vcmp.eq.s32.totalorder %v10117_v41, 1  ;;  %v6112_v41 = vld [vmem:[#allocation5 + $0x70] sm:$0xff]   ;;  %v6111_v10 = vld [vmem:[#allocation5 + $0x228] sm:$0xff]  }
 0x238   : > { %5668 = vmatpush3.bf16.msra.mxu1 %v6103_v53  ;;  %vm4894_vm0 = vmpackc.low %vm10120_vm7, %vm10118_vm14  ;;  %v10129_v53 = vld [vmem:[#allocation104_spill] sm:$0xff] }
 0x239   : > { %5398 = vmatmul.mubr.msk.bf16.gmra.mrb[36].mxu0 %vm10115_vm12, %v8395_v31  ;;  %5669 = vmatprep.subr.bf16.mxu1 %v6105_v38  ;;  %v10122_v31 = vld [vmem:[#allocation73_spill] sm:$0xff]  ;;  %vm10125_vm12 = vnez %v10124_v49  ;;  %v10139_v49 = vld [vmem:[#allocation124_spill] sm:$0xff] }
 0x23a   : > { %5401 = vmatprep.mubr.msk.bf16.mxu0 %vm10116_vm3, %v8411_v7  ;;  %5430 = vmatpush3.bf16.msra.mxu0 %v6104_v44  ;;  %v10123_v57 = vpack.c.bf16 %v10121_v5, %v10122_v31  ;;  %v6110_v7 = vld [vmem:[#allocation5 + $0x68] sm:$0xff]   ;;  %v10126_v44 = vld [vmem:[#allocation80_spill] sm:$0xff]  ;;  %vm10130_vm3 = vnez %v10129_v53  ;;  %v10132_v5 = vld [vmem:[#allocation125_spill] sm:$0xff] }
 0x23b   : > { %5431 = vmatprep.subr.bf16.mxu0 %v6106_v54  ;;  %v10128_v62 = vpack.c.bf16 %v10126_v44, %v10127_v0  ;;  %v10136_v31 = vld [vmem:[#allocation88_spill] sm:$0xff]  ;;  %v10142_v44 = vld [vmem:[#allocation93_spill] sm:$0xff] }
 0x23c   : > { %5638 = vmatmul.mubr.msk.bf16.gmra.mrb[4].mxu1 %vm10125_vm12, %v10123_v57  ;;  %vm10133_vm12 = vcmp.eq.s32.totalorder %v10132_v5, 1  ;;  %v10146_v5 = vld [vmem:[#allocation53_spill] sm:$0xff] }
 0x23d   : > { %5641 = vmatprep.mubr.msk.bf16.mxu1 %vm4894_vm0, %v10128_v62  ;;  %5670 = vmatpush3.bf16.msra.mxu1 %v6105_v38  ;;  %v10134_v38 = vld [vmem:[#allocation128_spill] sm:$0xff]  ;;  %vm10140_vm0 = vnez %v10139_v49  ;;  %v10144_v62 = vld [vmem:[#allocation102_spill] sm:$0xff] }
 0x23e   : > { %5432 = vmatpush3.bf16.msra.mxu0 %v6106_v54  ;;  %5671 = vmatprep.subr.bf16.mxu1 %v6107_v26  ;;  %v6109_v54 = vld [vmem:[#allocation5 + $0x220] sm:$0xff]   ;;  %vm10135_vm14 = vcmp.eq.s32.totalorder %v10134_v38, 1 }
 0x23f   : > { %5433 = vmatprep.subr.bf16.mxu0 %v6108_v13  ;;  %vm4900_vm7 = vmpackc.low %vm10135_vm14, %vm10133_vm12  ;;  %vm10145_vm12 = vcmp.eq.s32.totalorder %v10144_v62, 1  ;;  %vm10147_vm14 = vcmp.eq.s32.totalorder %v10146_v5, 1  ;;  %v10149_v38 = vld [vmem:[#allocation97_spill] sm:$0xff]  ;;  %v10183_v62 = vld [vmem:[#allocation64_spill] sm:$0xff] }
 0x240   : > { %v10185_v5 = vld [vmem:[#allocation19_spill] sm:$0xff] }
 0x241   : > { %5402 = vmatmul.mubr.msk.bf16.gmra.mrb[40].mxu0 %vm10130_vm3, %v8413_v9  ;;  %5672 = vmatpush3.bf16.msra.mxu1 %v6107_v26  ;;  %v10137_v9 = vld [vmem:[#allocation79_spill] sm:$0xff] }
 0x242   : > { %5405 = vmatprep.mubr.msk.bf16.mxu0 %vm8464_vm9, %v8424_v36  ;;  %5434 = vmatpush3.bf16.msra.mxu0 %v6108_v13  ;;  %v10138_v57 = vpack.c.bf16 %v10136_v31, %v10137_v9  ;;  %v6114_v36 = vld [vmem:[#allocation5 + $0x78] sm:$0xff]   ;;  %v10141_v13 = vld [vmem:[#allocation89_spill] sm:$0xff]  ;;  %v6113_v26 = vld [vmem:[#allocation5 + $0x230] sm:$0xff]  }
 0x243   : > { %5435 = vmatprep.subr.bf16.mxu0 %v6110_v7  ;;  %5673 = vmatprep.subr.bf16.mxu1 %v6109_v54  ;;  %v10143_v0 = vpack.c.bf16 %v10141_v13, %v10142_v44  ;;  %v10151_v31 = vld [vmem:[#allocation25_spill] sm:$0xff]  ;;  %v10153_v9 = vld [vmem:[#allocation111_spill] sm:$0xff]  ;;  %v10169_v44 = vld [vmem:[#allocation24_spill] sm:$0xff] }
 0x244   : > { %5642 = vmatmul.mubr.msk.bf16.gmra.mrb[8].mxu1 %vm10140_vm0, %v10138_v57  ;;  %vm10152_vm0 = vnez %v10151_v31  ;;  %v10154_v57 = vld [vmem:[#allocation114_spill] sm:$0xff] }
 0x245   : > { %5645 = vmatprep.mubr.msk.bf16.mxu1 %vm4900_vm7, %v10143_v0  ;;  %5674 = vmatpush3.bf16.msra.mxu1 %v6109_v54  ;;  %vm4906_vm7 = vmpackc.low %vm10147_vm14, %vm10145_vm12  ;;  %v10148_v54 = vld [vmem:[#allocation100_spill] sm:$0xff]  ;;  %vm10156_vm12 = vcmp.eq.s32.totalorder %v8539_v45, 1  ;;  %vm10157_vm14 = vcmp.eq.s32.totalorder %v8543_v48, 1  ;;  %v10166_v45 = vld [vmem:[#allocation138_spill] sm:$0xff] }
 0x246   : > { %5436 = vmatpush3.bf16.msra.mxu0 %v6110_v7  ;;  %5675 = vmatprep.subr.bf16.mxu1 %v6111_v10  ;;  %v6115_v7 = vld [vmem:[#allocation5 + $0x238] sm:$0xff]   ;;  %v10167_v48 = vld [vmem:[#allocation139_spill] sm:$0xff]  ;;  %v10195_v31 = vld [vmem:[#allocation62_spill] sm:$0xff] }
 0x247   : > { %5437 = vmatprep.subr.bf16.mxu0 %v6112_v41  ;;  %v10168_v13 = vpack.c.bf16 %v10166_v45, %v10167_v48  ;;  %v10211_v45 = vld [vmem:[#allocation50_spill] sm:$0xff] }
 0x249   : > { %5406 = vmatmul.mubr.msk.bf16.gmra.mrb[44].mxu0 %vm7122_vm4, %v8433_v4  ;;  %5676 = vmatpush3.bf16.msra.mxu1 %v6111_v10  ;;  %v10150_v4 = vpack.c.bf16 %v10148_v54, %v10149_v38  ;;  %v10159_v10 = vld [vmem:[#allocation123_spill] sm:$0xff]  ;;  %v10186_v54 = vpack.c.bf16 %v8274_v47, %v10185_v5  ;;  %v10188_v38 = vld [vmem:[#allocation58_spill] sm:$0xff]  ;;  %v10201_v47 = vld [vmem:[#allocation56_spill] sm:$0xff] }
 0x24a   : > { %5409 = vmatprep.mubr.msk.bf16.mxu0 %vm7142_vm11, %v8449_v60  ;;  %5438 = vmatpush3.bf16.msra.mxu0 %v6112_v41  ;;  %v10155_v60 = vpack.c.bf16 %v10153_v9, %v10154_v57  ;;  %v10158_v41 = vld [vmem:[#allocation122_spill] sm:$0xff]  ;;  %v10197_v9 = vld [vmem:[#allocation28_spill] sm:$0xff] }
 0x24b   : > { %5439 = vmatprep.subr.bf16.mxu0 %v6114_v36  ;;  %5677 = vmatprep.subr.bf16.mxu1 %v6113_v26  ;;  %v10160_v49 = vpack.c.bf16 %v10158_v41, %v10159_v10  ;;  %v10198_v57 = vld [vmem:[#allocation20_spill] sm:$0xff]  ;;  %v10200_v41 = vld [vmem:[#allocation85_spill] sm:$0xff]  ;;  %v10202_v10 = vld [vmem:[#allocation119_spill] sm:$0xff] }
 0x24c   : > { %5646 = vmatmul.mubr.msk.bf16.gmra.mrb[12].mxu1 %vm10152_vm0, %v10150_v4  ;;  %vm4912_vm0 = vmpackc.low %vm10157_vm14, %vm10156_vm12  ;;  %v10191_v4 = vld [vmem:[#allocation36_spill] sm:$0xff] }
 0x24d   : > { %5649 = vmatprep.mubr.msk.bf16.mxu1 %vm4906_vm7, %v10155_v60  ;;  %5678 = vmatpush3.bf16.msra.mxu1 %v6113_v26  ;;  %vm10163_vm7 = vcmp.eq.s32.totalorder %v8613_v25, 1  ;;  %v10180_v25 = vld [vmem:[#allocation143_spill] sm:$0xff]  ;;  %v10181_v26 = vld [vmem:[#allocation94_spill] sm:$0xff]  ;;  %v10199_v60 = vpack.c.bf16 %v10197_v9, %v10198_v57 }
 0x24e   : > { %5440 = vmatpush3.bf16.msra.mxu0 %v6114_v36  ;;  %5679 = vmatprep.subr.bf16.mxu1 %v6115_v7  ;;  %v10205_v36 = vld [vmem:[#allocation116_spill] sm:$0xff] }
 0x251   : > { %5410 = vmatmul.mubr.msk.bf16.gmra.mrb[48].mxu0 %vm7168_vm6, %v8468_v1  ;;  %5680 = vmatpush3.bf16.msra.mxu1 %v6115_v7  ;;  %v10162_v1 = vpack.c.bf16 %v9967_v14, %v9966_v20  ;;  %v10171_v20 = vld [vmem:[#allocation17_spill] sm:$0xff]  ;;  %v10172_v14 = vld [vmem:[#allocation18_spill] sm:$0xff]  ;;  %v10182_v7 = vpack.c.bf16 %v10180_v25, %v10181_v26 }
 0x252   : > { %5413 = vmatprep.mubr.msk.bf16.mxu0 %vm7184_vm1, %v8490_v35  ;;  %v10164_v35 = vld [vmem:[#allocation35_spill] sm:$0xff]  ;;  %v10173_v0 = vpack.c.bf16 %v10171_v20, %v10172_v14 }
 0x253   : > { %vm10165_vm12 = vcmp.eq.s32.totalorder %v10164_v35, 1  ;;  %v10208_v35 = vld [vmem:[#allocation49_spill] sm:$0xff] }
 0x254   : > { %5650 = vmatmul.mubr.msk.bf16.gmra.mrb[16].mxu1 %vm8516_vm10, %v10160_v49  ;;  %vm4918_vm14 = vmpackc.low %vm10165_vm12, %vm10163_vm7  ;;  %vm10170_vm10 = vnez %v10169_v44  ;;  %vm10179_vm12 = vcmp.eq.s32.totalorder %v8683_v6, 1  ;;  %v10193_v6 = vld [vmem:[#allocation61_spill] sm:$0xff]  ;;  %v10204_v49 = vld [vmem:[#allocation55_spill] sm:$0xff] }
 0x255   : > { %5653 = vmatprep.mubr.msk.bf16.mxu1 %vm4912_vm0, %v10162_v1  ;;  %v10207_v1 = vld [vmem:[#allocation65_spill] sm:$0xff] }
 0x259   : > { %5414 = vmatmul.mubr.msk.bf16.gmra.mrb[52].mxu0 %vm9996_vm8, %v8492_v2  ;;  %v10174_v2 = vld [vmem:[#allocation48_spill] sm:$0xff] }
 0x25a   : > { %5417 = vmatprep.mubr.msk.bf16.mxu0 %vm9999_vm5, %v8525_v52  ;;  %vm10175_vm0 = vnez %v10174_v2  ;;  %vm10176_vm5 = vnez %v10015_v34  ;;  %v10177_v52 = vld [vmem:[#allocation42_spill] sm:$0xff] }
 0x25b   : > { %vm10178_vm7 = vcmp.eq.s32.totalorder %v10177_v52, 1 }
 0x25c   : > { %5654 = vmatmul.mubr.msk.bf16.gmra.mrb[20].mxu1 %vm10170_vm10, %v10168_v13  ;;  %vm4924_vm8 = vmpackc.low %vm10179_vm12, %vm10178_vm7  ;;  %vm10184_vm10 = vnez %v10183_v62  ;;  %vm10194_vm7 = vcmp.eq.s32.totalorder %v10193_v6, 1  ;;  %vm10196_vm12 = vcmp.eq.s32.totalorder %v10195_v31, 1 }
 0x25d   : > { %5657 = vmatprep.mubr.msk.bf16.mxu1 %vm4918_vm14, %v10173_v0  ;;  %vm10189_vm14 = vnez %v10188_v38 }
 0x261   : > { %5418 = vmatmul.mubr.msk.bf16.gmra.mrb[56].mxu0 %vm10175_vm0, %v8541_v21  ;;  %v10187_v21 = vld [vmem:[#allocation133_spill] sm:$0xff]  ;;  %vm4927_vm0 = vmpackc.low %vm10196_vm12, %vm10194_vm7  ;;  %vm10214_vm7 = vnez %v9889_v19  ;;  %vm10220_vm12 = vnez %v10069_v46  ;;  %v10221_v19 = vld [vmem:[#allocation84_spill] sm:$0xff] }
 0x262   : > { %5421 = vmatprep.mubr.msk.bf16.mxu0 %vm10176_vm5, %v8281_v40  ;;  %v10190_v40 = vld [vmem:[#allocation126_spill] sm:$0xff]  ;;  %vm10192_vm5 = vnez %v10191_v4  ;;  %v10242_v46 = vld [vmem:[#allocation29_spill] sm:$0xff] }
 0x264   : > { %5658 = vmatmul.mubr.msk.bf16.gmra.mrb[24].mxu1 %vm10184_vm10, %v10182_v7  ;;  %vm10213_vm10 = vnez %v9882_v18  ;;  %v10219_v18 = vld [vmem:[#allocation87_spill] sm:$0xff] }
 0x265   : > { %5661 = vmatprep.mubr.msk.bf16.mxu1 %vm4924_vm8, %v10186_v54  ;;  %vm10203_vm8 = vnez %v10202_v10 }
 0x269   : > { %5422 = vmatmul.mubr.msk.bf16.gmra.mrb[60].mxu0 %vm10189_vm14, %v10187_v21 }
 0x26a   : > { %5441 = vmatprep.mubr.msk.bf16.mxu0 %vm10192_vm5, %v10190_v40  ;;  %vm10206_vm5 = vnez %v10205_v36 }
 0x26c   : > { %5662 = vmatmul.mubr.msk.bf16.gmra.mrb[28].mxu1 %vm4927_vm0, %v10199_v60  ;;  %vm10209_vm0 = vnez %v10208_v35 }
 0x26d   : > { %5681 = vmatprep.mubr.msk.bf16.mxu1 %vm10093_vm13, %v10200_v41  ;;  %vm10212_vm13 = vnez %v10211_v45 }
 0x271   : > { %5442 = vmatmul.mubr.msk.bf16.vlgmr.msra.gmra.mrb[32].mxu0 %vm10203_vm8, %v10201_v47  ;;  %vm10222_vm8 = vnez %v10072_v32 }
 0x272   : > { %5445 = vmatprep.mubr.msk.bf16.mxu0 %vm10206_vm5, %v10204_v49  ;;  %vm10231_vm5 = vnez %v9995_v59  ;;  %v10245_v59 = vld [vmem:[#allocation38_spill] sm:$0xff] }
 0x274   : > { %5682 = vmatmul.mubr.msk.bf16.vlgmr.msra.gmra.mrb[0].mxu1 %vm10100_vm2, %v10059_v43  ;;  %v10215_v43 = vld [vmem:[#allocation77_spill] sm:$0xff]  ;;  %vm10216_vm2 = vnez %v10061_v27  ;;  %v10223_v27 = vld [vmem:[#allocation99_spill] sm:$0xff] }
 0x275   : > { %5685 = vmatprep.mubr.msk.bf16.mxu1 %vm10102_vm15, %v10062_v3  ;;  %v10217_v3 = vld [vmem:[#allocation75_spill] sm:$0xff]  ;;  %vm10218_vm15 = vnez %v10064_v30 }
 0x279   : > { %5446 = vmatmul.mubr.msk.bf16.gmra.mrb[36].mxu0 %vm10209_vm0, %v10207_v1  ;;  %vm10239_vm0 = vnez %v10238_v61 }
 0x27a   : > { %5449 = vmatprep.mubr.msk.bf16.mxu0 %vm10212_vm13, %v10210_v24  ;;  %vm10241_vm13 = vnez %v10174_v2 }
 0x27c   : > { %5686 = vmatmul.mubr.msk.bf16.gmra.mrb[4].mxu1 %vm10213_vm10, %v10067_v29  ;;  %v10225_v29 = vld [vmem:[#allocation96_spill] sm:$0xff]  ;;  %vm10243_vm10 = vnez %v10015_v34 }
 0x27d   : > { %5689 = vmatprep.mubr.msk.bf16.mxu1 %vm10214_vm7, %v10070_v63  ;;  %vm10246_vm7 = vnez %v10245_v59 }
 0x281   : > { %5450 = vmatmul.mubr.msk.bf16.gmra.mrb[40].mxu0 %vm10216_vm2, %v10215_v43 }
 0x282   : > { %5453 = vmatprep.mubr.msk.bf16.mxu0 %vm10218_vm15, %v10217_v3 }
 0x284   : > { %5690 = vmatmul.mubr.msk.bf16.gmra.mrb[8].mxu1 %vm10130_vm3, %v10073_v39  ;;  %vm10224_vm3 = vnez %v10075_v15 }
 0x285   : > { %5693 = vmatprep.mubr.msk.bf16.mxu1 %vm8464_vm9, %v10076_v17  ;;  %vm10226_vm9 = vnez %v10078_v56 }
 0x289   : > { %5454 = vmatmul.mubr.msk.bf16.gmra.mrb[44].mxu0 %vm10220_vm12, %v10219_v18 }
 0x28a   : > { %5457 = vmatprep.mubr.msk.bf16.mxu0 %vm10222_vm8, %v10221_v19 }
 0x28c   : > { %5694 = vmatmul.mubr.msk.bf16.gmra.mrb[12].mxu1 %vm7122_vm4, %v8337_v23  ;;  %v10227_v23 = vld [vmem:[#allocation110_spill] sm:$0xff]  ;;  %vm10228_vm4 = vnez %v10080_v22 }
 0x28d   : > { %5697 = vmatprep.mubr.msk.bf16.mxu1 %vm7142_vm11, %v8532_v8  ;;  %v10229_v8 = vld [vmem:[#allocation107_spill] sm:$0xff]  ;;  %vm10230_vm11 = vnez %v10082_v42 }
 0x291   : > { %5458 = vmatmul.mubr.msk.bf16.gmra.mrb[48].mxu0 %vm10224_vm3, %v10223_v27 }
 0x292   : > { %5461 = vmatprep.mubr.msk.bf16.mxu0 %vm10226_vm9, %v10225_v29 }
 0x294   : > { %5698 = vmatmul.mubr.msk.bf16.gmra.mrb[16].mxu1 %vm7168_vm6, %v8555_v51  ;;  %vm10233_vm6 = vnez %v9998_v58  ;;  %v10234_v51 = vld [vmem:[#allocation121_spill] sm:$0xff] }
 0x295   : > { %5701 = vmatprep.mubr.msk.bf16.mxu1 %vm7184_vm1, %v8608_v55  ;;  %vm10236_vm1 = vnez %v10235_v50  ;;  %v10240_v55 = vld [vmem:[#allocation43_spill] sm:$0xff]  ;;  %v10247_v58 = vld [vmem:[#allocation69_spill] sm:$0xff] }
 0x299   : > { %5462 = vmatmul.mubr.msk.bf16.gmra.mrb[52].mxu0 %vm10228_vm4, %v10227_v23 }
 0x29a   : > { %5465 = vmatprep.mubr.msk.bf16.mxu0 %vm10230_vm11, %v10229_v8 }
 0x29c   : > { %5702 = vmatmul.mubr.msk.bf16.gmra.mrb[20].mxu1 %vm10231_vm5, %v8625_v16  ;;  %v10244_v16 = vld [vmem:[#allocation129_spill] sm:$0xff] }
 0x29d   : > { %5705 = vmatprep.mubr.msk.bf16.mxu1 %vm10233_vm6, %v10232_v12 }
 0x2a1   : > { %5466 = vmatmul.mubr.msk.bf16.gmra.mrb[56].mxu0 %vm10236_vm1, %v10234_v51 }
 0x2a2   : > { %5469 = vmatprep.mubr.msk.bf16.mxu0 %vm10239_vm0, %v10237_v37 }
 0x2a4   : > { %5706 = vmatmul.mubr.msk.bf16.gmra.mrb[24].mxu1 %vm10241_vm13, %v10240_v55 }
 0x2a5   : > { %5709 = vmatprep.mubr.msk.bf16.mxu1 %vm10243_vm10, %v10242_v46 }
 0x2a9   : > { %5470 = vmatmul.mubr.msk.bf16.gmra.mrb[60].mxu0 %vm10246_vm7, %v10244_v16 }
 0x2ac   : > { %5710 = vmatmul.mubr.msk.bf16.gmra.mrb[28].mxu1 %vm10189_vm14, %v10247_v58 }
 0x344   : > { %v5443_v30 = vpop.f32.mrb[32].mxu0 }
 0x345   : > { %v2464_v63 = vpop.f32.mrb[33].mxu0 }
 0x346   : > { %v5444_v32 = vpop.f32.mrb[34].mxu0 }
 0x347   : > { %v2467_v39 = vpop.f32.mrb[35].mxu0  ;;  %v5683_v15 = vpop.f32.mrb[0].mxu1 }
 0x348   : > { %v5713_v17 = vadd.f32 %v5683_v15, %v5443_v30  ;;  %v4219_v56 = vpop.f32.mrb[1].mxu1 }
 0x349   : > { %v5714_v34 = vadd.f32 %v4219_v56, %v2464_v63  ;;  %v5684_v42 = vpop.f32.mrb[2].mxu1 }
 0x34a   : > { %4380 = vst [vmem:[%s9122_s22 + $0x10] sm:$0xff] %v5713_v17  ;;  %v5715_v28 = vadd.f32 %v5684_v42, %v5444_v32  ;;  %v4222_v53 = vpop.f32.mrb[3].mxu1 }
 0x34b   : > { %4378 = vst [vmem:[%s9122_s22] sm:$0xff] %v5714_v34  ;;  %v5716_v11 = vadd.f32 %v4222_v53, %v2467_v39 }
 0x34c   : > { %v5447_v22 = vpop.f32.mrb[36].mxu0  ;;  %4381 = vst [vmem:[%s9122_s22 + $0x18] sm:$0xff] %v5715_v28 }
 0x34d   : > { %v2480_v33 = vpop.f32.mrb[37].mxu0  ;;  %4379 = vst [vmem:[%s9122_s22 + $0x8] sm:$0xff] %v5716_v11 }
 0x34e   : > { %v5448_v48 = vpop.f32.mrb[38].mxu0 }
 0x34f   : > { %v2483_v13 = vpop.f32.mrb[39].mxu0  ;;  %v5687_v44 = vpop.f32.mrb[4].mxu1 }
 0x350   : > { %v5717_v20 = vadd.f32 %v5687_v44, %v5447_v22  ;;  %v4235_v14 = vpop.f32.mrb[5].mxu1 }
 0x351   : > { %v5718_v0 = vadd.f32 %v4235_v14, %v2480_v33  ;;  %v5688_v52 = vpop.f32.mrb[6].mxu1 }
 0x352   : > { %4384 = vst [vmem:[%s9122_s22 + $0x30] sm:$0xff] %v5717_v20  ;;  %v5719_v25 = vadd.f32 %v5688_v52, %v5448_v48  ;;  %v4238_v7 = vpop.f32.mrb[7].mxu1 }
 0x353   : > { %4382 = vst [vmem:[%s9122_s22 + $0x20] sm:$0xff] %v5718_v0  ;;  %v5720_v62 = vadd.f32 %v4238_v7, %v2483_v13 }
 0x354   : > { %v5451_v2 = vpop.f32.mrb[40].mxu0  ;;  %4385 = vst [vmem:[%s9122_s22 + $0x38] sm:$0xff] %v5719_v25 }
 0x355   : > { %v2496_v26 = vpop.f32.mrb[41].mxu0  ;;  %4383 = vst [vmem:[%s9122_s22 + $0x28] sm:$0xff] %v5720_v62 }
 0x356   : > { %v5452_v5 = vpop.f32.mrb[42].mxu0 }
 0x357   : > { %v2499_v54 = vpop.f32.mrb[43].mxu0  ;;  %v5691_v21 = vpop.f32.mrb[8].mxu1 }
 0x358   : > { %v5721_v38 = vadd.f32 %v5691_v21, %v5451_v2  ;;  %v4251_v40 = vpop.f32.mrb[9].mxu1 }
 0x359   : > { %v5722_v4 = vadd.f32 %v4251_v40, %v2496_v26  ;;  %v5692_v31 = vpop.f32.mrb[10].mxu1 }
 0x35a   : > { %4388 = vst [vmem:[%s9122_s22 + $0x50] sm:$0xff] %v5721_v38  ;;  %v5723_v9 = vadd.f32 %v5692_v31, %v5452_v5  ;;  %v4254_v60 = vpop.f32.mrb[11].mxu1 }
 0x35b   : > { %4386 = vst [vmem:[%s9122_s22 + $0x40] sm:$0xff] %v5722_v4  ;;  %v5724_v41 = vadd.f32 %v4254_v60, %v2499_v54 }
 0x35c   : > { %v5455_v6 = vpop.f32.mrb[44].mxu0  ;;  %4389 = vst [vmem:[%s9122_s22 + $0x58] sm:$0xff] %v5723_v9 }
 0x35d   : > { %v2512_v57 = vpop.f32.mrb[45].mxu0  ;;  %4387 = vst [vmem:[%s9122_s22 + $0x48] sm:$0xff] %v5724_v41 }
 0x35e   : > { %v5456_v47 = vpop.f32.mrb[46].mxu0 }
 0x35f   : > { %v2515_v10 = vpop.f32.mrb[47].mxu0  ;;  %v5695_v49 = vpop.f32.mrb[12].mxu1 }
 0x360   : > { %v5725_v36 = vadd.f32 %v5695_v49, %v5455_v6  ;;  %v4267_v1 = vpop.f32.mrb[13].mxu1 }
 0x361   : > { %v5726_v35 = vadd.f32 %v4267_v1, %v2512_v57  ;;  %v5696_v45 = vpop.f32.mrb[14].mxu1 }
 0x362   : > { %4392 = vst [vmem:[%s9122_s22 + $0x70] sm:$0xff] %v5725_v36  ;;  %v5727_v43 = vadd.f32 %v5696_v45, %v5456_v47  ;;  %v4270_v18 = vpop.f32.mrb[15].mxu1 }
 0x363   : > { %4390 = vst [vmem:[%s9122_s22 + $0x60] sm:$0xff] %v5726_v35  ;;  %v5728_v19 = vadd.f32 %v4270_v18, %v2515_v10 }
 0x364   : > { %v5459_v24 = vpop.f32.mrb[48].mxu0  ;;  %4393 = vst [vmem:[%s9122_s22 + $0x78] sm:$0xff] %v5727_v43 }
 0x365   : > { %v2528_v3 = vpop.f32.mrb[49].mxu0  ;;  %4391 = vst [vmem:[%s9122_s22 + $0x68] sm:$0xff] %v5728_v19 }
 0x366   : > { %v5460_v27 = vpop.f32.mrb[50].mxu0 }
 0x367   : > { %v2531_v29 = vpop.f32.mrb[51].mxu0  ;;  %v5699_v23 = vpop.f32.mrb[16].mxu1 }
 0x368   : > { %v5729_v8 = vadd.f32 %v5699_v23, %v5459_v24  ;;  %v4283_v12 = vpop.f32.mrb[17].mxu1 }
 0x369   : > { %v5730_v51 = vadd.f32 %v4283_v12, %v2528_v3  ;;  %v5700_v37 = vpop.f32.mrb[18].mxu1 }
 0x36a   : > { %4396 = vst [vmem:[%s9122_s22 + $0x90] sm:$0xff] %v5729_v8  ;;  %v5731_v61 = vadd.f32 %v5700_v37, %v5460_v27  ;;  %v4286_v46 = vpop.f32.mrb[19].mxu1 }
 0x36b   : > { %4394 = vst [vmem:[%s9122_s22 + $0x80] sm:$0xff] %v5730_v51  ;;  %v5732_v16 = vadd.f32 %v4286_v46, %v2531_v29 }
 0x36c   : > { %v5463_v50 = vpop.f32.mrb[52].mxu0  ;;  %4397 = vst [vmem:[%s9122_s22 + $0x98] sm:$0xff] %v5731_v61 }
 0x36d   : > { %v2544_v55 = vpop.f32.mrb[53].mxu0  ;;  %4395 = vst [vmem:[%s9122_s22 + $0x88] sm:$0xff] %v5732_v16 }
 0x36e   : > { %v5464_v59 = vpop.f32.mrb[54].mxu0 }
 0x36f   : > { %v2547_v58 = vpop.f32.mrb[55].mxu0  ;;  %v5703_v30 = vpop.f32.mrb[20].mxu1 }
 0x370   : > { %v5733_v63 = vadd.f32 %v5703_v30, %v5463_v50  ;;  %v4299_v32 = vpop.f32.mrb[21].mxu1 }
 0x371   : > { %v5734_v39 = vadd.f32 %v4299_v32, %v2544_v55  ;;  %v5704_v17 = vpop.f32.mrb[22].mxu1 }
 0x372   : > { %4400 = vst [vmem:[%s9122_s22 + $0xb0] sm:$0xff] %v5733_v63  ;;  %v5735_v56 = vadd.f32 %v5704_v17, %v5464_v59  ;;  %v4302_v22 = vpop.f32.mrb[23].mxu1 }
 0x373   : > { %4398 = vst [vmem:[%s9122_s22 + $0xa0] sm:$0xff] %v5734_v39  ;;  %v5736_v42 = vadd.f32 %v4302_v22, %v2547_v58 }
 0x374   : > { %v5467_v15 = vpop.f32.mrb[56].mxu0  ;;  %4401 = vst [vmem:[%s9122_s22 + $0xb8] sm:$0xff] %v5735_v56 }
 0x375   : > { %v2560_v34 = vpop.f32.mrb[57].mxu0  ;;  %4399 = vst [vmem:[%s9122_s22 + $0xa8] sm:$0xff] %v5736_v42 }
 0x376   : > { %v5468_v28 = vpop.f32.mrb[58].mxu0 }
 0x377   : > { %v2563_v33 = vpop.f32.mrb[59].mxu0  ;;  %v5707_v53 = vpop.f32.mrb[24].mxu1 }
 0x378   : > { %v5737_v11 = vadd.f32 %v5707_v53, %v5467_v15  ;;  %v4315_v48 = vpop.f32.mrb[25].mxu1 }
 0x379   : > { %v5738_v13 = vadd.f32 %v4315_v48, %v2560_v34  ;;  %v5708_v20 = vpop.f32.mrb[26].mxu1 }
 0x37a   : > { %4404 = vst [vmem:[%s9122_s22 + $0xd0] sm:$0xff] %v5737_v11  ;;  %v5739_v14 = vadd.f32 %v5708_v20, %v5468_v28  ;;  %v4318_v2 = vpop.f32.mrb[27].mxu1 }
 0x37b   : > { %4402 = vst [vmem:[%s9122_s22 + $0xc0] sm:$0xff] %v5738_v13  ;;  %v5740_v52 = vadd.f32 %v4318_v2, %v2563_v33 }
 0x37c   : > { %v5471_v44 = vpop.f32.mrb[60].mxu0  ;;  %4405 = vst [vmem:[%s9122_s22 + $0xd8] sm:$0xff] %v5739_v14 }
 0x37d   : > { %v2576_v0 = vpop.f32.mrb[61].mxu0  ;;  %4403 = vst [vmem:[%s9122_s22 + $0xc8] sm:$0xff] %v5740_v52 }
 0x37e   : > { %v5472_v25 = vpop.f32.mrb[62].mxu0 }
 0x37f   : > { %v2579_v26 = vpop.f32.mrb[63].mxu0  ;;  %v5711_v7 = vpop.f32.mrb[28].mxu1 }
 0x380   : > { %v5741_v62 = vadd.f32 %v5711_v7, %v5471_v44  ;;  %v4331_v5 = vpop.f32.mrb[29].mxu1 }
 0x381   : > { %v5742_v54 = vadd.f32 %v4331_v5, %v2576_v0  ;;  %v5712_v21 = vpop.f32.mrb[30].mxu1 }
 0x382   : > { %4408 = vst [vmem:[%s9122_s22 + $0xf0] sm:$0xff] %v5741_v62  ;;  %v5743_v38 = vadd.f32 %v5712_v21, %v5472_v25  ;;  %v4334_v40 = vpop.f32.mrb[31].mxu1 }
 0x383   : > { %4406 = vst [vmem:[%s9122_s22 + $0xe0] sm:$0xff] %v5742_v54  ;;  %v5744_v4 = vadd.f32 %v4334_v40, %v2579_v26 }
 0x384   : > { %4409 = vst [vmem:[%s9122_s22 + $0xf8] sm:$0xff] %v5743_v38 }
 0x385   : > { %4407 = vst [vmem:[%s9122_s22 + $0xe8] sm:$0xff] %v5744_v4 }
 0x386   : > { %6220 = shalt.err (!%p6217_p11)
}
 0x387   : > { %s6221_s29 = scalar_lea.hbm %s9158_s26, 4096  ;;  %s6225_s18 = scalar_lea.hbm %s9216_s8, 8192 }
 0x388   : > { %p6222_p13 = scmp.ne.s32.totalorder %s9158_s26, %s6221_s29  ;;  %p6226_p6 = scmp.lt.u32.totalorder %s9158_s26, %s9216_s8 }
 0x389   : > { %p6227_p9 = scmp.lt.u32.totalorder %s6225_s18, %s6221_s29  ;;  %p6229_p10 = scmp.lt.u32.totalorder %s6221_s29, %s9158_s26 }
 0x38a   : > { %p6223_p5 = pnand %p6222_p13, %p10248_p1 }
 0x38b   : > { %p6228_p12 = por %p6227_p9, %p6226_p6 }
 0x38c   : > { %p6224_p0 = pneg %p6223_p5 }
 0x38d   : > { %p6230_p2 = por %p6229_p10, %p6228_p12 }
 0x38f   : > { %p6231_p3 = pnand %p6230_p2, %p6224_p0 }
 0x391   : > { %6234 = shalt.err (!%p6231_p3)
}
 0x392   : > { %s6285_s21 = smov 128   ;;  %s6286_s24 = smov 8  }
 0x393   : > { %5977 = dma.vmem_to_hbm [thread:$0]  (%p10248_p1), %s9160_s23, 4096, %s9158_s26, %s9167_s9, %s6285_s21, %s6285_s21, %s6286_s24  }
 0x394 PF: > { %p5994_p4 = scmp.ge.s32.totalorder %s6277_s30, 2  ;;  %s4439_s25 = sand.u32 1, %s6265_s27  }
 0x395   : > { %p10249_p7 = scmp.ne.s32.totalorder %s9491_s16, 0  ;;  %s4440_s10 = scalar_lea.sflag [#allocation4], %s4439_s25 }
 0x397   : > { %p5987_p8 = pnand %p5994_p4, %p10249_p7 }
 0x399   : > { %6260 = dma.done.wait (!%p5987_p8), %s4440_s10, 4096  }
 0x39a   : > { %6262 = vsyncadd (!%p5987_p8), %s4440_s10, 4294963200  ;;  %s10250_s12 = sld [smem:[#allocation11_spill]]  ;;  %s10251_s29 = sld [smem:[#allocation12_spill]] }
 0x39b   : > { %p20_p11 = scmp.ge.s32.totalorder %s6357_s11, 4   ;;  %s10252_s27 = smov %s6269_s28 }
 0x39c   : > { %s10254_s30 = smov %s6357_s11 }
 0x39d   :  { %22 = sbr.rel (!%p20_p11) target bundleno = 5 (0x5), region = 104 }
 0x3a0   : > { %s10253_s28 = smov %s10250_s12 }
 0x3a4   :  { %4445 = vsyncpa [#allocation3], 1 }
 0x3a5   :  { %4447 = vsyncpa [#allocation3 + $0x1], 1 }
 0x3a6   :  { %4448 = vsyncpa [#allocation6], 1 }
 0x3a7   :  { %4449 = vsyncpa [#allocation4], 1 }
 0x3a8   :  { %4451 = vsyncpa [#allocation4 + $0x1], 1 }

</bundles_post_ra>
